<compile_context>
chip_gen: v5e
topology: v5e:2x2
jax: 0.10.0
libtpu: 0.0.40
codegen_flags: <defaults>
</compile_context>

<pallas_src>
import numpy as np
import jax
import jax.numpy as jnp
from jax import lax
from jax.experimental import pallas as pl
from jax.experimental.pallas import tpu as pltpu

IMG_HEIGHT = 32          # small-shape instantiation of the module
IMG_WIDTH = 32
IN_CHANNELS = 3
BASE_CHANNELS = 16
BATCH = 2
NEG_SLOPE = 0.2

CIN_PAD = 4              # zero-pad the 3 input channels to 4 (zero weight rows)
P1 = 8                   # width phases of the layer-1 input (halves every layer)
S = IMG_WIDTH // P1      # per-phase plane width, constant across layers (= 4)
SUB = BATCH * S          # images * plane width folded into the sublane axis (= 8)

C1 = BASE_CHANNELS       # 16
C2 = BASE_CHANNELS * 2   # 32
C3 = BASE_CHANNELS * 4   # 64
K1 = 16 * CIN_PAD        # 64
K2 = 16 * C1             # 256
K3 = 16 * C2             # 512
HF = IMG_HEIGHT // 8     # 4

assert SUB == 8 and IMG_HEIGHT % 8 == 0 and IMG_WIDTH % 8 == 0


# ----------------------------------------------------------------------------
# In-kernel helpers
# ----------------------------------------------------------------------------
def _leaky(y):
    return jnp.where(y >= 0.0, y, NEG_SLOPE * y)


def _conv_block(ext, w, bvec, p_out, cin):
    """Conv2d(4x4, stride 2, pad 1) + bias + LeakyReLU on a phase-decomposed input.

    ext : (Hi, SUB, (2*p_out+2)*cin) bf16  -- width-phase slots on the lane axis
    w   : (16*cin, cout) bf16
    bvec: (1, cout) f32
    returns (p_out, Hi//2, SUB, cout) f32 -- output width phases, leading dim
    """
    hi = ext.shape[0]
    ho = hi // 2
    lanes = ext.shape[2]
    # Height zero-pad on the (free) leading dim + even/odd row split (free).
    zrow = jnp.zeros((1, SUB, lanes), ext.dtype)
    ep = jnp.concatenate([zrow, ext, zrow], axis=0).reshape(ho + 1, 2, SUB, lanes)
    cols = []
    for r in range(p_out):
        # The 4 kw taps of output phase r are lane slots 2r .. 2r+3.
        sl = ep[:, :, :, 2 * r * cin:(2 * r + 4) * cin]       # (ho+1, 2, SUB, 4cin)
        taps = [sl[(i // 2):(i // 2) + ho, i % 2] for i in range(4)]
        cols.append(jnp.concatenate(taps, axis=-1))           # (ho, SUB, 16cin)
    cols = jnp.stack(cols, axis=0).reshape(p_out * ho * SUB, 16 * cin)
    y = jnp.dot(cols, w, preferred_element_type=jnp.float32) + bvec
    return _leaky(y).reshape(p_out, ho, SUB, -1)


def _to_ext(planes):
    """(p, H, SUB, C) f32 phase planes -> (H, SUB, (p+2)*C) bf16 slot array."""
    p, h, _, c = planes.shape
    planes = planes.astype(jnp.bfloat16)
    sub = lax.broadcasted_iota(jnp.int32, (1, SUB, 1), 1) % S
    zc = jnp.zeros((h, 1, c), planes.dtype)
    # slot 0: last phase shifted right by one plane position (zero at s == 0)
    last = planes[p - 1]
    right = jnp.concatenate([zc, last[:, :SUB - 1, :]], axis=1)
    right = jnp.where(sub == 0, 0.0, right)          # kill cross-image leak
    # slot p+1: phase 0 shifted left by one plane position (zero at s == S-1)
    first = planes[0]
    left = jnp.concatenate([first[:, 1:, :], zc], axis=1)
    left = jnp.where(sub == S - 1, 0.0, left)
    pieces = [right] + [planes[k] for k in range(p)] + [left]
    return jnp.concatenate(pieces, axis=-1)


# ----------------------------------------------------------------------------
# Fused whole-network kernel (single grid step, both images folded in)
# ----------------------------------------------------------------------------
def _discriminator_kernel(ext1_ref, wpack_ref, bias_ref, lw_ref, o_ref):
    a1 = _conv_block(ext1_ref[...], wpack_ref[0:K1, 0:C1],
                     bias_ref[0:1, 0:C1], 4, CIN_PAD)                # (4,16,8,16)
    a2 = _conv_block(_to_ext(a1), wpack_ref[K1:K1 + K2, 0:C2],
                     bias_ref[1:2, 0:C2], 2, C1)                     # (2, 8,8,32)
    a3 = _conv_block(_to_ext(a2), wpack_ref[K1 + K2:K1 + K2 + K3, 0:C3],
                     bias_ref[2:3, 0:C3], 1, C2)                     # (1, 4,8,64)
    # Final Linear fused as multiply + per-image masked full reductions.
    prod = a3[0] * lw_ref[...]                                       # (4, 8, 64) f32
    sub = lax.broadcasted_iota(jnp.int32, (1, SUB, 1), 1)
    s0 = jnp.sum(jnp.where(sub < S, prod, 0.0))
    s1 = jnp.sum(jnp.where(sub < S, 0.0, prod))
    rows = lax.broadcasted_iota(jnp.int32, (8, 128), 0)
    out = jnp.where(rows == 0, s0, jnp.where(rows == 1, s1, 0.0))
    o_ref[...] = out + bias_ref[3:4, 0:1]                            # lane-dense store


# ----------------------------------------------------------------------------
# Wrapper: width-phase decomposition of the input + the pallas_call
# ----------------------------------------------------------------------------
def _build_input_ext(x_nchw):
    b, cin, h, w = x_nchw.shape
    x = jnp.transpose(x_nchw, (0, 2, 3, 1))                          # NCHW -> NHWC
    x = jnp.pad(x, ((0, 0), (0, 0), (0, 0), (0, CIN_PAD - cin)))
    xr = x.reshape(b, h, S, P1, CIN_PAD)                             # col = s*P1 + phase
    main = jnp.transpose(xr, (1, 0, 2, 3, 4)).reshape(h, b * S, P1 * CIN_PAD)
    plast = xr[:, :, :, P1 - 1, :]                                   # last phase
    right = jnp.concatenate(
        [jnp.zeros_like(plast[:, :, :1, :]), plast[:, :, :-1, :]], axis=2)
    right = jnp.transpose(right, (1, 0, 2, 3)).reshape(h, b * S, CIN_PAD)
    p0 = xr[:, :, :, 0, :]                                           # phase 0
    left = jnp.concatenate(
        [p0[:, :, 1:, :], jnp.zeros_like(p0[:, :, :1, :])], axis=2)
    left = jnp.transpose(left, (1, 0, 2, 3)).reshape(h, b * S, CIN_PAD)
    return jnp.concatenate([right, main, left], axis=-1).astype(jnp.bfloat16)


def vqgan_discriminator_forward(x_nchw, params):
    b = x_nchw.shape[0]
    assert b == BATCH and b * S == SUB
    ext1 = _build_input_ext(x_nchw)                                  # (32, 8, 40) bf16
    wpack = params["wpack"]
    biaspack = params["biaspack"]
    lw = params["lw"]
    out = pl.pallas_call(
        _discriminator_kernel,
        out_shape=jax.ShapeDtypeStruct((8, 128), jnp.float32),
        grid=(1,),
        in_specs=[
            pl.BlockSpec(ext1.shape, lambda i: (0, 0, 0)),
            pl.BlockSpec(wpack.shape, lambda i: (0, 0)),
            pl.BlockSpec(biaspack.shape, lambda i: (0, 0)),
            pl.BlockSpec(lw.shape, lambda i: (0, 0, 0)),
        ],
        out_specs=pl.BlockSpec((8, 128), lambda i: (0, 0)),
        compiler_params=pltpu.CompilerParams(
            dimension_semantics=("arbitrary",)),
    )(ext1, wpack, biaspack, lw)
    return out[0:b, 0:1]


# ----------------------------------------------------------------------------
# Parameter init (PyTorch layout) + one-time kernel-layout preparation
# ----------------------------------------------------------------------------
def init_params(key, in_channels, base_channels, img_h, img_w):
    keys = jax.random.split(key, 8)
    chans = [in_channels, base_channels, base_channels * 2, base_channels * 4]
    convs = []
    for i in range(3):
        fan_in = chans[i] * 4 * 4
        w = jax.random.normal(keys[2 * i], (chans[i + 1], chans[i], 4, 4),
                              jnp.float32) / jnp.sqrt(fan_in)
        b = jax.random.normal(keys[2 * i + 1], (chans[i + 1],),
                              jnp.float32) * 0.01
        convs.append((w, b))
    lin_in = base_channels * 4 * (img_h // 8) * (img_w // 8)
    lin_w = jax.random.normal(keys[6], (1, lin_in), jnp.float32) / jnp.sqrt(lin_in)
    lin_b = jnp.zeros((1,), jnp.float32)
    return {"convs": convs, "lin_w": lin_w, "lin_b": lin_b}


def prepare_params(raw):
    """One-time transform of PyTorch-layout params into the packed kernel layout."""
    wmats, bvecs = [], []
    for idx, (w, b) in enumerate(raw["convs"]):
        cout, cin, kh, kw = w.shape
        if idx == 0:
            w = jnp.pad(w, ((0, 0), (0, CIN_PAD - cin), (0, 0), (0, 0)))
            cin = CIN_PAD
        wmat = jnp.transpose(w, (2, 3, 1, 0)).reshape(kh * kw * cin, cout)
        wmats.append(wmat)
        bvecs.append(b)
    wpack = jnp.zeros((K1 + K2 + K3, C3), jnp.float32)
    wpack = wpack.at[0:K1, 0:C1].set(wmats[0])
    wpack = wpack.at[K1:K1 + K2, 0:C2].set(wmats[1])
    wpack = wpack.at[K1 + K2:K1 + K2 + K3, 0:C3].set(wmats[2])
    wpack = wpack.astype(jnp.bfloat16)

    biaspack = jnp.zeros((8, 128), jnp.float32)
    biaspack = biaspack.at[0, 0:C1].set(bvecs[0])
    biaspack = biaspack.at[1, 0:C2].set(bvecs[1])
    biaspack = biaspack.at[2, 0:C3].set(bvecs[2])
    biaspack = biaspack.at[3, 0].set(raw["lin_b"][0])

    wf = IMG_WIDTH // 8
    lw = raw["lin_w"].reshape(C3, HF, wf)                 # PyTorch flatten: (c, h, w)
    lw = jnp.transpose(lw, (1, 2, 0))                     # (h, w, c)
    lw = jnp.broadcast_to(lw[:, None, :, :], (HF, BATCH, wf, C3))
    lw = lw.reshape(HF, BATCH * wf, C3).astype(jnp.float32)
    return {"wpack": wpack, "biaspack": biaspack, "lw": lw}


# ----------------------------------------------------------------------------
# Pure-JAX reference (exact PyTorch semantics) for correctness cross-check
# ----------------------------------------------------------------------------
def reference_forward(x_nchw, params):
    y = x_nchw
    for (w, b) in params["convs"]:
        y = jax.lax.conv_general_dilated(
            y, w, window_strides=(2, 2), padding=((1, 1), (1, 1)),
            dimension_numbers=("NCHW", "OIHW", "NCHW"),
            precision=jax.lax.Precision.HIGHEST)
        y = y + b[None, :, None, None]
        y = jnp.where(y >= 0.0, y, NEG_SLOPE * y)
    bsz = y.shape[0]
    y = y.reshape(bsz, -1)
    return jnp.dot(y, params["lin_w"].T,
                   precision=jax.lax.Precision.HIGHEST) + params["lin_b"]


if __name__ == "__main__":
    key = jax.random.PRNGKey(0)
    k_x, k_p = jax.random.split(key)
    x = jax.random.normal(k_x, (BATCH, IN_CHANNELS, IMG_HEIGHT, IMG_WIDTH),
                          jnp.float32)
    raw_params = init_params(k_p, IN_CHANNELS, BASE_CHANNELS,
                             IMG_HEIGHT, IMG_WIDTH)
    kernel_params = prepare_params(raw_params)

    fwd = jax.jit(vqgan_discriminator_forward)
    out = jax.block_until_ready(fwd(x, kernel_params))

    ref = jax.block_until_ready(reference_forward(x, raw_params))
    assert out.shape == (BATCH, 1), out.shape
    np.testing.assert_allclose(np.asarray(out), np.asarray(ref),
                               rtol=5e-2, atol=5e-2)
    print("KERNEL_OK")
</pallas_src>

<mosaic_0001>
module attributes {stable_mosaic.version = 11 : i64} {
  func.func @_discriminator_kernel(%arg0: i32, %arg1: memref<32x8x40xbf16, #tpu.memory_space<vmem>>, %arg2: memref<832x64xbf16, #tpu.memory_space<vmem>>, %arg3: memref<8x128xf32, #tpu.memory_space<vmem>>, %arg4: memref<4x8x64xf32, #tpu.memory_space<vmem>>, %arg5: memref<8x128xf32, #tpu.memory_space<vmem>>) attributes {dimension_semantics = [#tpu.dimension_semantics<arbitrary>], iteration_bounds = array<i64: 1>, scalar_prefetch = 0 : i64, scratch_operands = 0 : i64, tpu.core_type = #tpu.core_type<tc>, window_params = [{pipeline_mode = #tpu.pipeline_mode<synchronous>, transform_indices = @transform_0, window_bounds = array<i64: 32, 8, 40>}, {pipeline_mode = #tpu.pipeline_mode<synchronous>, transform_indices = @transform_1, window_bounds = array<i64: 832, 64>}, {pipeline_mode = #tpu.pipeline_mode<synchronous>, transform_indices = @transform_2, window_bounds = array<i64: 8, 128>}, {pipeline_mode = #tpu.pipeline_mode<synchronous>, transform_indices = @transform_3, window_bounds = array<i64: 4, 8, 64>}, {pipeline_mode = #tpu.pipeline_mode<synchronous>, transform_indices = @transform_4, window_bounds = array<i64: 8, 128>}]} {
    %c0 = arith.constant 0 : index
    %c0_0 = arith.constant 0 : index
    %c0_1 = arith.constant 0 : index
    %0 = vector.load %arg1[%c0, %c0_0, %c0_1] : memref<32x8x40xbf16, #tpu.memory_space<vmem>>, vector<32x8x40xbf16>
    %c0_2 = arith.constant 0 : index
    %c0_3 = arith.constant 0 : index
    %1 = vector.load %arg2[%c0_2, %c0_3] : memref<832x64xbf16, #tpu.memory_space<vmem>>, vector<64x16xbf16>
    %c0_4 = arith.constant 0 : index
    %c0_5 = arith.constant 0 : index
    %2 = vector.load %arg3[%c0_4, %c0_5] : memref<8x128xf32, #tpu.memory_space<vmem>>, vector<1x16xf32>
    %cst = arith.constant 0.000000e+00 : bf16
    %3 = vector.broadcast %cst : bf16 to vector<1x8x40xbf16>
    %4 = tpu.concatenate %3, %0, %3 in 0 : vector<1x8x40xbf16>, vector<32x8x40xbf16>, vector<1x8x40xbf16> -> vector<34x8x40xbf16>
    %5 = vector.shape_cast %4 : vector<34x8x40xbf16> to vector<17x2x8x40xbf16>
    %6 = vector.extract_strided_slice %5 {offsets = [0, 0, 0, 0], sizes = [17, 2, 8, 16], strides = [1, 1, 1, 1]} : vector<17x2x8x40xbf16> to vector<17x2x8x16xbf16>
    %7 = vector.extract_strided_slice %6 {offsets = [0, 0, 0, 0], sizes = [16, 1, 8, 16], strides = [1, 1, 1, 1]} : vector<17x2x8x16xbf16> to vector<16x1x8x16xbf16>
    %8 = vector.shape_cast %7 : vector<16x1x8x16xbf16> to vector<16x8x16xbf16>
    %9 = vector.extract_strided_slice %6 {offsets = [0, 1, 0, 0], sizes = [16, 1, 8, 16], strides = [1, 1, 1, 1]} : vector<17x2x8x16xbf16> to vector<16x1x8x16xbf16>
    %10 = vector.shape_cast %9 : vector<16x1x8x16xbf16> to vector<16x8x16xbf16>
    %11 = vector.extract_strided_slice %6 {offsets = [1, 0, 0, 0], sizes = [16, 1, 8, 16], strides = [1, 1, 1, 1]} : vector<17x2x8x16xbf16> to vector<16x1x8x16xbf16>
    %12 = vector.shape_cast %11 : vector<16x1x8x16xbf16> to vector<16x8x16xbf16>
    %13 = vector.extract_strided_slice %6 {offsets = [1, 1, 0, 0], sizes = [16, 1, 8, 16], strides = [1, 1, 1, 1]} : vector<17x2x8x16xbf16> to vector<16x1x8x16xbf16>
    %14 = vector.shape_cast %13 : vector<16x1x8x16xbf16> to vector<16x8x16xbf16>
    %15 = tpu.concatenate %8, %10, %12, %14 in 2 : vector<16x8x16xbf16>, vector<16x8x16xbf16>, vector<16x8x16xbf16>, vector<16x8x16xbf16> -> vector<16x8x64xbf16>
    %16 = vector.extract_strided_slice %5 {offsets = [0, 0, 0, 8], sizes = [17, 2, 8, 16], strides = [1, 1, 1, 1]} : vector<17x2x8x40xbf16> to vector<17x2x8x16xbf16>
    %17 = vector.extract_strided_slice %16 {offsets = [0, 0, 0, 0], sizes = [16, 1, 8, 16], strides = [1, 1, 1, 1]} : vector<17x2x8x16xbf16> to vector<16x1x8x16xbf16>
    %18 = vector.shape_cast %17 : vector<16x1x8x16xbf16> to vector<16x8x16xbf16>
    %19 = vector.extract_strided_slice %16 {offsets = [0, 1, 0, 0], sizes = [16, 1, 8, 16], strides = [1, 1, 1, 1]} : vector<17x2x8x16xbf16> to vector<16x1x8x16xbf16>
    %20 = vector.shape_cast %19 : vector<16x1x8x16xbf16> to vector<16x8x16xbf16>
    %21 = vector.extract_strided_slice %16 {offsets = [1, 0, 0, 0], sizes = [16, 1, 8, 16], strides = [1, 1, 1, 1]} : vector<17x2x8x16xbf16> to vector<16x1x8x16xbf16>
    %22 = vector.shape_cast %21 : vector<16x1x8x16xbf16> to vector<16x8x16xbf16>
    %23 = vector.extract_strided_slice %16 {offsets = [1, 1, 0, 0], sizes = [16, 1, 8, 16], strides = [1, 1, 1, 1]} : vector<17x2x8x16xbf16> to vector<16x1x8x16xbf16>
    %24 = vector.shape_cast %23 : vector<16x1x8x16xbf16> to vector<16x8x16xbf16>
    %25 = tpu.concatenate %18, %20, %22, %24 in 2 : vector<16x8x16xbf16>, vector<16x8x16xbf16>, vector<16x8x16xbf16>, vector<16x8x16xbf16> -> vector<16x8x64xbf16>
    %26 = vector.extract_strided_slice %5 {offsets = [0, 0, 0, 16], sizes = [17, 2, 8, 16], strides = [1, 1, 1, 1]} : vector<17x2x8x40xbf16> to vector<17x2x8x16xbf16>
    %27 = vector.extract_strided_slice %26 {offsets = [0, 0, 0, 0], sizes = [16, 1, 8, 16], strides = [1, 1, 1, 1]} : vector<17x2x8x16xbf16> to vector<16x1x8x16xbf16>
    %28 = vector.shape_cast %27 : vector<16x1x8x16xbf16> to vector<16x8x16xbf16>
    %29 = vector.extract_strided_slice %26 {offsets = [0, 1, 0, 0], sizes = [16, 1, 8, 16], strides = [1, 1, 1, 1]} : vector<17x2x8x16xbf16> to vector<16x1x8x16xbf16>
    %30 = vector.shape_cast %29 : vector<16x1x8x16xbf16> to vector<16x8x16xbf16>
    %31 = vector.extract_strided_slice %26 {offsets = [1, 0, 0, 0], sizes = [16, 1, 8, 16], strides = [1, 1, 1, 1]} : vector<17x2x8x16xbf16> to vector<16x1x8x16xbf16>
    %32 = vector.shape_cast %31 : vector<16x1x8x16xbf16> to vector<16x8x16xbf16>
    %33 = vector.extract_strided_slice %26 {offsets = [1, 1, 0, 0], sizes = [16, 1, 8, 16], strides = [1, 1, 1, 1]} : vector<17x2x8x16xbf16> to vector<16x1x8x16xbf16>
    %34 = vector.shape_cast %33 : vector<16x1x8x16xbf16> to vector<16x8x16xbf16>
    %35 = tpu.concatenate %28, %30, %32, %34 in 2 : vector<16x8x16xbf16>, vector<16x8x16xbf16>, vector<16x8x16xbf16>, vector<16x8x16xbf16> -> vector<16x8x64xbf16>
    %36 = vector.extract_strided_slice %5 {offsets = [0, 0, 0, 24], sizes = [17, 2, 8, 16], strides = [1, 1, 1, 1]} : vector<17x2x8x40xbf16> to vector<17x2x8x16xbf16>
    %37 = vector.extract_strided_slice %36 {offsets = [0, 0, 0, 0], sizes = [16, 1, 8, 16], strides = [1, 1, 1, 1]} : vector<17x2x8x16xbf16> to vector<16x1x8x16xbf16>
    %38 = vector.shape_cast %37 : vector<16x1x8x16xbf16> to vector<16x8x16xbf16>
    %39 = vector.extract_strided_slice %36 {offsets = [0, 1, 0, 0], sizes = [16, 1, 8, 16], strides = [1, 1, 1, 1]} : vector<17x2x8x16xbf16> to vector<16x1x8x16xbf16>
    %40 = vector.shape_cast %39 : vector<16x1x8x16xbf16> to vector<16x8x16xbf16>
    %41 = vector.extract_strided_slice %36 {offsets = [1, 0, 0, 0], sizes = [16, 1, 8, 16], strides = [1, 1, 1, 1]} : vector<17x2x8x16xbf16> to vector<16x1x8x16xbf16>
    %42 = vector.shape_cast %41 : vector<16x1x8x16xbf16> to vector<16x8x16xbf16>
    %43 = vector.extract_strided_slice %36 {offsets = [1, 1, 0, 0], sizes = [16, 1, 8, 16], strides = [1, 1, 1, 1]} : vector<17x2x8x16xbf16> to vector<16x1x8x16xbf16>
    %44 = vector.shape_cast %43 : vector<16x1x8x16xbf16> to vector<16x8x16xbf16>
    %45 = tpu.concatenate %38, %40, %42, %44 in 2 : vector<16x8x16xbf16>, vector<16x8x16xbf16>, vector<16x8x16xbf16>, vector<16x8x16xbf16> -> vector<16x8x64xbf16>
    %46 = vector.shape_cast %15 : vector<16x8x64xbf16> to vector<1x16x8x64xbf16>
    %47 = vector.shape_cast %25 : vector<16x8x64xbf16> to vector<1x16x8x64xbf16>
    %48 = vector.shape_cast %35 : vector<16x8x64xbf16> to vector<1x16x8x64xbf16>
    %49 = vector.shape_cast %45 : vector<16x8x64xbf16> to vector<1x16x8x64xbf16>
    %50 = tpu.concatenate %46, %47, %48, %49 in 0 : vector<1x16x8x64xbf16>, vector<1x16x8x64xbf16>, vector<1x16x8x64xbf16>, vector<1x16x8x64xbf16> -> vector<4x16x8x64xbf16>
    %51 = vector.shape_cast %50 : vector<4x16x8x64xbf16> to vector<512x64xbf16>
    %cst_6 = arith.constant dense<0.000000e+00> : vector<512x16xf32>
    %52 = tpu.matmul %51, %1, %cst_6 {dimension_numbers = #tpu.dot_dimension_numbers<[1], [0], [0], [1], [0, 0, 1, 1], [], []>} : vector<512x64xbf16>, vector<64x16xbf16>, vector<512x16xf32> -> vector<512x16xf32>
    %53 = vector.broadcast %2 : vector<1x16xf32> to vector<512x16xf32>
    %54 = arith.addf %52, %53 : vector<512x16xf32>
    %cst_7 = arith.constant 0.000000e+00 : f32
    %55 = vector.broadcast %cst_7 : f32 to vector<512x16xf32>
    %56 = arith.cmpf oge, %54, %55 : vector<512x16xf32>
    %cst_8 = arith.constant 2.000000e-01 : f32
    %57 = vector.broadcast %cst_8 : f32 to vector<512x16xf32>
    %58 = arith.mulf %57, %54 : vector<512x16xf32>
    %59 = arith.select %56, %54, %58 : vector<512x16xi1>, vector<512x16xf32>
    %60 = vector.shape_cast %59 : vector<512x16xf32> to vector<4x16x8x16xf32>
    %61 = arith.truncf %60 : vector<4x16x8x16xf32> to vector<4x16x8x16xbf16>
    %62 = tpu.iota {dimensions = array<i32: 1>} : vector<1x8x1xi32>
    %c4_i32 = arith.constant 4 : i32
    %c0_i32 = arith.constant 0 : i32
    %63 = arith.cmpi eq, %c4_i32, %c0_i32 : i32
    %c1_i32 = arith.constant 1 : i32
    %64 = arith.select %63, %c1_i32, %c4_i32 : i32
    %65 = vector.broadcast %64 : i32 to vector<1x8x1xi32>
    %66 = arith.remsi %62, %65 : vector<1x8x1xi32>
    %c0_i32_9 = arith.constant 0 : i32
    %67 = vector.broadcast %c0_i32_9 : i32 to vector<1x8x1xi32>
    %68 = arith.cmpi ne, %66, %67 : vector<1x8x1xi32>
    %c0_i32_10 = arith.constant 0 : i32
    %69 = vector.broadcast %c0_i32_10 : i32 to vector<1x8x1xi32>
    %70 = arith.cmpi slt, %66, %69 : vector<1x8x1xi32>
    %c0_i32_11 = arith.constant 0 : i32
    %71 = arith.cmpi slt, %64, %c0_i32_11 : i32
    %72 = vector.broadcast %71 : i1 to vector<1x8x1xi1>
    %73 = vector.broadcast %72 : vector<1x8x1xi1> to vector<1x8x1xi1>
    %74 = arith.xori %70, %73 : vector<1x8x1xi1>
    %75 = arith.andi %74, %68 : vector<1x8x1xi1>
    %76 = vector.broadcast %64 : i32 to vector<1x8x1xi32>
    %77 = arith.addi %66, %76 : vector<1x8x1xi32>
    %78 = arith.select %75, %77, %66 : vector<1x8x1xi1>, vector<1x8x1xi32>
    %cst_12 = arith.constant 0.000000e+00 : bf16
    %79 = vector.broadcast %cst_12 : bf16 to vector<16x1x16xbf16>
    %80 = vector.extract_strided_slice %61 {offsets = [3, 0, 0, 0], sizes = [1, 16, 8, 16], strides = [1, 1, 1, 1]} : vector<4x16x8x16xbf16> to vector<1x16x8x16xbf16>
    %81 = vector.shape_cast %80 : vector<1x16x8x16xbf16> to vector<16x8x16xbf16>
    %82 = vector.extract_strided_slice %81 {offsets = [0, 0, 0], sizes = [16, 7, 16], strides = [1, 1, 1]} : vector<16x8x16xbf16> to vector<16x7x16xbf16>
    %83 = tpu.concatenate %79, %82 in 1 : vector<16x1x16xbf16>, vector<16x7x16xbf16> -> vector<16x8x16xbf16>
    %c0_i32_13 = arith.constant 0 : i32
    %84 = vector.broadcast %c0_i32_13 : i32 to vector<1x8x1xi32>
    %85 = arith.cmpi eq, %78, %84 : vector<1x8x1xi32>
    %cst_14 = arith.constant 0.000000e+00 : f32
    %86 = arith.truncf %cst_14 : f32 to bf16
    %87 = vector.shape_cast %85 : vector<1x8x1xi1> to vector<1x8x1xi1>
    %88 = vector.broadcast %87 : vector<1x8x1xi1> to vector<16x8x16xi1>
    %89 = vector.broadcast %86 : bf16 to vector<16x8x16xbf16>
    %90 = arith.select %88, %89, %83 : vector<16x8x16xi1>, vector<16x8x16xbf16>
    %91 = vector.extract_strided_slice %61 {offsets = [0, 0, 0, 0], sizes = [1, 16, 8, 16], strides = [1, 1, 1, 1]} : vector<4x16x8x16xbf16> to vector<1x16x8x16xbf16>
    %92 = vector.shape_cast %91 : vector<1x16x8x16xbf16> to vector<16x8x16xbf16>
    %93 = vector.extract_strided_slice %92 {offsets = [0, 1, 0], sizes = [16, 7, 16], strides = [1, 1, 1]} : vector<16x8x16xbf16> to vector<16x7x16xbf16>
    %94 = tpu.concatenate %93, %79 in 1 : vector<16x7x16xbf16>, vector<16x1x16xbf16> -> vector<16x8x16xbf16>
    %c3_i32 = arith.constant 3 : i32
    %95 = vector.broadcast %c3_i32 : i32 to vector<1x8x1xi32>
    %96 = arith.cmpi eq, %78, %95 : vector<1x8x1xi32>
    %cst_15 = arith.constant 0.000000e+00 : f32
    %97 = arith.truncf %cst_15 : f32 to bf16
    %98 = vector.shape_cast %96 : vector<1x8x1xi1> to vector<1x8x1xi1>
    %99 = vector.broadcast %98 : vector<1x8x1xi1> to vector<16x8x16xi1>
    %100 = vector.broadcast %97 : bf16 to vector<16x8x16xbf16>
    %101 = arith.select %99, %100, %94 : vector<16x8x16xi1>, vector<16x8x16xbf16>
    %102 = vector.extract_strided_slice %61 {offsets = [0, 0, 0, 0], sizes = [1, 16, 8, 16], strides = [1, 1, 1, 1]} : vector<4x16x8x16xbf16> to vector<1x16x8x16xbf16>
    %103 = vector.shape_cast %102 : vector<1x16x8x16xbf16> to vector<16x8x16xbf16>
    %104 = vector.extract_strided_slice %61 {offsets = [1, 0, 0, 0], sizes = [1, 16, 8, 16], strides = [1, 1, 1, 1]} : vector<4x16x8x16xbf16> to vector<1x16x8x16xbf16>
    %105 = vector.shape_cast %104 : vector<1x16x8x16xbf16> to vector<16x8x16xbf16>
    %106 = vector.extract_strided_slice %61 {offsets = [2, 0, 0, 0], sizes = [1, 16, 8, 16], strides = [1, 1, 1, 1]} : vector<4x16x8x16xbf16> to vector<1x16x8x16xbf16>
    %107 = vector.shape_cast %106 : vector<1x16x8x16xbf16> to vector<16x8x16xbf16>
    %108 = vector.extract_strided_slice %61 {offsets = [3, 0, 0, 0], sizes = [1, 16, 8, 16], strides = [1, 1, 1, 1]} : vector<4x16x8x16xbf16> to vector<1x16x8x16xbf16>
    %109 = vector.shape_cast %108 : vector<1x16x8x16xbf16> to vector<16x8x16xbf16>
    %110 = tpu.concatenate %90, %103, %105, %107, %109, %101 in 2 : vector<16x8x16xbf16>, vector<16x8x16xbf16>, vector<16x8x16xbf16>, vector<16x8x16xbf16>, vector<16x8x16xbf16>, vector<16x8x16xbf16> -> vector<16x8x96xbf16>
    %c64 = arith.constant 64 : index
    %c0_16 = arith.constant 0 : index
    %111 = vector.load %arg2[%c64, %c0_16] : memref<832x64xbf16, #tpu.memory_space<vmem>>, vector<256x32xbf16>
    %c1 = arith.constant 1 : index
    %c0_17 = arith.constant 0 : index
    %112 = vector.load %arg3[%c1, %c0_17] : memref<8x128xf32, #tpu.memory_space<vmem>>, vector<1x32xf32>
    %cst_18 = arith.constant 0.000000e+00 : bf16
    %113 = vector.broadcast %cst_18 : bf16 to vector<1x8x96xbf16>
    %114 = tpu.concatenate %113, %110, %113 in 0 : vector<1x8x96xbf16>, vector<16x8x96xbf16>, vector<1x8x96xbf16> -> vector<18x8x96xbf16>
    %115 = vector.shape_cast %114 : vector<18x8x96xbf16> to vector<9x2x8x96xbf16>
    %116 = vector.extract_strided_slice %115 {offsets = [0, 0, 0, 0], sizes = [9, 2, 8, 64], strides = [1, 1, 1, 1]} : vector<9x2x8x96xbf16> to vector<9x2x8x64xbf16>
    %117 = vector.extract_strided_slice %116 {offsets = [0, 0, 0, 0], sizes = [8, 1, 8, 64], strides = [1, 1, 1, 1]} : vector<9x2x8x64xbf16> to vector<8x1x8x64xbf16>
    %118 = vector.shape_cast %117 : vector<8x1x8x64xbf16> to vector<8x8x64xbf16>
    %119 = vector.extract_strided_slice %116 {offsets = [0, 1, 0, 0], sizes = [8, 1, 8, 64], strides = [1, 1, 1, 1]} : vector<9x2x8x64xbf16> to vector<8x1x8x64xbf16>
    %120 = vector.shape_cast %119 : vector<8x1x8x64xbf16> to vector<8x8x64xbf16>
    %121 = vector.extract_strided_slice %116 {offsets = [1, 0, 0, 0], sizes = [8, 1, 8, 64], strides = [1, 1, 1, 1]} : vector<9x2x8x64xbf16> to vector<8x1x8x64xbf16>
    %122 = vector.shape_cast %121 : vector<8x1x8x64xbf16> to vector<8x8x64xbf16>
    %123 = vector.extract_strided_slice %116 {offsets = [1, 1, 0, 0], sizes = [8, 1, 8, 64], strides = [1, 1, 1, 1]} : vector<9x2x8x64xbf16> to vector<8x1x8x64xbf16>
    %124 = vector.shape_cast %123 : vector<8x1x8x64xbf16> to vector<8x8x64xbf16>
    %125 = tpu.concatenate %118, %120, %122, %124 in 2 : vector<8x8x64xbf16>, vector<8x8x64xbf16>, vector<8x8x64xbf16>, vector<8x8x64xbf16> -> vector<8x8x256xbf16>
    %126 = vector.extract_strided_slice %115 {offsets = [0, 0, 0, 32], sizes = [9, 2, 8, 64], strides = [1, 1, 1, 1]} : vector<9x2x8x96xbf16> to vector<9x2x8x64xbf16>
    %127 = vector.extract_strided_slice %126 {offsets = [0, 0, 0, 0], sizes = [8, 1, 8, 64], strides = [1, 1, 1, 1]} : vector<9x2x8x64xbf16> to vector<8x1x8x64xbf16>
    %128 = vector.shape_cast %127 : vector<8x1x8x64xbf16> to vector<8x8x64xbf16>
    %129 = vector.extract_strided_slice %126 {offsets = [0, 1, 0, 0], sizes = [8, 1, 8, 64], strides = [1, 1, 1, 1]} : vector<9x2x8x64xbf16> to vector<8x1x8x64xbf16>
    %130 = vector.shape_cast %129 : vector<8x1x8x64xbf16> to vector<8x8x64xbf16>
    %131 = vector.extract_strided_slice %126 {offsets = [1, 0, 0, 0], sizes = [8, 1, 8, 64], strides = [1, 1, 1, 1]} : vector<9x2x8x64xbf16> to vector<8x1x8x64xbf16>
    %132 = vector.shape_cast %131 : vector<8x1x8x64xbf16> to vector<8x8x64xbf16>
    %133 = vector.extract_strided_slice %126 {offsets = [1, 1, 0, 0], sizes = [8, 1, 8, 64], strides = [1, 1, 1, 1]} : vector<9x2x8x64xbf16> to vector<8x1x8x64xbf16>
    %134 = vector.shape_cast %133 : vector<8x1x8x64xbf16> to vector<8x8x64xbf16>
    %135 = tpu.concatenate %128, %130, %132, %134 in 2 : vector<8x8x64xbf16>, vector<8x8x64xbf16>, vector<8x8x64xbf16>, vector<8x8x64xbf16> -> vector<8x8x256xbf16>
    %136 = vector.shape_cast %125 : vector<8x8x256xbf16> to vector<1x8x8x256xbf16>
    %137 = vector.shape_cast %135 : vector<8x8x256xbf16> to vector<1x8x8x256xbf16>
    %138 = tpu.concatenate %136, %137 in 0 : vector<1x8x8x256xbf16>, vector<1x8x8x256xbf16> -> vector<2x8x8x256xbf16>
    %139 = vector.shape_cast %138 : vector<2x8x8x256xbf16> to vector<128x256xbf16>
    %cst_19 = arith.constant dense<0.000000e+00> : vector<128x32xf32>
    %140 = tpu.matmul %139, %111, %cst_19 {dimension_numbers = #tpu.dot_dimension_numbers<[1], [0], [0], [1], [0, 0, 1, 1], [], []>} : vector<128x256xbf16>, vector<256x32xbf16>, vector<128x32xf32> -> vector<128x32xf32>
    %141 = vector.broadcast %112 : vector<1x32xf32> to vector<128x32xf32>
    %142 = arith.addf %140, %141 : vector<128x32xf32>
    %cst_20 = arith.constant 0.000000e+00 : f32
    %143 = vector.broadcast %cst_20 : f32 to vector<128x32xf32>
    %144 = arith.cmpf oge, %142, %143 : vector<128x32xf32>
    %cst_21 = arith.constant 2.000000e-01 : f32
    %145 = vector.broadcast %cst_21 : f32 to vector<128x32xf32>
    %146 = arith.mulf %145, %142 : vector<128x32xf32>
    %147 = arith.select %144, %142, %146 : vector<128x32xi1>, vector<128x32xf32>
    %148 = vector.shape_cast %147 : vector<128x32xf32> to vector<2x8x8x32xf32>
    %149 = arith.truncf %148 : vector<2x8x8x32xf32> to vector<2x8x8x32xbf16>
    %150 = tpu.iota {dimensions = array<i32: 1>} : vector<1x8x1xi32>
    %c4_i32_22 = arith.constant 4 : i32
    %c0_i32_23 = arith.constant 0 : i32
    %151 = arith.cmpi eq, %c4_i32_22, %c0_i32_23 : i32
    %c1_i32_24 = arith.constant 1 : i32
    %152 = arith.select %151, %c1_i32_24, %c4_i32_22 : i32
    %153 = vector.broadcast %152 : i32 to vector<1x8x1xi32>
    %154 = arith.remsi %150, %153 : vector<1x8x1xi32>
    %c0_i32_25 = arith.constant 0 : i32
    %155 = vector.broadcast %c0_i32_25 : i32 to vector<1x8x1xi32>
    %156 = arith.cmpi ne, %154, %155 : vector<1x8x1xi32>
    %c0_i32_26 = arith.constant 0 : i32
    %157 = vector.broadcast %c0_i32_26 : i32 to vector<1x8x1xi32>
    %158 = arith.cmpi slt, %154, %157 : vector<1x8x1xi32>
    %c0_i32_27 = arith.constant 0 : i32
    %159 = arith.cmpi slt, %152, %c0_i32_27 : i32
    %160 = vector.broadcast %159 : i1 to vector<1x8x1xi1>
    %161 = vector.broadcast %160 : vector<1x8x1xi1> to vector<1x8x1xi1>
    %162 = arith.xori %158, %161 : vector<1x8x1xi1>
    %163 = arith.andi %162, %156 : vector<1x8x1xi1>
    %164 = vector.broadcast %152 : i32 to vector<1x8x1xi32>
    %165 = arith.addi %154, %164 : vector<1x8x1xi32>
    %166 = arith.select %163, %165, %154 : vector<1x8x1xi1>, vector<1x8x1xi32>
    %cst_28 = arith.constant 0.000000e+00 : bf16
    %167 = vector.broadcast %cst_28 : bf16 to vector<8x1x32xbf16>
    %168 = vector.extract_strided_slice %149 {offsets = [1, 0, 0, 0], sizes = [1, 8, 8, 32], strides = [1, 1, 1, 1]} : vector<2x8x8x32xbf16> to vector<1x8x8x32xbf16>
    %169 = vector.shape_cast %168 : vector<1x8x8x32xbf16> to vector<8x8x32xbf16>
    %170 = vector.extract_strided_slice %169 {offsets = [0, 0, 0], sizes = [8, 7, 32], strides = [1, 1, 1]} : vector<8x8x32xbf16> to vector<8x7x32xbf16>
    %171 = tpu.concatenate %167, %170 in 1 : vector<8x1x32xbf16>, vector<8x7x32xbf16> -> vector<8x8x32xbf16>
    %c0_i32_29 = arith.constant 0 : i32
    %172 = vector.broadcast %c0_i32_29 : i32 to vector<1x8x1xi32>
    %173 = arith.cmpi eq, %166, %172 : vector<1x8x1xi32>
    %cst_30 = arith.constant 0.000000e+00 : f32
    %174 = arith.truncf %cst_30 : f32 to bf16
    %175 = vector.shape_cast %173 : vector<1x8x1xi1> to vector<1x8x1xi1>
    %176 = vector.broadcast %175 : vector<1x8x1xi1> to vector<8x8x32xi1>
    %177 = vector.broadcast %174 : bf16 to vector<8x8x32xbf16>
    %178 = arith.select %176, %177, %171 : vector<8x8x32xi1>, vector<8x8x32xbf16>
    %179 = vector.extract_strided_slice %149 {offsets = [0, 0, 0, 0], sizes = [1, 8, 8, 32], strides = [1, 1, 1, 1]} : vector<2x8x8x32xbf16> to vector<1x8x8x32xbf16>
    %180 = vector.shape_cast %179 : vector<1x8x8x32xbf16> to vector<8x8x32xbf16>
    %181 = vector.extract_strided_slice %180 {offsets = [0, 1, 0], sizes = [8, 7, 32], strides = [1, 1, 1]} : vector<8x8x32xbf16> to vector<8x7x32xbf16>
    %182 = tpu.concatenate %181, %167 in 1 : vector<8x7x32xbf16>, vector<8x1x32xbf16> -> vector<8x8x32xbf16>
    %c3_i32_31 = arith.constant 3 : i32
    %183 = vector.broadcast %c3_i32_31 : i32 to vector<1x8x1xi32>
    %184 = arith.cmpi eq, %166, %183 : vector<1x8x1xi32>
    %cst_32 = arith.constant 0.000000e+00 : f32
    %185 = arith.truncf %cst_32 : f32 to bf16
    %186 = vector.shape_cast %184 : vector<1x8x1xi1> to vector<1x8x1xi1>
    %187 = vector.broadcast %186 : vector<1x8x1xi1> to vector<8x8x32xi1>
    %188 = vector.broadcast %185 : bf16 to vector<8x8x32xbf16>
    %189 = arith.select %187, %188, %182 : vector<8x8x32xi1>, vector<8x8x32xbf16>
    %190 = vector.extract_strided_slice %149 {offsets = [0, 0, 0, 0], sizes = [1, 8, 8, 32], strides = [1, 1, 1, 1]} : vector<2x8x8x32xbf16> to vector<1x8x8x32xbf16>
    %191 = vector.shape_cast %190 : vector<1x8x8x32xbf16> to vector<8x8x32xbf16>
    %192 = vector.extract_strided_slice %149 {offsets = [1, 0, 0, 0], sizes = [1, 8, 8, 32], strides = [1, 1, 1, 1]} : vector<2x8x8x32xbf16> to vector<1x8x8x32xbf16>
    %193 = vector.shape_cast %192 : vector<1x8x8x32xbf16> to vector<8x8x32xbf16>
    %194 = tpu.concatenate %178, %191, %193, %189 in 2 : vector<8x8x32xbf16>, vector<8x8x32xbf16>, vector<8x8x32xbf16>, vector<8x8x32xbf16> -> vector<8x8x128xbf16>
    %c320 = arith.constant 320 : index
    %c0_33 = arith.constant 0 : index
    %195 = vector.load %arg2[%c320, %c0_33] : memref<832x64xbf16, #tpu.memory_space<vmem>>, vector<512x64xbf16>
    %c2 = arith.constant 2 : index
    %c0_34 = arith.constant 0 : index
    %196 = vector.load %arg3[%c2, %c0_34] : memref<8x128xf32, #tpu.memory_space<vmem>>, vector<1x64xf32>
    %cst_35 = arith.constant 0.000000e+00 : bf16
    %197 = vector.broadcast %cst_35 : bf16 to vector<1x8x128xbf16>
    %198 = tpu.concatenate %197, %194, %197 in 0 : vector<1x8x128xbf16>, vector<8x8x128xbf16>, vector<1x8x128xbf16> -> vector<10x8x128xbf16>
    %199 = vector.shape_cast %198 : vector<10x8x128xbf16> to vector<5x2x8x128xbf16>
    %200 = vector.extract_strided_slice %199 {offsets = [0, 0, 0, 0], sizes = [4, 1, 8, 128], strides = [1, 1, 1, 1]} : vector<5x2x8x128xbf16> to vector<4x1x8x128xbf16>
    %201 = vector.shape_cast %200 : vector<4x1x8x128xbf16> to vector<4x8x128xbf16>
    %202 = vector.extract_strided_slice %199 {offsets = [0, 1, 0, 0], sizes = [4, 1, 8, 128], strides = [1, 1, 1, 1]} : vector<5x2x8x128xbf16> to vector<4x1x8x128xbf16>
    %203 = vector.shape_cast %202 : vector<4x1x8x128xbf16> to vector<4x8x128xbf16>
    %204 = vector.extract_strided_slice %199 {offsets = [1, 0, 0, 0], sizes = [4, 1, 8, 128], strides = [1, 1, 1, 1]} : vector<5x2x8x128xbf16> to vector<4x1x8x128xbf16>
    %205 = vector.shape_cast %204 : vector<4x1x8x128xbf16> to vector<4x8x128xbf16>
    %206 = vector.extract_strided_slice %199 {offsets = [1, 1, 0, 0], sizes = [4, 1, 8, 128], strides = [1, 1, 1, 1]} : vector<5x2x8x128xbf16> to vector<4x1x8x128xbf16>
    %207 = vector.shape_cast %206 : vector<4x1x8x128xbf16> to vector<4x8x128xbf16>
    %208 = tpu.concatenate %201, %203, %205, %207 in 2 : vector<4x8x128xbf16>, vector<4x8x128xbf16>, vector<4x8x128xbf16>, vector<4x8x128xbf16> -> vector<4x8x512xbf16>
    %209 = vector.shape_cast %208 : vector<4x8x512xbf16> to vector<1x4x8x512xbf16>
    %210 = vector.shape_cast %209 : vector<1x4x8x512xbf16> to vector<32x512xbf16>
    %cst_36 = arith.constant dense<0.000000e+00> : vector<32x64xf32>
    %211 = tpu.matmul %210, %195, %cst_36 {dimension_numbers = #tpu.dot_dimension_numbers<[1], [0], [0], [1], [0, 0, 1, 1], [], []>} : vector<32x512xbf16>, vector<512x64xbf16>, vector<32x64xf32> -> vector<32x64xf32>
    %212 = vector.broadcast %196 : vector<1x64xf32> to vector<32x64xf32>
    %213 = arith.addf %211, %212 : vector<32x64xf32>
    %cst_37 = arith.constant 0.000000e+00 : f32
    %214 = vector.broadcast %cst_37 : f32 to vector<32x64xf32>
    %215 = arith.cmpf oge, %213, %214 : vector<32x64xf32>
    %cst_38 = arith.constant 2.000000e-01 : f32
    %216 = vector.broadcast %cst_38 : f32 to vector<32x64xf32>
    %217 = arith.mulf %216, %213 : vector<32x64xf32>
    %218 = arith.select %215, %213, %217 : vector<32x64xi1>, vector<32x64xf32>
    %219 = vector.shape_cast %218 : vector<32x64xf32> to vector<1x4x8x64xf32>
    %220 = vector.shape_cast %219 : vector<1x4x8x64xf32> to vector<4x8x64xf32>
    %c0_39 = arith.constant 0 : index
    %c0_40 = arith.constant 0 : index
    %c0_41 = arith.constant 0 : index
    %221 = vector.load %arg4[%c0_39, %c0_40, %c0_41] : memref<4x8x64xf32, #tpu.memory_space<vmem>>, vector<4x8x64xf32>
    %222 = arith.mulf %220, %221 : vector<4x8x64xf32>
    %223 = tpu.iota {dimensions = array<i32: 1>} : vector<1x8x1xi32>
    %c4_i32_42 = arith.constant 4 : i32
    %224 = vector.broadcast %c4_i32_42 : i32 to vector<1x8x1xi32>
    %225 = arith.cmpi slt, %223, %224 : vector<1x8x1xi32>
    %cst_43 = arith.constant 0.000000e+00 : f32
    %226 = vector.shape_cast %225 : vector<1x8x1xi1> to vector<1x8x1xi1>
    %227 = vector.broadcast %226 : vector<1x8x1xi1> to vector<4x8x64xi1>
    %228 = vector.broadcast %cst_43 : f32 to vector<4x8x64xf32>
    %229 = arith.select %227, %222, %228 : vector<4x8x64xi1>, vector<4x8x64xf32>
    %230 = vector.shape_cast %229 : vector<4x8x64xf32> to vector<1x4x8x64xf32>
    %cst_44 = arith.constant dense<0.000000e+00> : vector<1xf32>
    %231 = vector.multi_reduction <add>, %230, %cst_44 [1, 2, 3] : vector<1x4x8x64xf32> to vector<1xf32>
    %232 = vector.shape_cast %231 : vector<1xf32> to vector<1x1x1x1xf32>
    %233 = vector.extract %232[0, 0, 0, 0] : f32 from vector<1x1x1x1xf32>
    %c4_i32_45 = arith.constant 4 : i32
    %234 = vector.broadcast %c4_i32_45 : i32 to vector<1x8x1xi32>
    %235 = arith.cmpi slt, %223, %234 : vector<1x8x1xi32>
    %cst_46 = arith.constant 0.000000e+00 : f32
    %236 = vector.shape_cast %235 : vector<1x8x1xi1> to vector<1x8x1xi1>
    %237 = vector.broadcast %236 : vector<1x8x1xi1> to vector<4x8x64xi1>
    %238 = vector.broadcast %cst_46 : f32 to vector<4x8x64xf32>
    %239 = arith.select %237, %238, %222 : vector<4x8x64xi1>, vector<4x8x64xf32>
    %240 = vector.shape_cast %239 : vector<4x8x64xf32> to vector<1x4x8x64xf32>
    %cst_47 = arith.constant dense<0.000000e+00> : vector<1xf32>
    %241 = vector.multi_reduction <add>, %240, %cst_47 [1, 2, 3] : vector<1x4x8x64xf32> to vector<1xf32>
    %242 = vector.shape_cast %241 : vector<1xf32> to vector<1x1x1x1xf32>
    %243 = vector.extract %242[0, 0, 0, 0] : f32 from vector<1x1x1x1xf32>
    %244 = tpu.iota {dimensions = array<i32: 0>} : vector<8x128xi32>
    %c0_i32_48 = arith.constant 0 : i32
    %245 = vector.broadcast %c0_i32_48 : i32 to vector<8x128xi32>
    %246 = arith.cmpi eq, %244, %245 : vector<8x128xi32>
    %c1_i32_49 = arith.constant 1 : i32
    %247 = vector.broadcast %c1_i32_49 : i32 to vector<8x128xi32>
    %248 = arith.cmpi eq, %244, %247 : vector<8x128xi32>
    %cst_50 = arith.constant 0.000000e+00 : f32
    %249 = vector.broadcast %243 : f32 to vector<8x128xf32>
    %250 = vector.broadcast %cst_50 : f32 to vector<8x128xf32>
    %251 = arith.select %248, %249, %250 : vector<8x128xi1>, vector<8x128xf32>
    %252 = vector.broadcast %233 : f32 to vector<8x128xf32>
    %253 = arith.select %246, %252, %251 : vector<8x128xi1>, vector<8x128xf32>
    %c3 = arith.constant 3 : index
    %c0_51 = arith.constant 0 : index
    %254 = vector.load %arg3[%c3, %c0_51] : memref<8x128xf32, #tpu.memory_space<vmem>>, vector<1x1xf32>
    %255 = vector.broadcast %254 : vector<1x1xf32> to vector<8x128xf32>
    %256 = arith.addf %253, %255 : vector<8x128xf32>
    %c0_52 = arith.constant 0 : index
    %c0_53 = arith.constant 0 : index
    %257 = vector.load %arg5[%c0_52, %c0_53] : memref<8x128xf32, #tpu.memory_space<vmem>>, vector<8x128xf32>
    tpu.vector_store %arg5[%c0_52, %c0_53], %256 {strides = array<i32>} : memref<8x128xf32, #tpu.memory_space<vmem>>, vector<8x128xf32>,
    return
  }
  func.func @transform_0(%arg0: i32) -> (i32, i32, i32) {
    %c0_i32 = arith.constant 0 : i32
    %c0_i32_0 = arith.constant 0 : i32
    %c0_i32_1 = arith.constant 0 : i32
    %c0_i32_2 = arith.constant 0 : i32
    return %c0_i32, %c0_i32_0, %c0_i32_1 : i32, i32, i32
  }
  func.func @transform_1(%arg0: i32) -> (i32, i32) {
    %c0_i32 = arith.constant 0 : i32
    %c0_i32_0 = arith.constant 0 : i32
    %c0_i32_1 = arith.constant 0 : i32
    return %c0_i32, %c0_i32_0 : i32, i32
  }
  func.func @transform_2(%arg0: i32) -> (i32, i32) {
    %c0_i32 = arith.constant 0 : i32
    %c0_i32_0 = arith.constant 0 : i32
    %c0_i32_1 = arith.constant 0 : i32
    return %c0_i32, %c0_i32_0 : i32, i32
  }
  func.func @transform_3(%arg0: i32) -> (i32, i32, i32) {
    %c0_i32 = arith.constant 0 : i32
    %c0_i32_0 = arith.constant 0 : i32
    %c0_i32_1 = arith.constant 0 : i32
    %c0_i32_2 = arith.constant 0 : i32
    return %c0_i32, %c0_i32_0, %c0_i32_1 : i32, i32, i32
  }
  func.func @transform_4(%arg0: i32) -> (i32, i32) {
    %c0_i32 = arith.constant 0 : i32
    %c0_i32_0 = arith.constant 0 : i32
    %c0_i32_1 = arith.constant 0 : i32
    return %c0_i32, %c0_i32_0 : i32, i32
  }
}

</mosaic_0001>

<bundles_post_ra>
// kernel: vqgan_discriminator_forward.1
= control target key start
LH: loop header
LB: loop body
LE: loop exit
PB: predicated region body
PF: predicated region fallthrough
CT: control target
= control target key end

     0   :  { %s4173_s21 = smov 24   ;;  %s4174_s22 = smov 8   ;;  %v6413_v6 = vmov 0   ;;  %vm188_vm0 = vcmask 130048   ;;  %vm237_vm1 = vcmask 261120   ;;  %vm270_vm2 = vcmask 392192   ;;  %s6408_s0 = inlined_call_operand.vmem [shape: bf16[32,8,40], index: 0, kind: input, shape index: {}]   ;;  %s6409_s1 = inlined_call_operand.vmem [shape: bf16[832,64], index: 1, kind: input, shape index: {}]   ;;  %s6410_s2 = inlined_call_operand.vmem [shape: f32[8,128], index: 2, kind: input, shape index: {}]   ;;  %s6411_s3 = inlined_call_operand.vmem [shape: f32[4,8,64], index: 3, kind: input, shape index: {}]   ;;  %s6412_s4 = inlined_call_operand.vmem [shape: f32[8,128], index: 4, kind: output, shape index: {}]  }
   0x1   :  { %v4214_v0 = vld [vmem:[%s6408_s0 + $0x74] sm:$0xf]  ;;  %v4219_v1 = vld [vmem:[%s6408_s0 + $0x70] sm:$0xf]  ;;  %v4224_v2 = vld [vmem:[%s6408_s0 + $0x6c] sm:$0xf] }
   0x2   :  { %395 = vrot.lane.b32.xlu2 %v4214_v0, %s4173_s21  ;;  %363 = vrot.lane.b32.xlu1 %v4219_v1, %s4174_s22  ;;  %s4175_s23 = smov 120   ;;  %v4235_v3 = vld [vmem:[%s6408_s0 + $0x7c] sm:$0xf]  ;;  %v4240_v4 = vld [vmem:[%s6408_s0 + $0x78] sm:$0xf]  ;;  %s4177_s30 = smov 40  }
   0x3   :  { %331 = vrot.lane.b32.xlu0 %v4224_v2, %s4175_s23  ;;  %v4251_v5 = vld [vmem:[%s6408_s0] sm:$0xf]  ;;  %s4178_s5 = smov 16   ;;  %v4262_v7 = vld [vmem:[%s6408_s0 + $0x4] sm:$0xf]  ;;  %s4179_s12 = smov 32  }
   0x4   :  { %v4267_v8 = vld [vmem:[%s6408_s0 + $0xc] sm:$0xf]  ;;  %v4272_v9 = vld [vmem:[%s6408_s0 + $0x8] sm:$0xf]  ;;  %v4283_v10 = vld [vmem:[%s6408_s0 + $0x10] sm:$0xf] }
   0x5   :  { %s4180_s15 = smov 48   ;;  %s4181_s16 = smov 112   ;;  %v4306_v11 = vld [vmem:[%s6408_s0 + $0x14] sm:$0xf]  ;;  %v4311_v12 = vld [vmem:[%s6408_s0 + $0x1c] sm:$0xf] }
   0x6   :  { %v4316_v13 = vld [vmem:[%s6408_s0 + $0x18] sm:$0xf]  ;;  %v4327_v14 = vld [vmem:[%s6408_s0 + $0x20] sm:$0xf]  ;;  %v4350_v15 = vld [vmem:[%s6408_s0 + $0x24] sm:$0xf] }
   0x7   :  { %v4355_v16 = vld [vmem:[%s6408_s0 + $0x2c] sm:$0xf]  ;;  %v4360_v17 = vld [vmem:[%s6408_s0 + $0x28] sm:$0xf]  ;;  %v4074_v18 = vld [vmem:[%s6409_s1 + $0x18] sm:$0xff]  ;;  %vm1176_vm3 = vcmask 523264  }
   0x8   :  { %4123 = vmatpush.bf16.msra.mxu1 %v4074_v18  ;;  %1277 = vmatpush.bf16.msra.mxu0 %v4074_v18  ;;  %v4073_v20 = vld [vmem:[%s6409_s1 + $0x10] sm:$0xff]  ;;  %v4072_v22 = vld [vmem:[%s6409_s1 + $0x8] sm:$0xff]  ;;  %v4071_v24 = vld [vmem:[%s6409_s1] sm:$0xff]  ;;  %vm2103_vm11 = vcmask 1043456   ;;  %vm2104_vm12 = vsmask.f32 3328 }
   0x9   :  { %4124 = vmatpush.bf16.msra.mxu3 %v4074_v18  ;;  %v4377_v21 = vld [vmem:[%s6408_s0 + $0x30] sm:$0xf]  ;;  %v4406_v29 = vld [vmem:[%s6408_s0 + $0x34] sm:$0xf]  ;;  %v4411_v30 = vld [vmem:[%s6408_s0 + $0x3c] sm:$0xf] }
   0xa   :  { %397 = vrot.lane.b32.xlu2 %v4235_v3, %s4173_s21  ;;  %365 = vrot.lane.b32.xlu1 %v4240_v4, %s4174_s22  ;;  %v4416_v31 = vld [vmem:[%s6408_s0 + $0x38] sm:$0xf]  ;;  %v4427_v35 = vld [vmem:[%s6408_s0 + $0x40] sm:$0xf]  ;;  %vm5215_vm15 = vmand %vm2103_vm11, %vm2104_vm12 }
   0xb   :  { %333 = vrot.lane.b32.xlu0 %v4214_v0, %s4175_s23  ;;  %v4464_v62 = vld [vmem:[%s6408_s0 + $0x44] sm:$0xf]  ;;  %v4469_v63 = vld [vmem:[%s6408_s0 + $0x4c] sm:$0xf]  ;;  %v4474_v18 = vld [vmem:[%s6408_s0 + $0x48] sm:$0xf] }
   0xc   :  { %4125 = vmatpush.bf16.msra.mxu1 %v4073_v20  ;;  %1278 = vmatpush.bf16.msra.mxu0 %v4073_v20 }
   0xd   :  { %4126 = vmatpush.bf16.msra.mxu3 %v4073_v20 }
  0x10   :  { %4127 = vmatpush.bf16.msra.mxu1 %v4072_v22  ;;  %1279 = vmatpush.bf16.msra.mxu0 %v4072_v22 }
  0x11   :  { %4128 = vmatpush.bf16.msra.mxu3 %v4072_v22 }
  0x12   :  { %429 = vrot.lane.b32.xlu1 %v6413_v6, %s4177_s30  ;;  %75 = vrot.lane.b32.xlu2 %v4251_v5, %s4178_s5 }
  0x13   :  { %427 = vrot.lane.b32.xlu0 %v4240_v4, %s4177_s30 }
  0x14   :  { %4129 = vmatpush.bf16.msra.mxu1 %v4071_v24  ;;  %1280 = vmatpush.bf16.msra.mxu0 %v4071_v24 }
  0x15   :  { %4130 = vmatpush.bf16.msra.mxu3 %v4071_v24  ;;  %v4486_v24 = vld [vmem:[%s6408_s0 + $0x50] sm:$0xf] }
  0x1a   :  { %123 = vrot.lane.b32.xlu1 %v4262_v7, %s4179_s12  ;;  %125 = vrot.lane.b32.xlu2 %v4267_v8, %s4179_s12 }
  0x1b   :  { %77 = vrot.lane.b32.xlu0 %v4272_v9, %s4178_s5 }
  0x22   :  { %158 = vrot.lane.b32.xlu1 %v4283_v10, %s4180_s15  ;;  %543 = vrot.lane.b32.xlu2 %v6413_v6, %s4181_s16 }
  0x23   :  { %156 = vrot.lane.b32.xlu0 %v4272_v9, %s4180_s15 }
  0x2a   :  { %575 = vrot.lane.b32.xlu1 %v4262_v7, %s4178_s5  ;;  %577 = vrot.lane.b32.xlu2 %v4267_v8, %s4178_s5 }
  0x2b   :  { %545 = vrot.lane.b32.xlu0 %v4262_v7, %s4181_s16 }
  0x32   :  { %609 = vrot.lane.b32.xlu1 %v4283_v10, %s4179_s12  ;;  %79 = vrot.lane.b32.xlu2 %v4283_v10, %s4178_s5 }
  0x33   :  { %607 = vrot.lane.b32.xlu0 %v4272_v9, %s4179_s12 }
  0x3a   :  { %127 = vrot.lane.b32.xlu1 %v4306_v11, %s4179_s12  ;;  %129 = vrot.lane.b32.xlu2 %v4311_v12, %s4179_s12 }
  0x3b   :  { %81 = vrot.lane.b32.xlu0 %v4316_v13, %s4178_s5 }
  0x42   :  { %162 = vrot.lane.b32.xlu1 %v4327_v14, %s4180_s15  ;;  %547 = vrot.lane.b32.xlu2 %v4267_v8, %s4181_s16 }
  0x43   :  { %160 = vrot.lane.b32.xlu0 %v4316_v13, %s4180_s15 }
  0x4a   :  { %579 = vrot.lane.b32.xlu1 %v4306_v11, %s4178_s5  ;;  %581 = vrot.lane.b32.xlu2 %v4311_v12, %s4178_s5 }
  0x4b   :  { %549 = vrot.lane.b32.xlu0 %v4306_v11, %s4181_s16 }
  0x52   :  { %613 = vrot.lane.b32.xlu1 %v4327_v14, %s4179_s12  ;;  %83 = vrot.lane.b32.xlu2 %v4327_v14, %s4178_s5 }
  0x53   :  { %611 = vrot.lane.b32.xlu0 %v4316_v13, %s4179_s12 }
  0x5a   :  { %131 = vrot.lane.b32.xlu1 %v4350_v15, %s4179_s12  ;;  %133 = vrot.lane.b32.xlu2 %v4355_v16, %s4179_s12 }
  0x5b   :  { %85 = vrot.lane.b32.xlu0 %v4360_v17, %s4178_s5 }
  0x5c   :  { %v396_v19 = vpop.permute.xlu2 %395 }
  0x62   :  { %166 = vrot.lane.b32.xlu1 %v4377_v21, %s4180_s15  ;;  %551 = vrot.lane.b32.xlu2 %v4311_v12, %s4181_s16 }
  0x63   :  { %164 = vrot.lane.b32.xlu0 %v4360_v17, %s4180_s15 }
  0x64   :  { %v398_v23 = vpop.permute.xlu2 %397 }
  0x6a   :  { %583 = vrot.lane.b32.xlu1 %v4350_v15, %s4178_s5  ;;  %585 = vrot.lane.b32.xlu2 %v4355_v16, %s4178_s5 }
  0x6b   :  { %553 = vrot.lane.b32.xlu0 %v4350_v15, %s4181_s16 }
  0x6c   :  { %v76_v25 = vpop.permute.xlu2 %75 }
  0x6d   :  { %v191_v52 = vsel %vm188_vm0, 0, %v76_v25 }
  0x72   :  { %617 = vrot.lane.b32.xlu1 %v4377_v21, %s4179_s12  ;;  %87 = vrot.lane.b32.xlu2 %v4377_v21, %s4178_s5 }
  0x73   :  { %615 = vrot.lane.b32.xlu0 %v4360_v17, %s4179_s12 }
  0x74   :  { %v364_v26 = vpop.permute.xlu1 %363  ;;  %v126_v27 = vpop.permute.xlu2 %125 }
  0x75   :  { %v332_v28 = vpop.permute.xlu0 %331 }
  0x76   :  { %v475_v37 = vsel %vm188_vm0, %v332_v28, %v364_v26 }
  0x77   :  { %v508_v42 = vsel %vm237_vm1, %v475_v37, %v396_v19 }
  0x7a   :  { %135 = vrot.lane.b32.xlu1 %v4406_v29, %s4179_s12  ;;  %137 = vrot.lane.b32.xlu2 %v4411_v30, %s4179_s12 }
  0x7b   :  { %89 = vrot.lane.b32.xlu0 %v4416_v31, %s4178_s5 }
  0x7c   :  { %v366_v32 = vpop.permute.xlu1 %365  ;;  %v544_v33 = vpop.permute.xlu2 %543 }
  0x7d   :  { %v334_v34 = vpop.permute.xlu0 %333  ;;  %v641_v26 = vsel %vm188_vm0, %v544_v33, %v4251_v5 }
  0x7e   :  { %v478_v36 = vsel %vm188_vm0, %v334_v34, %v366_v32 }
  0x7f   :  { %v510_v39 = vsel %vm237_vm1, %v478_v36, %v398_v23 }
  0x82   :  { %170 = vrot.lane.b32.xlu1 %v4427_v35, %s4180_s15  ;;  %555 = vrot.lane.b32.xlu2 %v4355_v16, %s4181_s16 }
  0x83   :  { %168 = vrot.lane.b32.xlu0 %v4416_v31, %s4180_s15 }
  0x84   :  { %v430_v38 = vpop.permute.xlu1 %429  ;;  %v578_v40 = vpop.permute.xlu2 %577 }
  0x85   :  { %v542_v41 = vsel %vm270_vm2, %v510_v39, %v430_v38  ;;  %v428_v43 = vpop.permute.xlu0 %427 }
  0x86   :  { %v1087_v44 = vunpack.c.l.b16 %v542_v41  ;;  %v540_v45 = vsel %vm270_vm2, %v508_v42, %v428_v43 }
  0x87   :  { %v1086_v46 = vunpack.c.l.b16 %v540_v45 }
  0x89   :  { %v1135_v47 = vpack.c.b16 %v1087_v44, %v1086_v46 }
  0x8a   :  { %587 = vrot.lane.b32.xlu1 %v4406_v29, %s4178_s5  ;;  %589 = vrot.lane.b32.xlu2 %v4411_v30, %s4178_s5 }
  0x8b   :  { %3862 = vmatmul.msk.bf16.vlgmr.msra.gmra.mxu1 %vm1176_vm3, %v1135_v47  ;;  %557 = vrot.lane.b32.xlu0 %v4406_v29, %s4181_s16 }
  0x8c   :  { %v124_v48 = vpop.permute.xlu1 %123  ;;  %v80_v49 = vpop.permute.xlu2 %79 }
  0x8d   :  { %v78_v50 = vpop.permute.xlu0 %77  ;;  %v239_v56 = vsel %vm237_vm1, %v191_v52, %v124_v48  ;;  %v197_v45 = vsel %vm188_vm0, %v4267_v8, %v80_v49 }
  0x8e   :  { %v194_v51 = vsel %vm188_vm0, %v4262_v7, %v78_v50 }
  0x8f   :  { %v241_v54 = vsel %vm237_vm1, %v194_v51, %v126_v27 }
  0x92   :  { %621 = vrot.lane.b32.xlu1 %v4427_v35, %s4179_s12  ;;  %91 = vrot.lane.b32.xlu2 %v4427_v35, %s4178_s5 }
  0x93   :  { %619 = vrot.lane.b32.xlu0 %v4416_v31, %s4179_s12 }
  0x94   :  { %v159_v53 = vpop.permute.xlu1 %158  ;;  %v130_v55 = vpop.permute.xlu2 %129 }
  0x95   :  { %v157_v57 = vpop.permute.xlu0 %156  ;;  %v274_v58 = vsel %vm270_vm2, %v241_v54, %v159_v53 }
  0x96   :  { %v272_v59 = vsel %vm270_vm2, %v239_v56, %v157_v57  ;;  %v1057_v60 = vunpack.c.l.b16 %v274_v58  ;;  %v4526_v56 = vld [vmem:[%s6408_s0 + $0x54] sm:$0xf]  ;;  %v4531_v57 = vld [vmem:[%s6408_s0 + $0x5c] sm:$0xf] }
  0x97   :  { %v1056_v61 = vunpack.c.l.b16 %v272_v59 }
  0x99   :  { %v1120_v19 = vpack.c.b16 %v1057_v60, %v1056_v61 }
  0x9a   :  { %139 = vrot.lane.b32.xlu1 %v4464_v62, %s4179_s12  ;;  %141 = vrot.lane.b32.xlu2 %v4469_v63, %s4179_s12 }
  0x9b   :  { %93 = vrot.lane.b32.xlu0 %v4474_v18, %s4178_s5  ;;  %3847 = vmatmul.msk.bf16.vlgmr.msra.gmra.mxu0 %vm1176_vm3, %v1120_v19  ;;  %v4548_v19 = vld [vmem:[%s6408_s0 + $0x60] sm:$0xf] }
  0x9c   :  { %v576_v20 = vpop.permute.xlu1 %575  ;;  %v548_v22 = vpop.permute.xlu2 %547 }
  0x9d   :  { %v546_v23 = vpop.permute.xlu0 %545  ;;  %v688_v34 = vsel %vm237_vm1, %v641_v26, %v576_v20 }
  0x9e   :  { %v644_v25 = vsel %vm188_vm0, %v546_v23, %v4272_v9  ;;  %v647_v23 = vsel %vm188_vm0, %v548_v22, %v4283_v10 }
  0x9f   :  { %v690_v28 = vsel %vm237_vm1, %v644_v25, %v578_v40 }
  0xa2   :  { %174 = vrot.lane.b32.xlu1 %v4486_v24, %s4180_s15  ;;  %559 = vrot.lane.b32.xlu2 %v4411_v30, %s4181_s16 }
  0xa3   :  { %172 = vrot.lane.b32.xlu0 %v4474_v18, %s4180_s15 }
  0xa4   :  { %v610_v27 = vpop.permute.xlu1 %609  ;;  %v582_v32 = vpop.permute.xlu2 %581 }
  0xa5   :  { %v608_v36 = vpop.permute.xlu0 %607  ;;  %v722_v37 = vsel %vm270_vm2, %v690_v28, %v610_v27 }
  0xa6   :  { %v720_v33 = vsel %vm270_vm2, %v688_v34, %v608_v36  ;;  %v1089_v38 = vunpack.c.l.b16 %v722_v37 }
  0xa7   :  { %v1088_v39 = vunpack.c.l.b16 %v720_v33 }
  0xa9   :  { %v1136_v41 = vpack.c.b16 %v1089_v38, %v1088_v39 }
  0xaa   :  { %591 = vrot.lane.b32.xlu1 %v4464_v62, %s4178_s5  ;;  %593 = vrot.lane.b32.xlu2 %v4469_v63, %s4178_s5 }
  0xab   :  { %561 = vrot.lane.b32.xlu0 %v4464_v62, %s4181_s16  ;;  %3863 = vmatmul.msk.bf16.gmra.mxu1 %vm1176_vm3, %v1136_v41 }
  0xac   :  { %v128_v40 = vpop.permute.xlu1 %127  ;;  %v84_v42 = vpop.permute.xlu2 %83 }
  0xad   :  { %v82_v43 = vpop.permute.xlu0 %81  ;;  %v243_v50 = vsel %vm237_vm1, %v197_v45, %v128_v40 }
  0xae   :  { %v200_v44 = vsel %vm188_vm0, %v4306_v11, %v82_v43  ;;  %v203_v43 = vsel %vm188_vm0, %v4311_v12, %v84_v42 }
  0xaf   :  { %v245_v47 = vsel %vm237_vm1, %v200_v44, %v130_v55  ;;  %v4536_v55 = vld [vmem:[%s6408_s0 + $0x58] sm:$0xf] }
  0xb2   :  { %625 = vrot.lane.b32.xlu1 %v4486_v24, %s4179_s12  ;;  %95 = vrot.lane.b32.xlu2 %v4486_v24, %s4178_s5 }
  0xb3   :  { %623 = vrot.lane.b32.xlu0 %v4474_v18, %s4179_s12 }
  0xb4   :  { %v163_v46 = vpop.permute.xlu1 %162  ;;  %v134_v48 = vpop.permute.xlu2 %133 }
  0xb5   :  { %v161_v51 = vpop.permute.xlu0 %160  ;;  %v278_v52 = vsel %vm270_vm2, %v245_v47, %v163_v46 }
  0xb6   :  { %v276_v49 = vsel %vm270_vm2, %v243_v50, %v161_v51  ;;  %v1059_v53 = vunpack.c.l.b16 %v278_v52 }
  0xb7   :  { %v1058_v54 = vunpack.c.l.b16 %v276_v49 }
  0xb9   :  { %v1121_v58 = vpack.c.b16 %v1059_v53, %v1058_v54  ;;  %v4588_v53 = vld [vmem:[%s6408_s0 + $0x64] sm:$0xf]  ;;  %v4593_v54 = vld [vmem:[%s6408_s0 + $0x68] sm:$0xf] }
  0xba   :  { %143 = vrot.lane.b32.xlu1 %v4526_v56, %s4179_s12  ;;  %145 = vrot.lane.b32.xlu2 %v4531_v57, %s4179_s12 }
  0xbb   :  { %97 = vrot.lane.b32.xlu0 %v4536_v55, %s4178_s5  ;;  %3848 = vmatmul.msk.bf16.gmra.mxu0 %vm1176_vm3, %v1121_v58 }
  0xbc   :  { %v580_v59 = vpop.permute.xlu1 %579  ;;  %v552_v60 = vpop.permute.xlu2 %551 }
  0xbd   :  { %v550_v61 = vpop.permute.xlu0 %549  ;;  %v692_v28 = vsel %vm237_vm1, %v647_v23, %v580_v59  ;;  %v653_v23 = vsel %vm188_vm0, %v552_v60, %v4327_v14 }
  0xbe   :  { %v650_v20 = vsel %vm188_vm0, %v550_v61, %v4316_v13 }
  0xbf   :  { %v694_v26 = vsel %vm237_vm1, %v650_v20, %v582_v32 }
  0xc2   :  { %178 = vrot.lane.b32.xlu1 %v4548_v19, %s4180_s15  ;;  %563 = vrot.lane.b32.xlu2 %v4469_v63, %s4181_s16 }
  0xc3   :  { %176 = vrot.lane.b32.xlu0 %v4536_v55, %s4180_s15 }
  0xc4   :  { %v614_v25 = vpop.permute.xlu1 %613  ;;  %v586_v27 = vpop.permute.xlu2 %585 }
  0xc5   :  { %v612_v34 = vpop.permute.xlu0 %611  ;;  %v726_v36 = vsel %vm270_vm2, %v694_v26, %v614_v25 }
  0xc6   :  { %v724_v22 = vsel %vm270_vm2, %v692_v28, %v612_v34  ;;  %v1091_v37 = vunpack.c.l.b16 %v726_v36 }
  0xc7   :  { %v1090_v33 = vunpack.c.l.b16 %v724_v22 }
  0xc9   :  { %v1137_v38 = vpack.c.b16 %v1091_v37, %v1090_v33 }
  0xca   :  { %595 = vrot.lane.b32.xlu1 %v4526_v56, %s4178_s5  ;;  %597 = vrot.lane.b32.xlu2 %v4531_v57, %s4178_s5 }
  0xcb   :  { %565 = vrot.lane.b32.xlu0 %v4526_v56, %s4181_s16  ;;  %3864 = vmatmul.msk.bf16.gmra.mxu1 %vm1176_vm3, %v1137_v38 }
  0xcc   :  { %v132_v32 = vpop.permute.xlu1 %131  ;;  %v88_v39 = vpop.permute.xlu2 %87 }
  0xcd   :  { %v86_v41 = vpop.permute.xlu0 %85  ;;  %v247_v47 = vsel %vm237_vm1, %v203_v43, %v132_v32  ;;  %v209_v43 = vsel %vm188_vm0, %v4355_v16, %v88_v39 }
  0xce   :  { %v206_v40 = vsel %vm188_vm0, %v4350_v15, %v86_v41 }
  0xcf   :  { %v249_v45 = vsel %vm237_vm1, %v206_v40, %v134_v48 }
  0xd2   :  { %629 = vrot.lane.b32.xlu1 %v4548_v19, %s4179_s12  ;;  %99 = vrot.lane.b32.xlu2 %v4548_v19, %s4178_s5 }
  0xd3   :  { %627 = vrot.lane.b32.xlu0 %v4536_v55, %s4179_s12 }
  0xd4   :  { %v167_v44 = vpop.permute.xlu1 %166  ;;  %v138_v46 = vpop.permute.xlu2 %137 }
  0xd5   :  { %v165_v50 = vpop.permute.xlu0 %164  ;;  %v282_v51 = vsel %vm270_vm2, %v249_v45, %v167_v44 }
  0xd6   :  { %v280_v42 = vsel %vm270_vm2, %v247_v47, %v165_v50  ;;  %v1061_v52 = vunpack.c.l.b16 %v282_v51 }
  0xd7   :  { %v1060_v49 = vunpack.c.l.b16 %v280_v42 }
  0xd9   :  { %v1122_v48 = vpack.c.b16 %v1061_v52, %v1060_v49 }
  0xda   :  { %147 = vrot.lane.b32.xlu1 %v4588_v53, %s4179_s12  ;;  %149 = vrot.lane.b32.xlu2 %v4224_v2, %s4179_s12 }
  0xdb   :  { %101 = vrot.lane.b32.xlu0 %v4593_v54, %s4178_s5  ;;  %3849 = vmatmul.msk.bf16.gmra.mxu0 %vm1176_vm3, %v1122_v48 }
  0xdc   :  { %v584_v58 = vpop.permute.xlu1 %583  ;;  %v556_v59 = vpop.permute.xlu2 %555 }
  0xdd   :  { %v554_v61 = vpop.permute.xlu0 %553  ;;  %v696_v34 = vsel %vm237_vm1, %v653_v23, %v584_v58  ;;  %v659_v23 = vsel %vm188_vm0, %v556_v59, %v4377_v21 }
  0xde   :  { %v656_v20 = vsel %vm188_vm0, %v554_v61, %v4360_v17 }
  0xdf   :  { %v698_v26 = vsel %vm237_vm1, %v656_v20, %v586_v27 }
  0xe2   :  { %182 = vrot.lane.b32.xlu1 %v4219_v1, %s4180_s15  ;;  %567 = vrot.lane.b32.xlu2 %v4531_v57, %s4181_s16 }
  0xe3   :  { %180 = vrot.lane.b32.xlu0 %v4593_v54, %s4180_s15 }
  0xe4   :  { %v618_v25 = vpop.permute.xlu1 %617  ;;  %v590_v28 = vpop.permute.xlu2 %589 }
  0xe5   :  { %v616_v36 = vpop.permute.xlu0 %615  ;;  %v730_v22 = vsel %vm270_vm2, %v698_v26, %v618_v25 }
  0xe6   :  { %v728_v60 = vsel %vm270_vm2, %v696_v34, %v616_v36  ;;  %v1093_v37 = vunpack.c.l.b16 %v730_v22 }
  0xe7   :  { %v1092_v33 = vunpack.c.l.b16 %v728_v60 }
  0xe9   :  { %v1138_v38 = vpack.c.b16 %v1093_v37, %v1092_v33 }
  0xea   :  { %599 = vrot.lane.b32.xlu1 %v4588_v53, %s4178_s5  ;;  %601 = vrot.lane.b32.xlu2 %v4224_v2, %s4178_s5 }
  0xeb   :  { %569 = vrot.lane.b32.xlu0 %v4588_v53, %s4181_s16  ;;  %3865 = vmatmul.msk.bf16.gmra.mxu1 %vm1176_vm3, %v1138_v38 }
  0xec   :  { %v136_v27 = vpop.permute.xlu1 %135  ;;  %v92_v32 = vpop.permute.xlu2 %91 }
  0xed   :  { %v90_v41 = vpop.permute.xlu0 %89  ;;  %v251_v50 = vsel %vm237_vm1, %v209_v43, %v136_v27  ;;  %v215_v43 = vsel %vm188_vm0, %v4411_v30, %v92_v32 }
  0xee   :  { %v212_v40 = vsel %vm188_vm0, %v4406_v29, %v90_v41 }
  0xef   :  { %v253_v45 = vsel %vm237_vm1, %v212_v40, %v138_v46 }
  0xf2   :  { %633 = vrot.lane.b32.xlu1 %v4219_v1, %s4179_s12  ;;  %103 = vrot.lane.b32.xlu2 %v4219_v1, %s4178_s5 }
  0xf3   :  { %631 = vrot.lane.b32.xlu0 %v4593_v54, %s4179_s12 }
  0xf4   :  { %v171_v44 = vpop.permute.xlu1 %170  ;;  %v142_v47 = vpop.permute.xlu2 %141 }
  0xf5   :  { %v169_v51 = vpop.permute.xlu0 %168  ;;  %v286_v42 = vsel %vm270_vm2, %v253_v45, %v171_v44 }
  0xf6   :  { %v284_v39 = vsel %vm270_vm2, %v251_v50, %v169_v51  ;;  %v1063_v52 = vunpack.c.l.b16 %v286_v42 }
  0xf7   :  { %v1062_v49 = vunpack.c.l.b16 %v284_v39 }
  0xf9   :  { %v1123_v48 = vpack.c.b16 %v1063_v52, %v1062_v49 }
  0xfa   :  { %151 = vrot.lane.b32.xlu1 %v4214_v0, %s4179_s12  ;;  %153 = vrot.lane.b32.xlu2 %v4235_v3, %s4179_s12 }
  0xfb   :  { %105 = vrot.lane.b32.xlu0 %v4240_v4, %s4178_s5  ;;  %3850 = vmatmul.msk.bf16.gmra.mxu0 %vm1176_vm3, %v1123_v48 }
  0xfc   :  { %v588_v46 = vpop.permute.xlu1 %587  ;;  %v560_v58 = vpop.permute.xlu2 %559 }
  0xfd   :  { %v558_v61 = vpop.permute.xlu0 %557  ;;  %v700_v36 = vsel %vm237_vm1, %v659_v23, %v588_v46 }
  0xfe   :  { %v662_v20 = vsel %vm188_vm0, %v558_v61, %v4416_v31 }
  0xff   :  { %v702_v26 = vsel %vm237_vm1, %v662_v20, %v590_v28  ;;  %v665_v20 = vsel %vm188_vm0, %v560_v58, %v4427_v35 }
 0x102   :  { %186 = vrot.lane.b32.xlu1 %v6413_v6, %s4180_s15  ;;  %571 = vrot.lane.b32.xlu2 %v4224_v2, %s4181_s16 }
 0x103   :  { %184 = vrot.lane.b32.xlu0 %v4240_v4, %s4180_s15 }
 0x104   :  { %v622_v25 = vpop.permute.xlu1 %621  ;;  %v594_v34 = vpop.permute.xlu2 %593 }
 0x105   :  { %v620_v22 = vpop.permute.xlu0 %619  ;;  %v734_v60 = vsel %vm270_vm2, %v702_v26, %v622_v25 }
 0x106   :  { %v732_v59 = vsel %vm270_vm2, %v700_v36, %v620_v22  ;;  %v1095_v37 = vunpack.c.l.b16 %v734_v60 }
 0x107   :  { %v1094_v33 = vunpack.c.l.b16 %v732_v59 }
 0x109   :  { %v1139_v38 = vpack.c.b16 %v1095_v37, %v1094_v33 }
 0x10a   :  { %603 = vrot.lane.b32.xlu1 %v4214_v0, %s4178_s5  ;;  %605 = vrot.lane.b32.xlu2 %v4235_v3, %s4178_s5 }
 0x10b   :  { %573 = vrot.lane.b32.xlu0 %v4214_v0, %s4181_s16  ;;  %3866 = vmatmul.msk.bf16.gmra.mxu1 %vm1176_vm3, %v1139_v38  ;;  %s4182_s16 = smov 104  }
 0x10c   :  { %v140_v28 = vpop.permute.xlu1 %139  ;;  %v96_v27 = vpop.permute.xlu2 %95 }
 0x10d   :  { %v94_v41 = vpop.permute.xlu0 %93  ;;  %v255_v50 = vsel %vm237_vm1, %v215_v43, %v140_v28 }
 0x10e   :  { %v218_v40 = vsel %vm188_vm0, %v4464_v62, %v94_v41 }
 0x10f   :  { %v257_v44 = vsel %vm237_vm1, %v218_v40, %v142_v47  ;;  %v221_v40 = vsel %vm188_vm0, %v4469_v63, %v96_v27 }
 0x112   :  { %637 = vrot.lane.b32.xlu1 %v6413_v6, %s4179_s12  ;;  %303 = vrot.lane.b32.xlu2 %v6413_v6, %s4175_s23 }
 0x113   :  { %635 = vrot.lane.b32.xlu0 %v4240_v4, %s4179_s12 }
 0x114   :  { %v175_v3 = vpop.permute.xlu1 %174  ;;  %v146_v45 = vpop.permute.xlu2 %145 }
 0x115   :  { %v173_v51 = vpop.permute.xlu0 %172  ;;  %v290_v42 = vsel %vm270_vm2, %v257_v44, %v175_v3 }
 0x116   :  { %v288_v32 = vsel %vm270_vm2, %v255_v50, %v173_v51  ;;  %v1065_v39 = vunpack.c.l.b16 %v290_v42 }
 0x117   :  { %v1064_v52 = vunpack.c.l.b16 %v288_v32 }
 0x119   :  { %v1124_v49 = vpack.c.b16 %v1065_v39, %v1064_v52 }
 0x11a   :  { %335 = vrot.lane.b32.xlu1 %v4251_v5, %s4174_s22  ;;  %337 = vrot.lane.b32.xlu2 %v4272_v9, %s4174_s22 }
 0x11b   :  { %305 = vrot.lane.b32.xlu0 %v4262_v7, %s4175_s23  ;;  %3851 = vmatmul.msk.bf16.gmra.mxu0 %vm1176_vm3, %v1124_v49 }
 0x11c   :  { %v592_v47 = vpop.permute.xlu1 %591  ;;  %v564_v48 = vpop.permute.xlu2 %563 }
 0x11d   :  { %v562_v46 = vpop.permute.xlu0 %561  ;;  %v704_v36 = vsel %vm237_vm1, %v665_v20, %v592_v47  ;;  %v671_v47 = vsel %vm188_vm0, %v564_v48, %v4486_v24 }
 0x11e   :  { %v668_v61 = vsel %vm188_vm0, %v562_v46, %v4474_v18 }
 0x11f   :  { %v706_v25 = vsel %vm237_vm1, %v668_v61, %v594_v34 }
 0x122   :  { %369 = vrot.lane.b32.xlu1 %v4267_v8, %s4173_s21  ;;  %399 = vrot.lane.b32.xlu2 %v4272_v9, %s4177_s30 }
 0x123   :  { %367 = vrot.lane.b32.xlu0 %v4262_v7, %s4173_s21 }
 0x124   :  { %v626_v23 = vpop.permute.xlu1 %625  ;;  %v598_v26 = vpop.permute.xlu2 %597 }
 0x125   :  { %v624_v22 = vpop.permute.xlu0 %623  ;;  %v738_v60 = vsel %vm270_vm2, %v706_v25, %v626_v23 }
 0x126   :  { %v736_v58 = vsel %vm270_vm2, %v704_v36, %v624_v22  ;;  %v1097_v59 = vunpack.c.l.b16 %v738_v60 }
 0x127   :  { %v1096_v37 = vunpack.c.l.b16 %v736_v58 }
 0x129   :  { %v1140_v33 = vpack.c.b16 %v1097_v59, %v1096_v37 }
 0x12a   :  { %751 = vrot.lane.b32.xlu1 %v6413_v6, %s4182_s16  ;;  %753 = vrot.lane.b32.xlu2 %v4262_v7, %s4182_s16 }
 0x12b   :  { %401 = vrot.lane.b32.xlu0 %v4283_v10, %s4177_s30  ;;  %3867 = vmatmul.msk.bf16.gmra.mxu1 %vm1176_vm3, %v1140_v33 }
 0x12c   :  { %v144_v34 = vpop.permute.xlu1 %143  ;;  %v100_v38 = vpop.permute.xlu2 %99 }
 0x12d   :  { %v98_v28 = vpop.permute.xlu0 %97  ;;  %v259_v50 = vsel %vm237_vm1, %v221_v40, %v144_v34  ;;  %v227_v33 = vsel %vm188_vm0, %v4531_v57, %v100_v38 }
 0x12e   :  { %v224_v41 = vsel %vm188_vm0, %v4526_v56, %v98_v28 }
 0x12f   :  { %v261_v3 = vsel %vm237_vm1, %v224_v41, %v146_v45 }
 0x132   :  { %785 = vrot.lane.b32.xlu1 %v4272_v9, %s4175_s23  ;;  %815 = vrot.lane.b32.xlu2 %v4262_v7, %s4174_s22 }
 0x133   :  { %783 = vrot.lane.b32.xlu0 %v4251_v5, %s4175_s23 }
 0x134   :  { %v179_v43 = vpop.permute.xlu1 %178  ;;  %v150_v44 = vpop.permute.xlu2 %149 }
 0x135   :  { %v177_v51 = vpop.permute.xlu0 %176  ;;  %v294_v42 = vsel %vm270_vm2, %v261_v3, %v179_v43 }
 0x136   :  { %v292_v27 = vsel %vm270_vm2, %v259_v50, %v177_v51  ;;  %v1067_v32 = vunpack.c.l.b16 %v294_v42 }
 0x137   :  { %v1066_v39 = vunpack.c.l.b16 %v292_v27 }
 0x139   :  { %v1125_v52 = vpack.c.b16 %v1067_v32, %v1066_v39 }
 0x13a   :  { %847 = vrot.lane.b32.xlu1 %v4272_v9, %s4173_s21  ;;  %849 = vrot.lane.b32.xlu2 %v4283_v10, %s4173_s21 }
 0x13b   :  { %817 = vrot.lane.b32.xlu0 %v4267_v8, %s4174_s22  ;;  %3852 = vmatmul.msk.bf16.gmra.mxu0 %vm1176_vm3, %v1125_v52 }
 0x13c   :  { %v596_v5 = vpop.permute.xlu1 %595  ;;  %v568_v7 = vpop.permute.xlu2 %567 }
 0x13d   :  { %v566_v45 = vpop.permute.xlu0 %565  ;;  %v708_v20 = vsel %vm237_vm1, %v671_v47, %v596_v5  ;;  %v677_v39 = vsel %vm188_vm0, %v568_v7, %v4548_v19 }
 0x13e   :  { %v674_v49 = vsel %vm188_vm0, %v566_v45, %v4536_v55 }
 0x13f   :  { %v710_v46 = vsel %vm237_vm1, %v674_v49, %v598_v26 }
 0x142   :  { %309 = vrot.lane.b32.xlu1 %v4306_v11, %s4175_s23  ;;  %339 = vrot.lane.b32.xlu2 %v4283_v10, %s4174_s22 }
 0x143   :  { %307 = vrot.lane.b32.xlu0 %v4267_v8, %s4175_s23 }
 0x144   :  { %v630_v9 = vpop.permute.xlu1 %629  ;;  %v602_v61 = vpop.permute.xlu2 %601 }
 0x145   :  { %v628_v23 = vpop.permute.xlu0 %627  ;;  %v742_v25 = vsel %vm270_vm2, %v710_v46, %v630_v9 }
 0x146   :  { %v740_v48 = vsel %vm270_vm2, %v708_v20, %v628_v23  ;;  %v1099_v36 = vunpack.c.l.b16 %v742_v25 }
 0x147   :  { %v1098_v22 = vunpack.c.l.b16 %v740_v48 }
 0x149   :  { %v1141_v60 = vpack.c.b16 %v1099_v36, %v1098_v22 }
 0x14a   :  { %371 = vrot.lane.b32.xlu1 %v4306_v11, %s4173_s21  ;;  %373 = vrot.lane.b32.xlu2 %v4311_v12, %s4173_s21 }
 0x14b   :  { %341 = vrot.lane.b32.xlu0 %v4316_v13, %s4174_s22  ;;  %3868 = vmatmul.msk.bf16.gmra.mxu1 %vm1176_vm3, %v1141_v60 }
 0x14c   :  { %v148_v26 = vpop.permute.xlu1 %147  ;;  %v104_v58 = vpop.permute.xlu2 %103 }
 0x14d   :  { %v102_v59 = vpop.permute.xlu0 %101  ;;  %v263_v40 = vsel %vm237_vm1, %v227_v33, %v148_v26  ;;  %v233_v25 = vsel %vm188_vm0, %v4224_v2, %v104_v58 }
 0x14e   :  { %v230_v37 = vsel %vm188_vm0, %v4588_v53, %v102_v59 }
 0x14f   :  { %v265_v28 = vsel %vm237_vm1, %v230_v37, %v150_v44 }
 0x152   :  { %405 = vrot.lane.b32.xlu1 %v4327_v14, %s4177_s30  ;;  %755 = vrot.lane.b32.xlu2 %v4267_v8, %s4182_s16 }
 0x153   :  { %403 = vrot.lane.b32.xlu0 %v4316_v13, %s4177_s30 }
 0x154   :  { %v183_v34 = vpop.permute.xlu1 %182  ;;  %v154_v41 = vpop.permute.xlu2 %153 }
 0x155   :  { %v181_v43 = vpop.permute.xlu0 %180  ;;  %v298_v3 = vsel %vm270_vm2, %v265_v28, %v183_v34 }
 0x156   :  { %v296_v38 = vsel %vm270_vm2, %v263_v40, %v181_v43  ;;  %v1069_v50 = vunpack.c.l.b16 %v298_v3 }
 0x157   :  { %v1068_v51 = vunpack.c.l.b16 %v296_v38 }
 0x159   :  { %v1126_v42 = vpack.c.b16 %v1069_v50, %v1068_v51 }
 0x15a   :  { %787 = vrot.lane.b32.xlu1 %v4283_v10, %s4175_s23  ;;  %789 = vrot.lane.b32.xlu2 %v4316_v13, %s4175_s23 }
 0x15b   :  { %757 = vrot.lane.b32.xlu0 %v4306_v11, %s4182_s16  ;;  %3853 = vmatmul.msk.bf16.gmra.mxu0 %vm1176_vm3, %v1126_v42 }
 0x15c   :  { %v600_v8 = vpop.permute.xlu1 %599  ;;  %v572_v44 = vpop.permute.xlu2 %571 }
 0x15d   :  { %v570_v27 = vpop.permute.xlu0 %569  ;;  %v712_v45 = vsel %vm237_vm1, %v677_v39, %v600_v8  ;;  %v683_v40 = vsel %vm188_vm0, %v572_v44, %v4219_v1 }
 0x15e   :  { %v680_v32 = vsel %vm188_vm0, %v570_v27, %v4593_v54 }
 0x15f   :  { %v714_v52 = vsel %vm237_vm1, %v680_v32, %v602_v61 }
 0x162   :  { %821 = vrot.lane.b32.xlu1 %v4311_v12, %s4174_s22  ;;  %851 = vrot.lane.b32.xlu2 %v4316_v13, %s4173_s21 }
 0x163   :  { %819 = vrot.lane.b32.xlu0 %v4306_v11, %s4174_s22 }
 0x164   :  { %v634_v10 = vpop.permute.xlu1 %633  ;;  %v606_v5 = vpop.permute.xlu2 %605 }
 0x165   :  { %v632_v49 = vpop.permute.xlu0 %631  ;;  %v746_v47 = vsel %vm270_vm2, %v714_v52, %v634_v10 }
 0x166   :  { %v744_v7 = vsel %vm270_vm2, %v712_v45, %v632_v49  ;;  %v1101_v9 = vunpack.c.l.b16 %v746_v47 }
 0x167   :  { %v1100_v46 = vunpack.c.l.b16 %v744_v7 }
 0x169   :  { %v1142_v20 = vpack.c.b16 %v1101_v9, %v1100_v46 }
 0x16a   :  { %311 = vrot.lane.b32.xlu1 %v4311_v12, %s4175_s23  ;;  %313 = vrot.lane.b32.xlu2 %v4350_v15, %s4175_s23 }
 0x16b   :  { %853 = vrot.lane.b32.xlu0 %v4327_v14, %s4173_s21  ;;  %3869 = vmatmul.msk.bf16.gmra.mxu1 %vm1176_vm3, %v1142_v20 }
 0x16c   :  { %v152_v11 = vpop.permute.xlu1 %151  ;;  %v304_v13 = vpop.permute.xlu2 %303 }
 0x16d   :  { %v106_v61 = vpop.permute.xlu0 %105  ;;  %v267_v60 = vsel %vm237_vm1, %v233_v25, %v152_v11 }
 0x16e   :  { %v236_v23 = vsel %vm188_vm0, %v4214_v0, %v106_v61 }
 0x16f   :  { %v269_v36 = vsel %vm237_vm1, %v236_v23, %v154_v41  ;;  %v4861_v23 = vpop.f32.mrf.mxu0 }
 0x172   :  { %345 = vrot.lane.b32.xlu1 %v4360_v17, %s4174_s22  ;;  %375 = vrot.lane.b32.xlu2 %v4350_v15, %s4173_s21 }
 0x173   :  { %343 = vrot.lane.b32.xlu0 %v4327_v14, %s4174_s22 }
 0x174   :  { %v187_v48 = vpop.permute.xlu1 %186  ;;  %v338_v22 = vpop.permute.xlu2 %337 }
 0x175   :  { %v185_v26 = vpop.permute.xlu0 %184  ;;  %v302_v0 = vsel %vm270_vm2, %v269_v36, %v187_v48  ;;  %v4863_v48 = vpop.f32.mrf.mxu1 }
 0x176   :  { %v300_v2 = vsel %vm270_vm2, %v267_v60, %v185_v26  ;;  %v1071_v58 = vunpack.c.l.b16 %v302_v0 }
 0x177   :  { %v1070_v59 = vunpack.c.l.b16 %v300_v2 }
 0x179   :  { %v1127_v37 = vpack.c.b16 %v1071_v58, %v1070_v59 }
 0x17a   :  { %407 = vrot.lane.b32.xlu1 %v4360_v17, %s4177_s30  ;;  %409 = vrot.lane.b32.xlu2 %v4377_v21, %s4177_s30 }
 0x17b   :  { %377 = vrot.lane.b32.xlu0 %v4355_v16, %s4173_s21  ;;  %3854 = vmatmul.msk.bf16.gmra.mxu0 %vm1176_vm3, %v1127_v37 }
 0x17c   :  { %v604_v33 = vpop.permute.xlu1 %603  ;;  %v400_v34 = vpop.permute.xlu2 %399 }
 0x17d   :  { %v574_v28 = vpop.permute.xlu0 %573  ;;  %v716_v50 = vsel %vm237_vm1, %v683_v40, %v604_v33  ;;  %v4876_v33 = vpop.f32.mrf.mxu0 }
 0x17e   :  { %v686_v41 = vsel %vm188_vm0, %v574_v28, %v4240_v4  ;;  %v4879_v28 = vpop.f32.mrf.mxu1 }
 0x17f   :  { %v718_v43 = vsel %vm237_vm1, %v686_v41, %v606_v5  ;;  %6421 = vst [vmem:[#allocation3_spill] sm:$0xff] %v4879_v28 }
 0x182   :  { %761 = vrot.lane.b32.xlu1 %v4350_v15, %s4182_s16  ;;  %791 = vrot.lane.b32.xlu2 %v4327_v14, %s4175_s23 }
 0x183   :  { %759 = vrot.lane.b32.xlu0 %v4311_v12, %s4182_s16 }
 0x184   :  { %v4823_v3 = vpop.permute.xlu1 %637  ;;  %v754_v38 = vpop.permute.xlu2 %753 }
 0x185   :  { %6420 = vst [vmem:[#allocation2_spill] sm:$0xff] %v4823_v3  ;;  %v636_v4 = vpop.permute.xlu0 %635  ;;  %v750_v1 = vsel %vm270_vm2, %v718_v43, %v4823_v3 }
 0x186   :  { %v748_v51 = vsel %vm270_vm2, %v716_v50, %v636_v4  ;;  %v1103_v42 = vunpack.c.l.b16 %v750_v1  ;;  %v4888_v50 = vpop.f32.mrf.mxu0  ;;  %v4890_v4 = vpop.f32.mrf.mxu1 }
 0x187   :  { %v1102_v8 = vunpack.c.l.b16 %v748_v51 }
 0x189   :  { %v1143_v44 = vpack.c.b16 %v1103_v42, %v1102_v8 }
 0x18a   :  { %823 = vrot.lane.b32.xlu1 %v4350_v15, %s4174_s22  ;;  %825 = vrot.lane.b32.xlu2 %v4355_v16, %s4174_s22 }
 0x18b   :  { %793 = vrot.lane.b32.xlu0 %v4360_v17, %s4175_s23  ;;  %3870 = vmatmul.msk.bf16.gmra.mxu1 %vm1176_vm3, %v1143_v44 }
 0x18c   :  { %v336_v12 = vpop.permute.xlu1 %335  ;;  %v816_v14 = vpop.permute.xlu2 %815 }
 0x18d   :  { %v306_v27 = vpop.permute.xlu0 %305  ;;  %v433_v10 = vsel %vm188_vm0, %v304_v13, %v336_v12 }
 0x18e   :  { %v436_v5 = vsel %vm188_vm0, %v306_v27, %v338_v22  ;;  %v4898_v51 = vpop.f32.mrf.mxu0 }
 0x192   :  { %857 = vrot.lane.b32.xlu1 %v4377_v21, %s4173_s21  ;;  %315 = vrot.lane.b32.xlu2 %v4355_v16, %s4175_s23 }
 0x193   :  { %855 = vrot.lane.b32.xlu0 %v4360_v17, %s4173_s21 }
 0x194   :  { %v370_v15 = vpop.permute.xlu1 %369  ;;  %v850_v32 = vpop.permute.xlu2 %849 }
 0x195   :  { %v368_v39 = vpop.permute.xlu0 %367  ;;  %v482_v47 = vsel %vm237_vm1, %v436_v5, %v370_v15 }
 0x196   :  { %v480_v52 = vsel %vm237_vm1, %v433_v10, %v368_v39  ;;  %v4914_v5 = vpop.f32.mrf.mxu0 }
 0x197   :  { %v512_v17 = vsel %vm270_vm2, %v480_v52, %v400_v34 }
 0x198   :  { %v1072_v46 = vunpack.c.l.b16 %v512_v17 }
 0x19a   :  { %347 = vrot.lane.b32.xlu1 %v4377_v21, %s4174_s22  ;;  %349 = vrot.lane.b32.xlu2 %v4416_v31, %s4174_s22 }
 0x19b   :  { %317 = vrot.lane.b32.xlu0 %v4406_v29, %s4175_s23 }
 0x19c   :  { %v752_v45 = vpop.permute.xlu1 %751  ;;  %v340_v49 = vpop.permute.xlu2 %339 }
 0x19d   :  { %v402_v7 = vpop.permute.xlu0 %401 }
 0x19e   :  { %v514_v9 = vsel %vm270_vm2, %v482_v47, %v402_v7 }
 0x19f   :  { %v1073_v20 = vunpack.c.l.b16 %v514_v9  ;;  %v4929_v9 = vpop.f32.mrf.mxu0 }
 0x1a1   :  { %v1128_v11 = vpack.c.b16 %v1073_v20, %v1072_v46 }
 0x1a2   :  { %381 = vrot.lane.b32.xlu1 %v4411_v30, %s4173_s21  ;;  %411 = vrot.lane.b32.xlu2 %v4416_v31, %s4177_s30 }
 0x1a3   :  { %379 = vrot.lane.b32.xlu0 %v4406_v29, %s4173_s21  ;;  %3855 = vmatmul.msk.bf16.gmra.mxu0 %vm1176_vm3, %v1128_v11 }
 0x1a4   :  { %v786_v13 = vpop.permute.xlu1 %785  ;;  %v374_v61 = vpop.permute.xlu2 %373 }
 0x1a5   :  { %v784_v25 = vpop.permute.xlu0 %783  ;;  %v884_v0 = vsel %vm188_vm0, %v754_v38, %v786_v13 }
 0x1a6   :  { %v881_v36 = vsel %vm188_vm0, %v752_v45, %v784_v25 }
 0x1a7   :  { %v928_v60 = vsel %vm237_vm1, %v881_v36, %v816_v14 }
 0x1aa   :  { %763 = vrot.lane.b32.xlu1 %v4355_v16, %s4182_s16  ;;  %765 = vrot.lane.b32.xlu2 %v4406_v29, %s4182_s16 }
 0x1ab   :  { %413 = vrot.lane.b32.xlu0 %v4427_v35, %s4177_s30 }
 0x1ac   :  { %v848_v22 = vpop.permute.xlu1 %847  ;;  %v756_v26 = vpop.permute.xlu2 %755 }
 0x1ad   :  { %v818_v2 = vpop.permute.xlu0 %817  ;;  %v960_v58 = vsel %vm270_vm2, %v928_v60, %v848_v22 }
 0x1ae   :  { %v930_v59 = vsel %vm237_vm1, %v884_v0, %v818_v2  ;;  %v1104_v37 = vunpack.c.l.b16 %v960_v58 }
 0x1af   :  { %v962_v16 = vsel %vm270_vm2, %v930_v59, %v850_v32 }
 0x1b0   :  { %v1105_v34 = vunpack.c.l.b16 %v962_v16 }
 0x1b2   :  { %797 = vrot.lane.b32.xlu1 %v4416_v31, %s4175_s23  ;;  %827 = vrot.lane.b32.xlu2 %v4406_v29, %s4174_s22  ;;  %v1144_v41 = vpack.c.b16 %v1105_v34, %v1104_v37 }
 0x1b3   :  { %795 = vrot.lane.b32.xlu0 %v4377_v21, %s4175_s23 }
 0x1b4   :  { %3871 = vmatmul.msk.bf16.gmra.mxu1 %vm1176_vm3, %v1144_v41  ;;  %v310_v40 = vpop.permute.xlu1 %309  ;;  %v790_v43 = vpop.permute.xlu2 %789 }
 0x1b5   :  { %v308_v38 = vpop.permute.xlu0 %307 }
 0x1b6   :  { %v439_v8 = vsel %vm188_vm0, %v308_v38, %v340_v49 }
 0x1ba   :  { %859 = vrot.lane.b32.xlu1 %v4416_v31, %s4173_s21  ;;  %861 = vrot.lane.b32.xlu2 %v4427_v35, %s4173_s21  ;;  %v4905_v31 = vpop.f32.mrf.mxu1 }
 0x1bb   :  { %829 = vrot.lane.b32.xlu0 %v4411_v30, %s4174_s22 }
 0x1bc   :  { %v372_v29 = vpop.permute.xlu1 %371  ;;  %v852_v21 = vpop.permute.xlu2 %851 }
 0x1bd   :  { %v342_v1 = vpop.permute.xlu0 %341  ;;  %v484_v27 = vsel %vm237_vm1, %v439_v8, %v372_v29 }
 0x1be   :  { %v442_v42 = vsel %vm188_vm0, %v310_v40, %v342_v1 }
 0x1bf   :  { %v486_v12 = vsel %vm237_vm1, %v442_v42, %v374_v61 }
 0x1c2   :  { %321 = vrot.lane.b32.xlu1 %v4464_v62, %s4175_s23  ;;  %351 = vrot.lane.b32.xlu2 %v4427_v35, %s4174_s22  ;;  %v4920_v45 = vpop.f32.mrf.mxu1 }
 0x1c3   :  { %319 = vrot.lane.b32.xlu0 %v4411_v30, %s4175_s23 }
 0x1c4   :  { %v406_v44 = vpop.permute.xlu1 %405  ;;  %v314_v14 = vpop.permute.xlu2 %313 }
 0x1c5   :  { %v404_v15 = vpop.permute.xlu0 %403  ;;  %v518_v32 = vsel %vm270_vm2, %v486_v12, %v406_v44 }
 0x1c6   :  { %v516_v39 = vsel %vm270_vm2, %v484_v27, %v404_v15  ;;  %v1075_v10 = vunpack.c.l.b16 %v518_v32 }
 0x1c7   :  { %v1074_v52 = vunpack.c.l.b16 %v516_v39 }
 0x1c9   :  { %v1129_v17 = vpack.c.b16 %v1075_v10, %v1074_v52 }
 0x1ca   :  { %383 = vrot.lane.b32.xlu1 %v4464_v62, %s4173_s21  ;;  %385 = vrot.lane.b32.xlu2 %v4469_v63, %s4173_s21  ;;  %v4933_v11 = vpop.f32.mrf.mxu1 }
 0x1cb   :  { %353 = vrot.lane.b32.xlu0 %v4474_v18, %s4174_s22  ;;  %3856 = vmatmul.msk.bf16.gmra.mxu0 %vm1176_vm3, %v1129_v17 }
 0x1cc   :  { %v788_v49 = vpop.permute.xlu1 %787  ;;  %v376_v47 = vpop.permute.xlu2 %375 }
 0x1cd   :  { %v758_v7 = vpop.permute.xlu0 %757  ;;  %v887_v61 = vsel %vm188_vm0, %v756_v26, %v788_v49 }
 0x1ce   :  { %v890_v36 = vsel %vm188_vm0, %v758_v7, %v790_v43  ;;  %v4996_v7 = vld [vmem:[%s6408_s0 + $0x70] sm:$0xf] }
 0x1d2   :  { %417 = vrot.lane.b32.xlu1 %v4486_v24, %s4177_s30  ;;  %767 = vrot.lane.b32.xlu2 %v4411_v30, %s4182_s16  ;;  %v4941_v30 = vpop.f32.mrf.mxu0  ;;  %v4947_v26 = vpop.f32.mrf.mxu1 }
 0x1d3   :  { %415 = vrot.lane.b32.xlu0 %v4474_v18, %s4177_s30 }
 0x1d4   :  { %v822_v46 = vpop.permute.xlu1 %821  ;;  %v410_v20 = vpop.permute.xlu2 %409 }
 0x1d5   :  { %v820_v13 = vpop.permute.xlu0 %819  ;;  %v934_v2 = vsel %vm237_vm1, %v890_v36, %v822_v46  ;;  %v5003_v46 = vld [vmem:[%s6408_s0 + $0x6c] sm:$0xf] }
 0x1d6   :  { %v932_v25 = vsel %vm237_vm1, %v887_v61, %v820_v13 }
 0x1d7   :  { %v964_v22 = vsel %vm270_vm2, %v932_v25, %v852_v21 }
 0x1d8   :  { %v1106_v59 = vunpack.c.l.b16 %v964_v22 }
 0x1da   :  { %799 = vrot.lane.b32.xlu1 %v4427_v35, %s4175_s23  ;;  %801 = vrot.lane.b32.xlu2 %v4474_v18, %s4175_s23  ;;  %v4958_v40 = vpop.f32.mrf.mxu0  ;;  %v4960_v38 = vpop.f32.mrf.mxu1 }
 0x1db   :  { %769 = vrot.lane.b32.xlu0 %v4464_v62, %s4182_s16 }
 0x1dc   :  { %v312_v60 = vpop.permute.xlu1 %311  ;;  %v792_v0 = vpop.permute.xlu2 %791 }
 0x1dd   :  { %v854_v58 = vpop.permute.xlu0 %853 }
 0x1de   :  { %v966_v35 = vsel %vm270_vm2, %v934_v2, %v854_v58 }
 0x1df   :  { %v1107_v37 = vunpack.c.l.b16 %v966_v35 }
 0x1e1   :  { %v1145_v16 = vpack.c.b16 %v1107_v37, %v1106_v59 }
 0x1e2   :  { %833 = vrot.lane.b32.xlu1 %v4469_v63, %s4174_s22  ;;  %863 = vrot.lane.b32.xlu2 %v4474_v18, %s4173_s21  ;;  %v4972_v1 = vpop.f32.mrf.mxu0  ;;  %v4977_v15 = vpop.f32.mrf.mxu1 }
 0x1e3   :  { %831 = vrot.lane.b32.xlu0 %v4464_v62, %s4174_s22  ;;  %3872 = vmatmul.msk.bf16.gmra.mxu1 %vm1176_vm3, %v1145_v16 }
 0x1e4   :  { %v346_v34 = vpop.permute.xlu1 %345  ;;  %v826_v41 = vpop.permute.xlu2 %825 }
 0x1e5   :  { %v344_v43 = vpop.permute.xlu0 %343  ;;  %v448_v42 = vsel %vm188_vm0, %v314_v14, %v346_v34 }
 0x1e6   :  { %v445_v29 = vsel %vm188_vm0, %v312_v60, %v344_v43 }
 0x1e7   :  { %v488_v18 = vsel %vm237_vm1, %v445_v29, %v376_v47 }
 0x1ea   :  { %775 = vrot.lane.b32.xlu1 %v4531_v57, %s4182_s16  ;;  %777 = vrot.lane.b32.xlu2 %v4588_v53, %s4182_s16  ;;  %v4987_v49 = vpop.f32.mrf.mxu0  ;;  %v4989_v47 = vpop.f32.mrf.mxu1 }
 0x1eb   :  { %865 = vrot.lane.b32.xlu0 %v4486_v24, %s4173_s21 }
 0x1ec   :  { %v408_v62 = vpop.permute.xlu1 %407  ;;  %v4970_v21 = vpop.permute.xlu2 %315 }
 0x1ed   :  { %v378_v8 = vpop.permute.xlu0 %377  ;;  %v520_v44 = vsel %vm270_vm2, %v488_v18, %v408_v62 }
 0x1ee   :  { %v490_v12 = vsel %vm237_vm1, %v448_v42, %v378_v8  ;;  %v1076_v27 = vunpack.c.l.b16 %v520_v44  ;;  %v4163_v42 = vld [vmem:[%s6408_s0 + $0x4c] sm:$0xf] }
 0x1ef   :  { %v522_v32 = vsel %vm270_vm2, %v490_v12, %v410_v20 }
 0x1f0   :  { %v1077_v39 = vunpack.c.l.b16 %v522_v32 }
 0x1f2   :  { %809 = vrot.lane.b32.xlu1 %v4593_v54, %s4175_s23  ;;  %839 = vrot.lane.b32.xlu2 %v4588_v53, %s4174_s22  ;;  %v1130_v10 = vpack.c.b16 %v1077_v39, %v1076_v27  ;;  %v5009_v25 = vpop.f32.mrf.mxu1 }
 0x1f3   :  { %807 = vrot.lane.b32.xlu0 %v4548_v19, %s4175_s23 }
 0x1f4   :  { %3857 = vmatmul.msk.bf16.gmra.mxu0 %vm1176_vm3, %v1130_v10  ;;  %v762_v14 = vpop.permute.xlu1 %761  ;;  %v350_v52 = vpop.permute.xlu2 %349  ;;  %v4164_v10 = vld [vmem:[%s6408_s0 + $0x50] sm:$0xf] }
 0x1f5   :  { %v760_v17 = vpop.permute.xlu0 %759 }
 0x1f6   :  { %v893_v22 = vsel %vm188_vm0, %v760_v17, %v792_v0 }
 0x1fa   :  { %871 = vrot.lane.b32.xlu1 %v4593_v54, %s4173_s21  ;;  %873 = vrot.lane.b32.xlu2 %v4996_v7, %s4173_s21  ;;  %v5007_v54 = vpop.f32.mrf.mxu0 }
 0x1fb   :  { %841 = vrot.lane.b32.xlu0 %v5003_v46, %s4174_s22 }
 0x1fc   :  { %v824_v20 = vpop.permute.xlu1 %823  ;;  %v412_v13 = vpop.permute.xlu2 %411 }
 0x1fd   :  { %v794_v61 = vpop.permute.xlu0 %793  ;;  %v936_v35 = vsel %vm237_vm1, %v893_v22, %v824_v20 }
 0x1fe   :  { %v896_v36 = vsel %vm188_vm0, %v762_v14, %v794_v61 }
 0x1ff   :  { %v938_v2 = vsel %vm237_vm1, %v896_v36, %v826_v41 }
 0x202   :  { %325 = vrot.lane.b32.xlu1 %v4526_v56, %s4175_s23  ;;  %355 = vrot.lane.b32.xlu2 %v4486_v24, %s4174_s22  ;;  %v5023_v29 = vpop.f32.mrf.mxu0 }
 0x203   :  { %323 = vrot.lane.b32.xlu0 %v4469_v63, %s4175_s23  ;;  %v5029_v63 = vpop.f32.mrf.mxu1 }
 0x204   :  { %v858_v60 = vpop.permute.xlu1 %857  ;;  %v766_v58 = vpop.permute.xlu2 %765 }
 0x205   :  { %v856_v59 = vpop.permute.xlu0 %855  ;;  %v970_v37 = vsel %vm270_vm2, %v938_v2, %v858_v60 }
 0x206   :  { %v968_v16 = vsel %vm270_vm2, %v936_v35, %v856_v59  ;;  %v1109_v34 = vunpack.c.l.b16 %v970_v37 }
 0x207   :  { %v1108_v43 = vunpack.c.l.b16 %v968_v16 }
 0x209   :  { %v1146_v24 = vpack.c.b16 %v1109_v34, %v1108_v43 }
 0x20a   :  { %387 = vrot.lane.b32.xlu1 %v4526_v56, %s4173_s21  ;;  %389 = vrot.lane.b32.xlu2 %v4531_v57, %s4173_s21  ;;  %v5034_v18 = vpop.f32.mrf.mxu0 }
 0x20b   :  { %357 = vrot.lane.b32.xlu0 %v4536_v55, %s4174_s22  ;;  %3873 = vmatmul.msk.bf16.gmra.mxu1 %vm1176_vm3, %v1146_v24  ;;  %v5042_v8 = vpop.f32.mrf.mxu1 }
 0x20c   :  { %v348_v0 = vpop.permute.xlu1 %347  ;;  %v828_v41 = vpop.permute.xlu2 %827 }
 0x20d   :  { %v318_v62 = vpop.permute.xlu0 %317  ;;  %v451_v32 = vsel %vm188_vm0, %v4970_v21, %v348_v0 }
 0x20e   :  { %v454_v17 = vsel %vm188_vm0, %v318_v62, %v350_v52 }
 0x212   :  { %421 = vrot.lane.b32.xlu1 %v4548_v19, %s4177_s30  ;;  %771 = vrot.lane.b32.xlu2 %v4163_v42, %s4182_s16  ;;  %v5055_v14 = vpop.f32.mrf.mxu0 }
 0x213   :  { %419 = vrot.lane.b32.xlu0 %v4536_v55, %s4177_s30  ;;  %6422 = vst [vmem:[#allocation4_spill] sm:$0xff] %v5055_v14  ;;  %v5064_v60 = vpop.f32.mrf.mxu1 }
 0x214   :  { %v382_v44 = vpop.permute.xlu1 %381  ;;  %v862_v12 = vpop.permute.xlu2 %861  ;;  %6423 = vst [vmem:[#allocation5_spill] sm:$0xff] %v5064_v60 }
 0x215   :  { %v380_v27 = vpop.permute.xlu0 %379  ;;  %v494_v36 = vsel %vm237_vm1, %v454_v17, %v382_v44 }
 0x216   :  { %v492_v39 = vsel %vm237_vm1, %v451_v32, %v380_v27 }
 0x217   :  { %v524_v21 = vsel %vm270_vm2, %v492_v39, %v412_v13 }
 0x218   :  { %v1078_v35 = vunpack.c.l.b16 %v524_v21 }
 0x21a   :  { %803 = vrot.lane.b32.xlu1 %v4164_v10, %s4175_s23  ;;  %805 = vrot.lane.b32.xlu2 %v4536_v55, %s4175_s23  ;;  %v5071_v52 = vpop.f32.mrf.mxu0 }
 0x21b   :  { %773 = vrot.lane.b32.xlu0 %v4526_v56, %s4182_s16  ;;  %v5076_v43 = vpop.f32.mrf.mxu1 }
 0x21c   :  { %v764_v20 = vpop.permute.xlu1 %763  ;;  %v5061_v61 = vpop.permute.xlu2 %351 }
 0x21d   :  { %v414_v22 = vpop.permute.xlu0 %413 }
 0x21e   :  { %v526_v2 = vsel %vm270_vm2, %v494_v36, %v414_v22 }
 0x21f   :  { %v1079_v59 = vunpack.c.l.b16 %v526_v2  ;;  %v5116_v2 = vld [vmem:[%s6410_s2] ss:$0 sm:$0xff] }
 0x221   :  { %v1131_v37 = vpack.c.b16 %v1079_v59, %v1078_v35  ;;  %v4167_v35 = vld [vmem:[%s6408_s0 + $0x7c] sm:$0xf] }
 0x222   :  { %837 = vrot.lane.b32.xlu1 %v4531_v57, %s4174_s22  ;;  %867 = vrot.lane.b32.xlu2 %v4536_v55, %s4173_s21  ;;  %v4165_v57 = vld [vmem:[%s6408_s0 + $0x74] sm:$0xf]  ;;  %v5092_v27 = vpop.f32.mrf.mxu0 }
 0x223   :  { %835 = vrot.lane.b32.xlu0 %v4526_v56, %s4174_s22  ;;  %3858 = vmatmul.msk.bf16.gmra.mxu0 %vm1176_vm3, %v1131_v37  ;;  %6424 = vst [vmem:[#allocation6_spill] sm:$0xff] %v5092_v27  ;;  %v5096_v17 = vpop.f32.mrf.mxu1 }
 0x224   :  { %v798_v13 = vpop.permute.xlu1 %797  ;;  %v386_v16 = vpop.permute.xlu2 %385  ;;  %6425 = vst [vmem:[#allocation7_spill] sm:$0xff] %v5096_v17 }
 0x225   :  { %v796_v34 = vpop.permute.xlu0 %795  ;;  %v902_v62 = vsel %vm188_vm0, %v766_v58, %v798_v13  ;;  %v1283_v13 = vadd.f32 %v5116_v2, %v4861_v23  ;;  %v1288_v23 = vadd.f32 %v5116_v2, %v4888_v50 }
 0x226   :  { %v899_v24 = vsel %vm188_vm0, %v764_v20, %v796_v34 }
 0x227   :  { %v940_v55 = vsel %vm237_vm1, %v899_v24, %v828_v41  ;;  %v4166_v41 = vld [vmem:[%s6408_s0 + $0x78] sm:$0xf]  ;;  %vm1442_vm4 = vcmp.ge.f32.partialorder %v1283_v13, 0.0  ;;  %vm1444_vm5 = vcmp.ge.f32.partialorder %v1288_v23, 0.0 }
 0x22a   :  { %779 = vrot.lane.b32.xlu1 %v5003_v46, %s4182_s16  ;;  %781 = vrot.lane.b32.xlu2 %v4165_v57, %s4182_s16  ;;  %v1322_v36 = vpop.f32.mrf.mxu0 }
 0x22b   :  { %869 = vrot.lane.b32.xlu0 %v4548_v19, %s4173_s21  ;;  %v5108_v22 = vpop.f32.mrf.mxu1 }
 0x22c   :  { %v860_v56 = vpop.permute.xlu1 %859  ;;  %v5088_v0 = vpop.permute.xlu2 %767 }
 0x22d   :  { %v830_v42 = vpop.permute.xlu0 %829  ;;  %v972_v44 = vsel %vm270_vm2, %v940_v55, %v860_v56 }
 0x22e   :  { %v942_v32 = vsel %vm237_vm1, %v902_v62, %v830_v42  ;;  %v1110_v39 = vunpack.c.l.b16 %v972_v44  ;;  %v4168_v62 = vld [vmem:[%s6408_s0 + $0x60] sm:$0xf]  ;;  %v4169_v42 = vld [vmem:[%s6408_s0 + $0x5c] sm:$0xf] }
 0x22f   :  { %v974_v10 = vsel %vm270_vm2, %v942_v32, %v862_v12 }
 0x230   :  { %v1111_v19 = vunpack.c.l.b16 %v974_v10 }
 0x232   :  { %v1147_v21 = vpack.c.b16 %v1111_v19, %v1110_v39  ;;  %813 = vrot.lane.b32.xlu1 %v4166_v41, %s4175_s23  ;;  %843 = vrot.lane.b32.xlu2 %v4165_v57, %s4174_s22  ;;  %v5126_v24 = vpop.f32.mrf.mxu0  ;;  %v1506_v57 = vmul.f32 0.2, %v1283_v13  ;;  %v1323_v19 = vadd.f32 %v5116_v2, %v1322_v36  ;;  %v4170_v36 = vld [vmem:[%s6408_s0 + $0x64] sm:$0xf] }
 0x233   :  { %811 = vrot.lane.b32.xlu0 %v4996_v7, %s4175_s23  ;;  %v5129_v55 = vpop.f32.mrf.mxu1 }
 0x234   :  { %3874 = vmatmul.msk.bf16.gmra.mxu1 %vm1176_vm3, %v1147_v21  ;;  %v322_v58 = vpop.permute.xlu1 %321  ;;  %v5106_v20 = vpop.permute.xlu2 %801  ;;  %6426 = vst [vmem:[#allocation8_spill] sm:$0xff] %v5129_v55  ;;  %v1570_v10 = vsel %vm1442_vm4, %v1283_v13, %v1506_v57  ;;  %vm1458_vm6 = vcmp.ge.f32.partialorder %v1323_v19, 0.0 }
 0x235   :  { %v320_v12 = vpop.permute.xlu0 %319 }
 0x236   :  { %v457_v44 = vsel %vm188_vm0, %v320_v12, %v5061_v61  ;;  %v1522_v12 = vmul.f32 0.2, %v1323_v19 }
 0x23a   :  { %875 = vrot.lane.b32.xlu1 %v4166_v41, %s4173_s21  ;;  %877 = vrot.lane.b32.xlu2 %v6413_v6, %s4173_s21 }
 0x23b   :  { %845 = vrot.lane.b32.xlu0 %v4167_v35, %s4174_s22  ;;  %v1402_v13 = vpop.f32.mrf.mxu1 }
 0x23c   :  { %v384_v59 = vpop.permute.xlu1 %383  ;;  %v5122_v37 = vpop.permute.xlu2 %863 }
 0x23d   :  { %v354_v34 = vpop.permute.xlu0 %353  ;;  %v496_v21 = vsel %vm237_vm1, %v457_v44, %v384_v59  ;;  %v4171_v44 = vld [vmem:[%s6408_s0 + $0x68] sm:$0xf]  ;;  %s4183_s0 = smov 64  }
 0x23e   :  { %v460_v56 = vsel %vm188_vm0, %v322_v58, %v354_v34  ;;  %v1508_v34 = vmul.f32 0.2, %v1288_v23 }
 0x240   :  { %v1572_v59 = vsel %vm1444_vm5, %v1288_v23, %v1508_v34 }
 0x242   :  { %329 = vrot.lane.b32.xlu1 %v4588_v53, %s4175_s23  ;;  %359 = vrot.lane.b32.xlu2 %v4168_v62, %s4174_s22  ;;  %v498_v53 = vsel %vm237_vm1, %v460_v56, %v386_v16 }
 0x243   :  { %327 = vrot.lane.b32.xlu0 %v4169_v42, %s4175_s23  ;;  %v1634_v42 = vpack.c.bf16 %v1570_v10, %v1570_v10  ;;  %v5180_v3 = vpop.f32.mrf.mxu1  ;;  %s4185_s23 = smov 96  }
 0x244   :  { %v418_v32 = vpop.permute.xlu1 %417  ;;  %v5146_v39 = vpop.permute.xlu2 %777 }
 0x245   :  { %v416_v50 = vpop.permute.xlu0 %415  ;;  %v530_v41 = vsel %vm270_vm2, %v498_v53, %v418_v32  ;;  %v1943_v32 = vunpack.c.l.b16 %v1634_v42  ;;  %v1368_v53 = vadd.f32 %v5116_v2, %v4920_v45 }
 0x246   :  { %v528_v58 = vsel %vm270_vm2, %v496_v21, %v416_v50  ;;  %v1081_v35 = vunpack.c.l.b16 %v530_v41  ;;  %v1586_v50 = vsel %vm1458_vm6, %v1323_v19, %v1522_v12 }
 0x247   :  { %v1080_v62 = vunpack.c.l.b16 %v528_v58  ;;  %v1363_v58 = vadd.f32 %v5116_v2, %v4890_v4  ;;  %v5171_v34 = vpack.c.b16 %v1943_v32, %v1943_v32  ;;  %vm1476_vm8 = vcmp.ge.f32.partialorder %v1368_v53, 0.0 }
 0x248   :  { %v1327_v61 = vpop.f32.mrf.mxu0  ;;  %v1698_v32 = vlaneseq }
 0x249   :  { %v1132_v16 = vpack.c.b16 %v1081_v35, %v1080_v62  ;;  %v1328_v56 = vadd.f32 %v5116_v2, %v1327_v61  ;;  %v1636_v35 = vpack.c.bf16 %v1572_v59, %v1572_v59  ;;  %v1540_v62 = vmul.f32 0.2, %v1368_v53 }
 0x24a   :  { %391 = vrot.lane.b32.xlu1 %v4170_v36, %s4173_s21  ;;  %393 = vrot.lane.b32.xlu2 %v5003_v46, %s4173_s21  ;;  %v1403_v46 = vadd.f32 %v5116_v2, %v1402_v13  ;;  %v1650_v61 = vpack.c.bf16 %v1586_v50, %v1586_v50  ;;  %v1538_v45 = vmul.f32 0.2, %v1363_v58  ;;  %vm1474_vm10 = vcmp.ge.f32.partialorder %v1363_v58, 0.0  ;;  %s4184_s21 = smov 80  }
 0x24b   :  { %vm1460_vm7 = vcmp.ge.f32.partialorder %v1328_v56, 0.0  ;;  %v1524_v57 = vmul.f32 0.2, %v1328_v56  ;;  %361 = vrot.lane.b32.xlu0 %v4171_v44, %s4174_s22  ;;  %3859 = vmatmul.msk.bf16.gmra.mxu0 %vm1176_vm3, %v1132_v16  ;;  %v1945_v36 = vunpack.c.l.b16 %v1636_v35  ;;  %v1604_v4 = vsel %vm1476_vm8, %v1368_v53, %v1540_v62 }
 0x24c   :  { %v800_v10 = vpop.permute.xlu1 %799  ;;  %v5166_v21 = vpop.permute.xlu2 %839  ;;  %v1554_v16 = vmul.f32 0.2, %v1403_v46  ;;  %vm1490_vm9 = vcmp.ge.f32.partialorder %v1403_v46, 0.0  ;;  %v2190_v19 = vunpack.c.l.b16 %v1650_v61  ;;  %v1602_v50 = vsel %vm1474_vm10, %v1363_v58, %v1538_v45 }
 0x24d   :  { %v1588_v23 = vsel %vm1460_vm7, %v1328_v56, %v1524_v57  ;;  %v770_v41 = vpop.permute.xlu0 %769  ;;  %v1668_v35 = vpack.c.bf16 %v1604_v4, %v1604_v4  ;;  %v1666_v53 = vpack.c.bf16 %v1602_v50, %v1602_v50  ;;  %v5185_v61 = vshrl.u32 %v1698_v32, 7 }
 0x24e   :  { %v1652_v42 = vpack.c.bf16 %v1588_v23, %v1588_v23  ;;  %v1618_v59 = vsel %vm1490_vm9, %v1403_v46, %v1554_v16  ;;  %v1961_v23 = vpack.c.b16 %v1945_v36, %v1945_v36  ;;  %v2206_v6 = vpack.c.b16 %v2190_v19, %v2190_v19 }
 0x24f   :  { %6427 = vst [vmem:[#allocation9_spill] sm:$0xff] %v5185_v61  ;;  %v1978_v46 = vshll.u32 %v5171_v34, 16  ;;  %v908_v45 = vsel %vm188_vm0, %v770_v41, %v5106_v20  ;;  %v2270_v36 = vunpack.c.l.b16 %v1666_v53 }
 0x250   :  { %v2192_v12 = vunpack.c.l.b16 %v1652_v42  ;;  %v1992_v58 = vshll.u32 %v1961_v23, 16  ;;  %v2272_v42 = vunpack.c.l.b16 %v1668_v35  ;;  %v1976_v35 = vshrl.u32 %v5171_v34, 16 }
 0x252   :  { %425 = vrot.lane.b32.xlu1 %v4996_v7, %s4177_s30  ;;  %2142 = vrot.lane.b32.xlu2 %v5171_v34, %s4178_s5  ;;  %v1682_v7 = vpack.c.bf16 %v1618_v59, %v1618_v59  ;;  %v2208_v55 = vpack.c.b16 %v2192_v12, %v2192_v12  ;;  %v1704_v12 = vand.u32 3, %v5185_v61  ;;  %v1994_v20 = vrot.slane %v1992_v58, 1  ;;  %v4092_v34 = vld [vmem:[%s6409_s1 + $0xa8] sm:$0xff] }
 0x253   :  { %423 = vrot.lane.b32.xlu0 %v4171_v44, %s4177_s30  ;;  %v905_v44 = vsel %vm188_vm0, %v5088_v0, %v800_v10  ;;  %v2288_v50 = vpack.c.b16 %v2272_v42, %v2272_v42 }
 0x254   :  { %v834_v56 = vpop.permute.xlu1 %833  ;;  %v5178_v13 = vpop.permute.xlu2 %873  ;;  %v1728_v16 = vunpack.c.l.b16 %v1682_v7  ;;  %v1990_v7 = vshrl.u32 %v1961_v23, 16  ;;  %vm2122_vm4 = vcmp.eq.s32.totalorder %v1704_v12, 3 }
 0x255   :  { %v832_v57 = vpop.permute.xlu0 %831  ;;  %vm5226_vm6 = vmpackc.low %vm2122_vm4, %vm2122_vm4 }
 0x256   :  { %v944_v62 = vsel %vm237_vm1, %v905_v44, %v832_v57  ;;  %v1980_v57 = vrot.slane %v1978_v46, 1  ;;  %v2286_v44 = vpack.c.b16 %v2270_v36, %v2270_v36  ;;  %v1995_v58 = vor.u32 %v1994_v20, %v1990_v7 }
 0x257   :  { %v976_v0 = vsel %vm270_vm2, %v944_v62, %v5122_v37  ;;  %v1293_v37 = vadd.f32 %v5116_v2, %v4914_v5 }
 0x258   :  { %v1112_v41 = vunpack.c.l.b16 %v976_v0  ;;  %v1981_v5 = vor.u32 %v1980_v57, %v1976_v35  ;;  %v2108_v20 = vsel %vm5215_vm15, %v1995_v58, 0  ;;  %v4091_v57 = vld [vmem:[%s6409_s1 + $0xa0] sm:$0xff] }
 0x259   :  { %v1510_v42 = vmul.f32 0.2, %v1293_v37  ;;  %vm1446_vm5 = vcmp.ge.f32.partialorder %v1293_v37, 0.0 }
 0x25a   :  { %2222 = vrot.lane.b32.xlu1 %v2206_v6, %s4179_s12  ;;  %2226 = vrot.lane.b32.xlu2 %v2208_v55, %s4179_s12  ;;  %v1298_v6 = vadd.f32 %v5116_v2, %v4941_v30  ;;  %v946_v55 = vsel %vm237_vm1, %v908_v45, %v834_v56  ;;  %v5204_v30 = vpack.c.b16 %v1728_v16, %v1728_v16 }
 0x25b   :  { %2146 = vrot.lane.b32.xlu0 %v1961_v23, %s4178_s5  ;;  %v1373_v45 = vadd.f32 %v5116_v2, %v4947_v26 }
 0x25c   :  { %v776_v10 = vpop.permute.xlu1 %775  ;;  %v5198_v19 = vpop.permute.xlu2 %355  ;;  %v1512_v53 = vmul.f32 0.2, %v1298_v6  ;;  %vm1448_vm13 = vcmp.ge.f32.partialorder %v1298_v6, 0.0 }
 0x25d   :  { %v866_v4 = vpop.permute.xlu0 %865  ;;  %vm1478_vm7 = vcmp.ge.f32.partialorder %v1373_v45, 0.0 }
 0x25e   :  { %v978_v59 = vsel %vm270_vm2, %v946_v55, %v866_v4  ;;  %v1576_v0 = vsel %vm1448_vm13, %v1298_v6, %v1512_v53  ;;  %v5234_v6 = vpop.f32.mrf.mxu0 }
 0x25f   :  { %v1113_v32 = vunpack.c.l.b16 %v978_v59  ;;  %v2106_v59 = vsel %vm5215_vm15, %v1981_v5, 0 }
 0x260   :  { %v1407_v56 = vpop.f32.mrf.mxu1  ;;  %v2126_v7 = vsel %vm5226_vm6, 0, %v2106_v59 }
 0x261   :  { %v1148_v62 = vpack.c.b16 %v1113_v32, %v1112_v41  ;;  %v1408_v46 = vadd.f32 %v5116_v2, %v1407_v56  ;;  %v1574_v41 = vsel %vm1446_vm5, %v1293_v37, %v1510_v42  ;;  %v1542_v56 = vmul.f32 0.2, %v1373_v45 }
 0x262   :  { %2306 = vrot.lane.b32.xlu1 %v2288_v50, %s4180_s15  ;;  %2334 = vrot.lane.b32.xlu2 %v5204_v30, %s4183_s0  ;;  %v1640_v50 = vpack.c.bf16 %v1576_v0, %v1576_v0  ;;  %v1638_v53 = vpack.c.bf16 %v1574_v41, %v1574_v41 }
 0x263   :  { %vm1492_vm14 = vcmp.ge.f32.partialorder %v1408_v46, 0.0  ;;  %v1556_v16 = vmul.f32 0.2, %v1408_v46  ;;  %2302 = vrot.lane.b32.xlu0 %v2286_v44, %s4180_s15  ;;  %3875 = vmatmul.msk.bf16.gmra.mxu1 %vm1176_vm3, %v1148_v62  ;;  %v2128_v44 = vsel %vm5226_vm6, 0, %v2108_v20  ;;  %v1606_v5 = vsel %vm1478_vm7, %v1373_v45, %v1542_v56 }
 0x264   :  { %v810_v23 = vpop.permute.xlu1 %809  ;;  %v5232_v32 = vpop.permute.xlu2 %389  ;;  %v1949_v37 = vunpack.c.l.b16 %v1640_v50  ;;  %v1947_v0 = vunpack.c.l.b16 %v1638_v53  ;;  %v1670_v59 = vpack.c.bf16 %v1606_v5, %v1606_v5 }
 0x265   :  { %v1620_v36 = vsel %vm1492_vm14, %v1408_v46, %v1556_v16  ;;  %v808_v55 = vpop.permute.xlu0 %807  ;;  %v920_v58 = vsel %vm188_vm0, %v5146_v39, %v810_v23 }
 0x266   :  { %v1684_v4 = vpack.c.bf16 %v1620_v36, %v1620_v36  ;;  %v917_v35 = vsel %vm188_vm0, %v776_v10, %v808_v55  ;;  %v5255_v20 = vpack.c.b16 %v1949_v37, %v1949_v37  ;;  %v1963_v23 = vpack.c.b16 %v1947_v0, %v1947_v0 }
 0x267   :  { %v952_v46 = vsel %vm237_vm1, %v917_v35, %v5166_v21  ;;  %v1378_v21 = vadd.f32 %v5116_v2, %v4977_v15  ;;  %v2274_v56 = vunpack.c.l.b16 %v1670_v59 }
 0x268   :  { %v1730_v26 = vunpack.c.l.b16 %v1684_v4 }
 0x269   :  { %v1544_v35 = vmul.f32 0.2, %v1378_v21  ;;  %vm1480_vm9 = vcmp.ge.f32.partialorder %v1378_v21, 0.0  ;;  %v2290_v37 = vpack.c.b16 %v2274_v56, %v2274_v56 }
 0x26a   :  { %v5241_v62 = vpack.c.b16 %v1730_v26, %v1730_v26  ;;  %2382 = vrot.lane.b32.xlu1 %v2126_v7, %s4184_s21  ;;  %2386 = vrot.lane.b32.xlu2 %v2128_v44, %s4184_s21 }
 0x26c   :  { %2338 = vrot.lane.b32.xlu0 %v5241_v62, %s4183_s0  ;;  %v872_v10 = vpop.permute.xlu1 %871  ;;  %v5259_v41 = vpop.permute.xlu2 %771 }
 0x26d   :  { %v842_v42 = vpop.permute.xlu0 %841  ;;  %v984_v16 = vsel %vm270_vm2, %v952_v46, %v872_v10  ;;  %v1608_v10 = vsel %vm1480_vm9, %v1378_v21, %v1544_v35  ;;  %v2004_v21 = vshrl.u32 %v1963_v23, 16 }
 0x26e   :  { %v954_v36 = vsel %vm237_vm1, %v920_v58, %v842_v42  ;;  %v1116_v55 = vunpack.c.l.b16 %v984_v16  ;;  %v1672_v5 = vpack.c.bf16 %v1608_v10, %v1608_v10 }
 0x26f   :  { %v986_v4 = vsel %vm270_vm2, %v954_v36, %v5178_v13  ;;  %v2006_v36 = vshll.u32 %v1963_v23, 16 }
 0x270   :  { %v1117_v45 = vunpack.c.l.b16 %v986_v4  ;;  %v1308_v4 = vadd.f32 %v5116_v2, %v5007_v54 }
 0x271   :  { %v1332_v39 = vpop.f32.mrf.mxu0 }
 0x272   :  { %v1333_v50 = vadd.f32 %v5116_v2, %v1332_v39  ;;  %2154 = vrot.lane.b32.xlu1 %v5255_v20, %s4178_s5  ;;  %v1150_v26 = vpack.c.b16 %v1117_v45, %v1116_v55  ;;  %v2276_v55 = vunpack.c.l.b16 %v1672_v5  ;;  %v2008_v45 = vrot.slane %v2006_v36, 1 }
 0x273   :  { %vm1452_vm10 = vcmp.ge.f32.partialorder %v1308_v4, 0.0 }
 0x274   :  { %vm1462_vm8 = vcmp.ge.f32.partialorder %v1333_v50, 0.0  ;;  %v1526_v13 = vmul.f32 0.2, %v1333_v50  ;;  %2150 = vrot.lane.b32.xlu0 %v1963_v23, %s4178_s5  ;;  %3877 = vmatmul.msk.bf16.vlgmr.msra.gmra.mxu3 %vm1176_vm3, %v1150_v26  ;;  %v326_v15 = vpop.permute.xlu1 %325  ;;  %v806_v42 = vpop.permute.xlu2 %805  ;;  %v2292_v39 = vpack.c.b16 %v2276_v55, %v2276_v55 }
 0x275   :  { %v324_v7 = vpop.permute.xlu0 %323 }
 0x276   :  { %v1590_v44 = vsel %vm1462_vm8, %v1333_v50, %v1526_v13  ;;  %v1516_v50 = vmul.f32 0.2, %v1308_v4  ;;  %v463_v26 = vsel %vm188_vm0, %v324_v7, %v5198_v19  ;;  %v1383_v19 = vadd.f32 %v5116_v2, %v5009_v25 }
 0x277   :  { %v1654_v53 = vpack.c.bf16 %v1590_v44, %v1590_v44 }
 0x278   :  { %v1580_v7 = vsel %vm1452_vm10, %v1308_v4, %v1516_v50  ;;  %vm1482_vm11 = vcmp.ge.f32.partialorder %v1383_v19, 0.0  ;;  %vm1888_vm10 = vcmask 1040384  }
 0x279   :  { %v2194_v46 = vunpack.c.l.b16 %v1654_v53  ;;  %v1644_v5 = vpack.c.bf16 %v1580_v7, %v1580_v7 }
 0x27a   :  { %2310 = vrot.lane.b32.xlu1 %v2290_v37, %s4180_s15 }
 0x27b   :  { %v2210_v58 = vpack.c.b16 %v2194_v46, %v2194_v46  ;;  %v1953_v55 = vunpack.c.l.b16 %v1644_v5 }
 0x27c   :  { %v388_v16 = vpop.permute.xlu1 %387  ;;  %v868_v44 = vpop.permute.xlu2 %867 }
 0x27d   :  { %v358_v0 = vpop.permute.xlu0 %357  ;;  %2230 = vrot.lane.b32.xlu2 %v2210_v58, %s4179_s12  ;;  %v500_v13 = vsel %vm237_vm1, %v463_v26, %v388_v16  ;;  %v1546_v58 = vmul.f32 0.2, %v1383_v19 }
 0x27e   :  { %v466_v59 = vsel %vm188_vm0, %v326_v15, %v358_v0  ;;  %v2009_v15 = vor.u32 %v2008_v45, %v2004_v21  ;;  %v5287_v45 = vpack.c.b16 %v1953_v55, %v1953_v55 }
 0x27f   :  { %v502_v35 = vsel %vm237_vm1, %v466_v59, %v5232_v32  ;;  %v1610_v25 = vsel %vm1482_vm11, %v1383_v19, %v1546_v58  ;;  %vm1889_vm11 = vsmask.f32 256 }
 0x280   :  { %v2110_v32 = vsel %vm5215_vm15, %v2009_v15, 0  ;;  %v1674_v4 = vpack.c.bf16 %v1610_v25, %v1610_v25 }
 0x281   :  { %v2130_v0 = vsel %vm5226_vm6, 0, %v2110_v32 }
 0x282   :  { %v2278_v26 = vunpack.c.l.b16 %v1674_v4 }
 0x284   :  { %v422_v56 = vpop.permute.xlu1 %421  ;;  %v782_v59 = vpop.permute.xlu2 %781  ;;  %v2294_v15 = vpack.c.b16 %v2278_v26, %v2278_v26 }
 0x285   :  { %v420_v53 = vpop.permute.xlu0 %419  ;;  %v534_v54 = vsel %vm270_vm2, %v502_v35, %v422_v56  ;;  %2314 = vrot.lane.b32.xlu2 %v2292_v39, %s4180_s15  ;;  %v5289_v39 = vpop.f32.mrf.mxu1 }
 0x286   :  { %v532_v23 = vsel %vm270_vm2, %v500_v13, %v420_v53  ;;  %v1083_v37 = vunpack.c.l.b16 %v534_v54  ;;  %v5293_v56 = vpop.f32.mrf.mxu0 }
 0x287   :  { %v1082_v10 = vunpack.c.l.b16 %v532_v23 }
 0x289   :  { %v1133_v46 = vpack.c.b16 %v1083_v37, %v1082_v10 }
 0x28b   :  { %3860 = vmatmul.msk.bf16.gmra.mxu0 %vm1176_vm3, %v1133_v46 }
 0x28c   :  { %v804_v16 = vpop.permute.xlu1 %803  ;;  %v844_v13 = vpop.permute.xlu2 %843 }
 0x28d   :  { %v774_v36 = vpop.permute.xlu0 %773  ;;  %2390 = vrot.lane.b32.xlu2 %v2130_v0, %s4184_s21  ;;  %v911_v35 = vsel %vm188_vm0, %v5259_v41, %v804_v16  ;;  %v1412_v23 = vpop.f32.mrf.mxu1 }
 0x28e   :  { %v914_v54 = vsel %vm188_vm0, %v774_v36, %v806_v42  ;;  %v1413_v32 = vadd.f32 %v5116_v2, %v1412_v23 }
 0x290   :  { %v1558_v0 = vmul.f32 0.2, %v1413_v32  ;;  %vm1494_vm13 = vcmp.ge.f32.partialorder %v1413_v32, 0.0 }
 0x294   :  { %v838_v21 = vpop.permute.xlu1 %837  ;;  %v878_v36 = vpop.permute.xlu2 %877 }
 0x295   :  { %v836_v50 = vpop.permute.xlu0 %835  ;;  %2162 = vrot.lane.b32.xlu2 %v5287_v45, %s4178_s5  ;;  %v950_v19 = vsel %vm237_vm1, %v914_v54, %v838_v21 }
 0x296   :  { %v948_v53 = vsel %vm237_vm1, %v911_v35, %v836_v50  ;;  %v1622_v50 = vsel %vm1494_vm13, %v1413_v32, %v1558_v0  ;;  %v5306_v35 = vpop.f32.mrf.mxu1  ;;  %vm5375_vm13 = vmand %vm1888_vm10, %vm1889_vm11 }
 0x297   :  { %v980_v37 = vsel %vm270_vm2, %v948_v53, %v868_v44  ;;  %v1686_v54 = vpack.c.bf16 %v1622_v50, %v1622_v50 }
 0x298   :  { %v1114_v41 = vunpack.c.l.b16 %v980_v37 }
 0x29c   :  { %v780_v10 = vpop.permute.xlu1 %779 }
 0x29d   :  { %v870_v7 = vpop.permute.xlu0 %869  ;;  %2318 = vrot.lane.b32.xlu2 %v2294_v15, %s4180_s15 }
 0x29e   :  { %v982_v46 = vsel %vm270_vm2, %v950_v19, %v870_v7  ;;  %v2020_v19 = vshll.u32 %v5255_v20, 16  ;;  %v360_v7 = vpop.permute.xlu2 %359 }
 0x29f   :  { %v1115_v5 = vunpack.c.l.b16 %v982_v46 }
 0x2a0   :  { %v1337_v58 = vpop.f32.mrf.mxu0 }
 0x2a1   :  { %v1149_v16 = vpack.c.b16 %v1115_v5, %v1114_v41  ;;  %v1338_v42 = vadd.f32 %v5116_v2, %v1337_v58  ;;  %v1732_v5 = vunpack.c.l.b16 %v1686_v54 }
 0x2a3   :  { %vm1464_vm12 = vcmp.ge.f32.partialorder %v1338_v42, 0.0  ;;  %v1528_v44 = vmul.f32 0.2, %v1338_v42  ;;  %3876 = vmatmul.msk.bf16.gmra.mxu1 %vm1176_vm3, %v1149_v16 }
 0x2a4   :  { %v814_v55 = vpop.permute.xlu1 %813 }
 0x2a5   :  { %v1592_v25 = vsel %vm1464_vm12, %v1338_v42, %v1528_v44  ;;  %v812_v4 = vpop.permute.xlu0 %811  ;;  %v926_v46 = vsel %vm188_vm0, %v782_v59, %v814_v55  ;;  %v1303_v42 = vadd.f32 %v5116_v2, %v4972_v1  ;;  %v2022_v44 = vrot.slane %v2020_v19, 1 }
 0x2a6   :  { %v1656_v21 = vpack.c.bf16 %v1592_v25, %v1592_v25  ;;  %v923_v53 = vsel %vm188_vm0, %v780_v10, %v812_v4  ;;  %v5318_v25 = vpack.c.b16 %v1732_v5, %v1732_v5  ;;  %v2018_v55 = vshrl.u32 %v5255_v20, 16  ;;  %v394_v54 = vpop.permute.xlu2 %393 }
 0x2a7   :  { %v956_v37 = vsel %vm237_vm1, %v923_v53, %v844_v13  ;;  %vm1450_vm4 = vcmp.ge.f32.partialorder %v1303_v42, 0.0  ;;  %vm1907_vm12 = vcmp.eq.s32.totalorder %v1704_v12, 0 }
 0x2a8   :  { %v2196_v26 = vunpack.c.l.b16 %v1656_v21  ;;  %v1514_v21 = vmul.f32 0.2, %v1303_v42  ;;  %v2023_v1 = vor.u32 %v2022_v44, %v2018_v55 }
 0x2aa   :  { %v2212_v15 = vpack.c.b16 %v2196_v26, %v2196_v26 }
 0x2ac   :  { %2234 = vrot.lane.b32.xlu0 %v2212_v15, %s4179_s12  ;;  %v876_v23 = vpop.permute.xlu1 %875 }
 0x2ad   :  { %v846_v41 = vpop.permute.xlu0 %845  ;;  %v988_v32 = vsel %vm270_vm2, %v956_v37, %v876_v23  ;;  %v1578_v23 = vsel %vm1450_vm4, %v1303_v42, %v1514_v21  ;;  %v2112_v37 = vsel %vm5215_vm15, %v2023_v1, 0 }
 0x2ae   :  { %v958_v58 = vsel %vm237_vm1, %v926_v46, %v846_v41  ;;  %v1118_v16 = vunpack.c.l.b16 %v988_v32  ;;  %v1642_v19 = vpack.c.bf16 %v1578_v23, %v1578_v23  ;;  %v2132_v41 = vsel %vm5226_vm6, 0, %v2112_v37 }
 0x2af   :  { %v990_v10 = vsel %vm270_vm2, %v958_v58, %v878_v36 }
 0x2b0   :  { %v1119_v0 = vunpack.c.l.b16 %v990_v10  ;;  %v1951_v58 = vunpack.c.l.b16 %v1642_v19  ;;  %v5336_v10 = vpop.permute.xlu2 %2142 }
 0x2b1   :  { %v1417_v13 = vpop.f32.mrf.mxu1 }
 0x2b2   :  { %v1418_v4 = vadd.f32 %v5116_v2, %v1417_v13  ;;  %v1151_v59 = vpack.c.b16 %v1119_v0, %v1118_v16  ;;  %v5334_v16 = vpop.f32.mrf.mxu0  ;;  %v1967_v44 = vpack.c.b16 %v1951_v58, %v1951_v58 }
 0x2b4   :  { %vm1496_vm14 = vcmp.ge.f32.partialorder %v1418_v4, 0.0  ;;  %v1560_v50 = vmul.f32 0.2, %v1418_v4  ;;  %2342 = vrot.lane.b32.xlu0 %v5318_v25, %s4183_s0  ;;  %3878 = vmatmul.msk.bf16.gmra.mxu3 %vm1176_vm3, %v1151_v59  ;;  %v330_v36 = vpop.permute.xlu1 %329 }
 0x2b5   :  { %v328_v26 = vpop.permute.xlu0 %327 }
 0x2b6   :  { %v1624_v53 = vsel %vm1496_vm14, %v1418_v4, %v1560_v50  ;;  %v469_v0 = vsel %vm188_vm0, %v328_v26, %v360_v7  ;;  %vm5385_vm14 = vmpackc.low %vm1907_vm12, %vm1907_vm12 }
 0x2b7   :  { %v1688_v15 = vpack.c.bf16 %v1624_v53, %v1624_v53  ;;  %v1388_v53 = vadd.f32 %v5116_v2, %v5042_v8 }
 0x2b9   :  { %v1734_v20 = vunpack.c.l.b16 %v1688_v15  ;;  %v1548_v23 = vmul.f32 0.2, %v1388_v53  ;;  %vm1484_vm7 = vcmp.ge.f32.partialorder %v1388_v53, 0.0 }
 0x2bb   :  { %v5327_v46 = vpack.c.b16 %v1734_v20, %v1734_v20  ;;  %v1285_v20 = vadd.f32 %v5116_v2, %v4876_v33  ;;  %v1325_v33 = vadd.f32 %v5116_v2, %v5126_v24 }
 0x2bc   :  { %2394 = vrot.lane.b32.xlu0 %v2132_v41, %s4184_s21  ;;  %v392_v32 = vpop.permute.xlu1 %391 }
 0x2bd   :  { %v362_v5 = vpop.permute.xlu0 %361  ;;  %2346 = vrot.lane.b32.xlu1 %v5327_v46, %s4183_s0  ;;  %v504_v59 = vsel %vm237_vm1, %v469_v0, %v392_v32  ;;  %v1612_v32 = vsel %vm1484_vm7, %v1388_v53, %v1548_v23  ;;  %v1507_v58 = vmul.f32 0.2, %v1285_v20  ;;  %vm1443_vm8 = vcmp.ge.f32.partialorder %v1285_v20, 0.0 }
 0x2be   :  { %v472_v42 = vsel %vm188_vm0, %v330_v36, %v362_v5  ;;  %vm1459_vm9 = vcmp.ge.f32.partialorder %v1325_v33, 0.0 }
 0x2bf   :  { %v506_v4 = vsel %vm237_vm1, %v472_v42, %v394_v54  ;;  %v5348_v54 = vpop.permute.xlu2 %2226  ;;  %v1676_v42 = vpack.c.bf16 %v1612_v32, %v1612_v32 }
 0x2c4   :  { %v426_v13 = vpop.permute.xlu1 %425 }
 0x2c5   :  { %v424_v55 = vpop.permute.xlu0 %423  ;;  %v538_v21 = vsel %vm270_vm2, %v506_v4, %v426_v13  ;;  %2158 = vrot.lane.b32.xlu1 %v1967_v44, %s4178_s5  ;;  %v2034_v13 = vshll.u32 %v1967_v44, 16  ;;  %v1571_v4 = vsel %vm1443_vm8, %v1285_v20, %v1507_v58  ;;  %v1792_v20 = vshll.u32 %v5318_v25, 16 }
 0x2c6   :  { %v536_v50 = vsel %vm270_vm2, %v504_v59, %v424_v55  ;;  %v1085_v1 = vunpack.c.l.b16 %v538_v21  ;;  %v2280_v21 = vunpack.c.l.b16 %v1676_v42 }
 0x2c7   :  { %v1084_v36 = vunpack.c.l.b16 %v536_v50  ;;  %v5356_v59 = vpop.permute.xlu2 %2334  ;;  %v1789_v50 = vshrl.u32 %v5318_v25, 16  ;;  %v2036_v53 = vrot.slane %v2034_v13, 1 }
 0x2c8   :  { %v1342_v15 = vpop.f32.mrf.mxu0 }
 0x2c9   :  { %v1134_v7 = vpack.c.b16 %v1085_v1, %v1084_v36  ;;  %v1343_v26 = vadd.f32 %v5116_v2, %v1342_v15  ;;  %v1635_v1 = vpack.c.bf16 %v1571_v4, %v1571_v4  ;;  %v2296_v36 = vpack.c.b16 %v2280_v21, %v2280_v21  ;;  %v4116_v4 = vld [vmem:[%s6409_s1 + $0x168] sm:$0xff] }
 0x2ca   :  { %v2032_v15 = vshrl.u32 %v1967_v44, 16 }
 0x2cb   :  { %vm1466_vm5 = vcmp.ge.f32.partialorder %v1343_v26, 0.0  ;;  %v1530_v37 = vmul.f32 0.2, %v1343_v26  ;;  %3861 = vmatmul.msk.bf16.gmra.mxu0 %vm1176_vm3, %v1134_v7  ;;  %v1523_v7 = vmul.f32 0.2, %v1325_v33  ;;  %v1944_v23 = vunpack.c.l.b16 %v1635_v1 }
 0x2cd   :  { %v1594_v19 = vsel %vm1466_vm5, %v1343_v26, %v1530_v37  ;;  %v5353_v41 = vpop.permute.xlu0 %2146  ;;  %v1791_v26 = vrot.slane %v1789_v50, 7  ;;  %v2037_v37 = vor.u32 %v2036_v53, %v2032_v15  ;;  %v1313_v50 = vadd.f32 %v5116_v2, %v5034_v18 }
 0x2ce   :  { %v1658_v8 = vpack.c.bf16 %v1594_v19, %v1594_v19  ;;  %v1358_v18 = vadd.f32 %v5116_v2, %v4863_v48 }
 0x2cf   :  { %v5367_v24 = vpop.permute.xlu2 %2386  ;;  %v1794_v32 = vor.u32 %v1792_v20, %v1791_v26  ;;  %v2114_v44 = vsel %vm5215_vm15, %v2037_v37, 0  ;;  %vm1454_vm4 = vcmp.ge.f32.partialorder %v1313_v50, 0.0  ;;  %v1318_v20 = vadd.f32 %v5116_v2, %v5071_v52 }
 0x2d0   :  { %v2198_v5 = vunpack.c.l.b16 %v1658_v8  ;;  %v1587_v8 = vsel %vm1459_vm9, %v1325_v33, %v1523_v7  ;;  %v2134_v25 = vsel %vm5226_vm6, 0, %v2114_v44  ;;  %vm1472_vm7 = vcmp.ge.f32.partialorder %v1358_v18, 0.0 }
 0x2d1   :  { %v1651_v58 = vpack.c.bf16 %v1587_v8, %v1587_v8  ;;  %v1520_v44 = vmul.f32 0.2, %v1318_v20  ;;  %vm1456_vm5 = vcmp.ge.f32.partialorder %v1318_v20, 0.0 }
 0x2d2   :  { %v2214_v0 = vpack.c.b16 %v2198_v5, %v2198_v5  ;;  %v5369_v5 = vpack.c.b16 %v1944_v23, %v1944_v23  ;;  %v1518_v23 = vmul.f32 0.2, %v1313_v50 }
 0x2d3   :  { %v2191_v21 = vunpack.c.l.b16 %v1651_v58 }
 0x2d4   :  { %2238 = vrot.lane.b32.xlu0 %v2214_v0, %s4179_s12  ;;  %v1895_v0 = vsel %vm5375_vm13, 0, %v1794_v32  ;;  %v1985_v13 = vshll.u32 %v5369_v5, 16  ;;  %v1983_v26 = vshrl.u32 %v5369_v5, 16  ;;  %v1582_v8 = vsel %vm1454_vm4, %v1313_v50, %v1518_v23 }
 0x2d5   :  { %v5358_v55 = vpop.permute.xlu0 %2302  ;;  %v1915_v33 = vsel %vm5385_vm14, 0, %v1895_v0  ;;  %v2207_v7 = vpack.c.b16 %v2191_v21, %v2191_v21  ;;  %v1646_v58 = vpack.c.bf16 %v1582_v8, %v1582_v8 }
 0x2d6   :  { %v1987_v15 = vrot.slane %v1985_v13, 1  ;;  %v1584_v13 = vsel %vm1456_vm5, %v1318_v20, %v1520_v44  ;;  %v1290_v44 = vadd.f32 %v5116_v2, %v4898_v51 }
 0x2d7   :  { %v2231_v1 = vpop.permute.xlu2 %2230  ;;  %v1955_v21 = vunpack.c.l.b16 %v1646_v58 }
 0x2d8   :  { %v1988_v37 = vor.u32 %v1987_v15, %v1983_v26  ;;  %v5413_v26 = vpop.f32.mrf.mxu1  ;;  %vm1445_vm9 = vcmp.ge.f32.partialorder %v1290_v44, 0.0 }
 0x2da   :  { %v2107_v32 = vsel %vm5215_vm15, %v1988_v37, 0 }
 0x2db   :  { %v2127_v0 = vsel %vm5226_vm6, 0, %v2107_v32 }
 0x2dc   :  { %2322 = vrot.lane.b32.xlu0 %v2296_v36, %s4180_s15 }
 0x2de   :  { %v5365_v19 = vpop.permute.xlu0 %2338 }
 0x2e0   :  { %v1422_v58 = vpop.f32.mrf.mxu1 }
 0x2e4   :  { %2398 = vrot.lane.b32.xlu0 %v2134_v25, %s4184_s21  ;;  %v1536_v25 = vmul.f32 0.2, %v1358_v18 }
 0x2e6   :  { %v2151_v12 = vpop.permute.xlu0 %2150  ;;  %v1600_v52 = vsel %vm1472_vm7, %v1358_v18, %v1536_v25  ;;  %v5419_v18 = vpop.f32.mrf.mxu0 }
 0x2e7   :  { %v2428_v53 = vsel %vm188_vm0, %v1915_v33, %v2151_v12  ;;  %v1648_v33 = vpack.c.bf16 %v1584_v13, %v1584_v13  ;;  %v1664_v50 = vpack.c.bf16 %v1600_v52, %v1600_v52  ;;  %v1330_v13 = vadd.f32 %v5116_v2, %v5234_v6 }
 0x2e8   :  { %v5395_v36 = vsel %vm237_vm1, %v2428_v53, %v2231_v1  ;;  %v5409_v1 = vpack.c.b16 %v1955_v21, %v1955_v21  ;;  %v5411_v53 = vpop.permute.xlu1 %2222  ;;  %v1509_v52 = vmul.f32 0.2, %v1290_v44 }
 0x2e9   :  { %v2204_v23 = vunpack.c.l.b16 %v1664_v50  ;;  %v1525_v51 = vmul.f32 0.2, %v1330_v13  ;;  %vm1461_vm11 = vcmp.ge.f32.partialorder %v1330_v13, 0.0 }
 0x2eb   :  { %v2220_v8 = vpack.c.b16 %v2204_v23, %v2204_v23  ;;  %v1573_v23 = vsel %vm1445_vm9, %v1290_v44, %v1509_v52 }
 0x2ec   :  { %2224 = vrot.lane.b32.xlu0 %v2207_v7, %s4179_s12  ;;  %v1957_v7 = vunpack.c.l.b16 %v1648_v33 }
 0x2ee   :  { %v5417_v20 = vpack.c.b16 %v1957_v7, %v1957_v7 }
 0x2f0   :  { %v2076_v25 = vshll.u32 %v5417_v20, 16  ;;  %v2074_v7 = vshrl.u32 %v5417_v20, 16 }
 0x2f4   :  { %2384 = vrot.lane.b32.xlu0 %v2127_v0, %s4184_s21  ;;  %v5425_v0 = vpop.permute.xlu1 %2306 }
 0x2f7   :  { %v1432_v12 = vpop.f32.mrf.mxu3 }
 0x2f8   :  { %v1433_v48 = vadd.f32 %v5116_v2, %v1432_v12  ;;  %v1423_v12 = vadd.f32 %v5116_v2, %v1422_v58  ;;  %v1637_v58 = vpack.c.bf16 %v1573_v23, %v1573_v23  ;;  %v5451_v23 = vpop.f32.mrf.mxu1 }
 0x2fa   :  { %v1566_v15 = vmul.f32 0.2, %v1433_v48  ;;  %vm1502_vm8 = vcmp.ge.f32.partialorder %v1433_v48, 0.0  ;;  %vm1498_vm12 = vcmp.ge.f32.partialorder %v1423_v12, 0.0  ;;  %v1946_v27 = vunpack.c.l.b16 %v1637_v58 }
 0x2fc   :  { %2166 = vrot.lane.b32.xlu0 %v5409_v1, %s4178_s5  ;;  %v1630_v37 = vsel %vm1502_vm8, %v1433_v48, %v1566_v15  ;;  %v2078_v48 = vrot.slane %v2076_v25, 1  ;;  %v5438_v61 = vpop.permute.xlu1 %2382 }
 0x2fd   :  { %v1694_v32 = vpack.c.bf16 %v1630_v37, %v1630_v37  ;;  %v1562_v37 = vmul.f32 0.2, %v1423_v12 }
 0x2fe   :  { %v2079_v6 = vor.u32 %v2078_v48, %v2074_v7 }
 0x2ff   :  { %v1740_v21 = vunpack.c.l.b16 %v1694_v32  ;;  %v1626_v28 = vsel %vm1498_vm12, %v1423_v12, %v1562_v37 }
 0x300   :  { %v2120_v52 = vsel %vm5215_vm15, %v2079_v6, 0  ;;  %v1690_v17 = vpack.c.bf16 %v1626_v28, %v1626_v28  ;;  %v2046_v6 = vshrl.u32 %v5287_v45, 16 }
 0x301   :  { %v5431_v15 = vpack.c.b16 %v1740_v21, %v1740_v21  ;;  %v1589_v21 = vsel %vm1461_vm11, %v1330_v13, %v1525_v51  ;;  %v2140_v48 = vsel %vm5226_vm6, 0, %v2120_v52  ;;  %v5449_v13 = vpack.c.b16 %v1946_v27, %v1946_v27 }
 0x302   :  { %v1653_v60 = vpack.c.bf16 %v1589_v21, %v1589_v21  ;;  %v1736_v51 = vunpack.c.l.b16 %v1690_v17  ;;  %vm2558_vm11 = vcmask 654336  }
 0x303   :  { %6436 = vst [vmem:[#allocation10_spill] sm:$0xff] %v5431_v15 }
 0x304   :  { %2250 = vrot.lane.b32.xlu0 %v2220_v8, %s4179_s12  ;;  %v2193_v12 = vunpack.c.l.b16 %v1653_v60  ;;  %v1761_v60 = vshrl.u32 %v5204_v30, 16 }
 0x306   :  { %v2209_v58 = vpack.c.b16 %v2193_v12, %v2193_v12  ;;  %v1763_v12 = vrot.slane %v1761_v60, 7 }
 0x308   :  { %v1347_v33 = vpop.f32.mrf.mxu0 }
 0x309   :  { %v1348_v50 = vadd.f32 %v5116_v2, %v1347_v33  ;;  %v1375_v33 = vadd.f32 %v5116_v2, %v4960_v38  ;;  %v1365_v38 = vadd.f32 %v5116_v2, %v4905_v31  ;;  %v1803_v31 = vshrl.u32 %v5327_v46, 16 }
 0x30b   :  { %vm1468_vm10 = vcmp.ge.f32.partialorder %v1348_v50, 0.0  ;;  %v1532_v8 = vmul.f32 0.2, %v1348_v50  ;;  %vm1479_vm4 = vcmp.ge.f32.partialorder %v1375_v33, 0.0  ;;  %v1539_v37 = vmul.f32 0.2, %v1365_v38 }
 0x30c   :  { %2358 = vrot.lane.b32.xlu0 %v5431_v15, %s4183_s0  ;;  %v1543_v15 = vmul.f32 0.2, %v1375_v33  ;;  %vm1475_vm5 = vcmp.ge.f32.partialorder %v1365_v38, 0.0  ;;  %v1805_v21 = vrot.slane %v1803_v31, 7 }
 0x30d   :  { %v1596_v32 = vsel %vm1468_vm10, %v1348_v50, %v1532_v8  ;;  %v2048_v50 = vshll.u32 %v5287_v45, 16  ;;  %v2155_v8 = vpop.permute.xlu1 %2154  ;;  %v1603_v17 = vsel %vm1475_vm5, %v1365_v38, %v1539_v37  ;;  %v1300_v38 = vadd.f32 %v5116_v2, %v4958_v40 }
 0x30e   :  { %v1660_v25 = vpack.c.bf16 %v1596_v32, %v1596_v32  ;;  %v1607_v28 = vsel %vm1479_vm4, %v1375_v33, %v1543_v15 }
 0x30f   :  { %v2050_v7 = vrot.slane %v2048_v50, 1  ;;  %v1671_v32 = vpack.c.bf16 %v1607_v28, %v1607_v28  ;;  %v1667_v50 = vpack.c.bf16 %v1603_v17, %v1603_v17  ;;  %v1513_v17 = vmul.f32 0.2, %v1300_v38 }
 0x310   :  { %v2200_v44 = vunpack.c.l.b16 %v1660_v25  ;;  %v5454_v25 = vpack.c.b16 %v1736_v51, %v1736_v51  ;;  %v1806_v51 = vshll.u32 %v5327_v46, 16  ;;  %vm1449_vm8 = vcmp.ge.f32.partialorder %v1300_v38, 0.0 }
 0x311   :  { %v2051_v27 = vor.u32 %v2050_v7, %v2046_v6  ;;  %v2275_v15 = vunpack.c.l.b16 %v1671_v32  ;;  %v1764_v32 = vshll.u32 %v5204_v30, 16  ;;  %v2271_v46 = vunpack.c.l.b16 %v1667_v50 }
 0x312   :  { %v2216_v14 = vpack.c.b16 %v2200_v44, %v2200_v44 }
 0x313   :  { %v2116_v44 = vsel %vm5215_vm15, %v2051_v27, 0  ;;  %v2291_v7 = vpack.c.b16 %v2275_v15, %v2275_v15  ;;  %v1766_v27 = vor.u32 %v1764_v32, %v1763_v12 }
 0x314   :  { %2410 = vrot.lane.b32.xlu0 %v2140_v48, %s4184_s21  ;;  %2242 = vrot.lane.b32.xlu1 %v2216_v14, %s4179_s12  ;;  %v1999_v14 = vshll.u32 %v5449_v13, 16  ;;  %v1997_v48 = vshrl.u32 %v5449_v13, 16  ;;  %v2136_v37 = vsel %vm5226_vm6, 0, %v2116_v44 }
 0x315   :  { %v1891_v50 = vsel %vm5375_vm13, 0, %v1766_v27  ;;  %v2315_v27 = vpop.permute.xlu2 %2314 }
 0x316   :  { %v2001_v33 = vrot.slane %v1999_v14, 1  ;;  %v2311_v14 = vpop.permute.xlu1 %2310  ;;  %v1911_v32 = vsel %vm5385_vm14, 0, %v1891_v50 }
 0x317   :  { %v2503_v40 = vsel %vm270_vm2, %v5395_v36, %v2311_v14 }
 0x318   :  { %v2002_v6 = vor.u32 %v2001_v33, %v1997_v48  ;;  %v5481_v33 = vld [vmem:[%s6410_s2] ss:$0 sm:$0xff] }
 0x319   :  { %v1340_v44 = vadd.f32 %v5481_v33, %v5334_v16  ;;  %v2287_v16 = vpack.c.b16 %v2271_v46, %v2271_v46 }
 0x31a   :  { %v2109_v30 = vsel %vm5215_vm15, %v2002_v6, 0 }
 0x31b   :  { %vm1465_vm9 = vcmp.ge.f32.partialorder %v1340_v44, 0.0 }
 0x31c   :  { %2228 = vrot.lane.b32.xlu0 %v2209_v58, %s4179_s12  ;;  %2350 = vrot.lane.b32.xlu1 %v5454_v25, %s4183_s0  ;;  %v1808_v58 = vor.u32 %v1806_v51, %v1805_v21  ;;  %v1405_v21 = vadd.f32 %v5481_v33, %v5180_v3  ;;  %v2129_v3 = vsel %vm5226_vm6, 0, %v2109_v30 }
 0x31e   :  { %v2235_v45 = vpop.permute.xlu0 %2234  ;;  %vm1491_vm10 = vcmp.ge.f32.partialorder %v1405_v21, 0.0 }
 0x320   :  { %v1427_v52 = vpop.f32.mrf.mxu1 }
 0x321   :  { %v1428_v28 = vadd.f32 %v5116_v2, %v1427_v52  ;;  %v1897_v52 = vsel %vm5375_vm13, 0, %v1808_v58  ;;  %v1775_v58 = vshrl.u32 %v5241_v62, 16 }
 0x322   :  { %v1917_v12 = vsel %vm5385_vm14, 0, %v1897_v52 }
 0x323   :  { %vm1500_vm7 = vcmp.ge.f32.partialorder %v1428_v28, 0.0  ;;  %v1564_v31 = vmul.f32 0.2, %v1428_v28  ;;  %v2434_v6 = vsel %vm188_vm0, %v1917_v12, %v2155_v8  ;;  %v1777_v30 = vrot.slane %v1775_v58, 7 }
 0x324   :  { %2312 = vrot.lane.b32.xlu0 %v2291_v7, %s4180_s15  ;;  %2402 = vrot.lane.b32.xlu1 %v2136_v37, %s4184_s21  ;;  %v1555_v7 = vmul.f32 0.2, %v1405_v21  ;;  %v1529_v37 = vmul.f32 0.2, %v1340_v44  ;;  %v2475_v14 = vsel %vm237_vm1, %v2434_v6, %v2235_v45  ;;  %v1393_v45 = vadd.f32 %v5481_v33, %v5076_v43 }
 0x325   :  { %v1628_v60 = vsel %vm1500_vm7, %v1428_v28, %v1564_v31  ;;  %v1577_v28 = vsel %vm1449_vm8, %v1300_v38, %v1513_v17  ;;  %v2416_v38 = vsel %vm188_vm0, %v1911_v32, %v5336_v10  ;;  %v1385_v31 = vadd.f32 %v5481_v33, %v5029_v63 }
 0x326   :  { %v1692_v2 = vpack.c.bf16 %v1628_v60, %v1628_v60  ;;  %v2343_v15 = vpop.permute.xlu0 %2342  ;;  %v1641_v8 = vpack.c.bf16 %v1577_v28, %v1577_v28  ;;  %v2463_v46 = vsel %vm237_vm1, %v2416_v38, %v5411_v53  ;;  %v1593_v60 = vsel %vm1465_vm9, %v1340_v44, %v1529_v37 }
 0x327   :  { %v5490_v36 = vsel %vm1176_vm3, %v2503_v40, %v2343_v15  ;;  %v2495_v17 = vsel %vm270_vm2, %v2463_v46, %v5358_v55  ;;  %v5519_v40 = vpop.f32.mrf.mxu3  ;;  %v1619_v15 = vsel %vm1491_vm10, %v1405_v21, %v1555_v7  ;;  %v1547_v52 = vmul.f32 0.2, %v1385_v31 }
 0x328   :  { %v1738_v48 = vunpack.c.l.b16 %v1692_v2  ;;  %v2507_v2 = vsel %vm270_vm2, %v2475_v14, %v2315_v27  ;;  %v1657_v53 = vpack.c.bf16 %v1593_v60, %v1593_v60  ;;  %v2527_v43 = vsel %vm1176_vm3, %v2495_v17, %v5356_v59 }
 0x329   :  { %v1550_v50 = vmul.f32 0.2, %v1393_v45  ;;  %v1683_v55 = vpack.c.bf16 %v1619_v15, %v1619_v15  ;;  %v5528_v12 = vsel %vm2558_vm11, %v2527_v43, %v5438_v61  ;;  %vm1483_vm12 = vcmp.ge.f32.partialorder %v1385_v31, 0.0 }
 0x32a   :  { %v5496_v51 = vpack.c.b16 %v1738_v48, %v1738_v48  ;;  %v1778_v48 = vshll.u32 %v5241_v62, 16  ;;  %vm1486_vm4 = vcmp.ge.f32.partialorder %v1393_v45, 0.0  ;;  %v2197_v62 = vunpack.c.l.b16 %v1657_v53 }
 0x32b   :  { %v1611_v59 = vsel %vm1483_vm12, %v1385_v31, %v1547_v52  ;;  %v1614_v61 = vsel %vm1486_vm4, %v1393_v45, %v1550_v50  ;;  %v1729_v28 = vunpack.c.l.b16 %v1683_v55 }
 0x32c   :  { %2388 = vrot.lane.b32.xlu0 %v2129_v3, %s4184_s21  ;;  %2304 = vrot.lane.b32.xlu1 %v2287_v16, %s4180_s15  ;;  %v1950_v3 = vunpack.c.l.b16 %v1641_v8  ;;  %v1780_v16 = vor.u32 %v1778_v48, %v1777_v30  ;;  %v1675_v58 = vpack.c.bf16 %v1611_v59, %v1611_v59  ;;  %v1678_v14 = vpack.c.bf16 %v1614_v61, %v1614_v61 }
 0x32d   :  { %2354 = vrot.lane.b32.xlu2 %v5496_v51, %s4183_s0  ;;  %v2213_v38 = vpack.c.b16 %v2197_v62, %v2197_v62  ;;  %v5544_v8 = vpack.c.b16 %v1729_v28, %v1729_v28  ;;  %v1295_v48 = vadd.f32 %v5481_v33, %v4929_v9 }
 0x32e   :  { %v2395_v44 = vpop.permute.xlu0 %2394  ;;  %v5539_v37 = vpack.c.b16 %v1950_v3, %v1950_v3  ;;  %v1893_v6 = vsel %vm5375_vm13, 0, %v1780_v16  ;;  %v2279_v45 = vunpack.c.l.b16 %v1675_v58  ;;  %v2282_v60 = vunpack.c.l.b16 %v1678_v14 }
 0x32f   :  { %v2347_v10 = vpop.permute.xlu1 %2346  ;;  %v1511_v55 = vmul.f32 0.2, %v1295_v48  ;;  %vm1447_vm7 = vcmp.ge.f32.partialorder %v1295_v48, 0.0 }
 0x330   :  { %v2539_v63 = vsel %vm1176_vm3, %v2507_v2, %v2347_v10  ;;  %v2027_v27 = vshll.u32 %v5539_v37, 16  ;;  %v5560_v2 = vpop.f32.mrf.mxu0  ;;  %v2295_v30 = vpack.c.b16 %v2279_v45, %v2279_v45  ;;  %v2025_v53 = vshrl.u32 %v5539_v37, 16 }
 0x331   :  { %v5531_v21 = vsel %vm2558_vm11, %v2539_v63, %v2395_v44  ;;  %v2298_v63 = vpack.c.b16 %v2282_v60, %v2282_v60  ;;  %v1335_v44 = vadd.f32 %v5481_v33, %v5293_v56  ;;  %v1575_v56 = vsel %vm1447_vm7, %v1295_v48, %v1511_v55 }
 0x332   :  { %v2029_v15 = vrot.slane %v2027_v27, 1  ;;  %v1639_v58 = vpack.c.bf16 %v1575_v56, %v1575_v56  ;;  %v2062_v45 = vshll.u32 %v5409_v1, 16  ;;  %v1305_v55 = vadd.f32 %v5481_v33, %v4987_v49 }
 0x333   :  { %v1527_v62 = vmul.f32 0.2, %v1335_v44  ;;  %vm1463_vm10 = vcmp.ge.f32.partialorder %v1335_v44, 0.0 }
 0x334   :  { %2632 = vrot.lane.b32.xlu1 %v5528_v12, %s4183_s0  ;;  %2638 = vrot.lane.b32.xlu0 %v5531_v21, %s4183_s0  ;;  %v1948_v27 = vunpack.c.l.b16 %v1639_v58 }
 0x335   :  { %2144 = vrot.lane.b32.xlu2 %v5369_v5, %s4178_s5  ;;  %v1913_v5 = vsel %vm5385_vm14, 0, %v1893_v6  ;;  %v1410_v6 = vadd.f32 %v5481_v33, %v5289_v39 }
 0x336   :  { %v2422_v31 = vsel %vm188_vm0, %v1913_v5, %v5353_v41  ;;  %v1964_v39 = vpack.c.b16 %v1948_v27, %v1948_v27 }
 0x337   :  { %v1437_v7 = vpop.f32.mrf.mxu3  ;;  %v2467_v17 = vsel %vm237_vm1, %v2422_v31, %v5348_v54  ;;  %v1557_v31 = vmul.f32 0.2, %v1410_v6  ;;  %vm1493_vm12 = vcmp.ge.f32.partialorder %v1410_v6, 0.0 }
 0x338   :  { %v1438_v32 = vadd.f32 %v5481_v33, %v1437_v7  ;;  %v2499_v41 = vsel %vm270_vm2, %v2467_v17, %v5425_v0  ;;  %v2030_v0 = vor.u32 %v2029_v15, %v2025_v53 }
 0x33a   :  { %v1568_v46 = vmul.f32 0.2, %v1438_v32  ;;  %vm1504_vm5 = vcmp.ge.f32.partialorder %v1438_v32, 0.0 }
 0x33c   :  { %2170 = vrot.lane.b32.xlu1 %v5417_v20, %s4178_s5  ;;  %2236 = vrot.lane.b32.xlu0 %v2213_v38, %s4179_s12  ;;  %v1632_v10 = vsel %vm1504_vm5, %v1438_v32, %v1568_v46  ;;  %v2531_v20 = vsel %vm1176_vm3, %v2499_v41, %v5365_v19  ;;  %v1398_v19 = vadd.f32 %v5481_v33, %v5108_v22  ;;  %v2064_v41 = vrot.slane %v2062_v45, 1 }
 0x33d   :  { %2336 = vrot.lane.b32.xlu2 %v5544_v8, %s4183_s0  ;;  %v1696_v52 = vpack.c.bf16 %v1632_v10, %v1632_v10  ;;  %v5568_v54 = vsel %vm2558_vm11, %v2531_v20, %v5367_v24  ;;  %v2113_v24 = vsel %vm5215_vm15, %v2030_v0, 0  ;;  %v1591_v32 = vsel %vm1463_vm10, %v1335_v44, %v1527_v62 }
 0x33e   :  { %v1552_v16 = vmul.f32 0.2, %v1398_v19  ;;  %v2133_v22 = vsel %vm5226_vm6, 0, %v2113_v24  ;;  %vm1488_vm9 = vcmp.ge.f32.partialorder %v1398_v19, 0.0  ;;  %v1655_v5 = vpack.c.bf16 %v1591_v32, %v1591_v32 }
 0x33f   :  { %v1742_v43 = vunpack.c.l.b16 %v1696_v52  ;;  %v1621_v10 = vsel %vm1493_vm12, %v1410_v6, %v1557_v31  ;;  %v1370_v0 = vadd.f32 %v5481_v33, %v4933_v11  ;;  %v1345_v62 = vadd.f32 %v5481_v33, %v5419_v18 }
 0x340   :  { %v1616_v7 = vsel %vm1488_vm9, %v1398_v19, %v1552_v16  ;;  %v2195_v17 = vunpack.c.l.b16 %v1655_v5  ;;  %v1685_v20 = vpack.c.bf16 %v1621_v10, %v1621_v10  ;;  %v1415_v16 = vadd.f32 %v5481_v33, %v5306_v35  ;;  %v4082_v35 = vld [vmem:[%s6409_s1 + $0x58] sm:$0xff] }
 0x341   :  { %v5582_v9 = vpack.c.b16 %v1742_v43, %v1742_v43  ;;  %v1680_v38 = vpack.c.bf16 %v1616_v7, %v1616_v7  ;;  %vm1477_vm4 = vcmp.ge.f32.partialorder %v1370_v0, 0.0  ;;  %vm1451_vm5 = vcmp.ge.f32.partialorder %v1305_v55, 0.0  ;;  %v5619_v7 = vpop.permute.xlu2 %2390  ;;  %2901 = vmatpush.bf16.msra.mxu2 %v4082_v35  ;;  %4131 = vmatpush.bf16.msrb.mxu3 %v4082_v35  ;;  %v4076_v35 = vld [vmem:[%s6409_s1 + $0x28] sm:$0xff] }
 0x342   :  { %v1731_v53 = vunpack.c.l.b16 %v1685_v20  ;;  %vm1495_vm7 = vcmp.ge.f32.partialorder %v1415_v16, 0.0 }
 0x343   :  { %v2284_v60 = vunpack.c.l.b16 %v1680_v38 }
 0x344   :  { %2326 = vrot.lane.b32.xlu1 %v2298_v63, %s4180_s15  ;;  %2320 = vrot.lane.b32.xlu0 %v2295_v30, %s4180_s15  ;;  %v2211_v30 = vpack.c.b16 %v2195_v17, %v2195_v17  ;;  %v2060_v63 = vshrl.u32 %v5409_v1, 16  ;;  %v5604_v44 = vpack.c.b16 %v1731_v53, %v1731_v53  ;;  %v1541_v1 = vmul.f32 0.2, %v1370_v0 }
 0x345   :  { %2634 = vrot.lane.b32.xlu2 %v5568_v54, %s4183_s0  ;;  %v2300_v15 = vpack.c.b16 %v2284_v60, %v2284_v60 }
 0x346   :  { %v2065_v52 = vor.u32 %v2064_v41, %v2060_v63  ;;  %v5602_v43 = vpop.permute.xlu0 %2238 }
 0x348   :  { %v1352_v50 = vpop.f32.mrf.mxu0  ;;  %v2118_v48 = vsel %vm5215_vm15, %v2065_v52, 0 }
 0x349   :  { %v1353_v3 = vadd.f32 %v5481_v33, %v1352_v50  ;;  %v2011_v50 = vshrl.u32 %v1964_v39, 16  ;;  %v2138_v24 = vsel %vm5226_vm6, 0, %v2118_v48  ;;  %v5641_v10 = vpop.permute.xlu2 %2162  ;;  %v1831_v48 = vshrl.u32 %v5496_v51, 16 }
 0x34b   :  { %vm1470_vm8 = vcmp.ge.f32.partialorder %v1353_v3, 0.0  ;;  %v1534_v59 = vmul.f32 0.2, %v1353_v3 }
 0x34c   :  { %2362 = vrot.lane.b32.xlu1 %v5582_v9, %s4183_s0  ;;  %2396 = vrot.lane.b32.xlu0 %v2133_v22, %s4184_s21  ;;  %v1515_v22 = vmul.f32 0.2, %v1305_v55 }
 0x34d   :  { %v1598_v61 = vsel %vm1470_vm8, %v1353_v3, %v1534_v59  ;;  %v1605_v3 = vsel %vm1477_vm4, %v1370_v0, %v1541_v1  ;;  %vm1467_vm8 = vcmp.ge.f32.partialorder %v1345_v62, 0.0  ;;  %v4078_v0 = vld [vmem:[%s6409_s1 + $0x38] sm:$0xff] }
 0x34e   :  { %v1662_v28 = vpack.c.bf16 %v1598_v61, %v1598_v61  ;;  %v1669_v56 = vpack.c.bf16 %v1605_v3, %v1605_v3  ;;  %v1559_v61 = vmul.f32 0.2, %v1415_v16  ;;  %v5621_v6 = vpop.permute.xlu0 %2322  ;;  %v1579_v18 = vsel %vm1451_vm5, %v1305_v55, %v1515_v22 }
 0x34f   :  { %v1643_v5 = vpack.c.bf16 %v1579_v18, %v1579_v18  ;;  %v6437_v18 = vld [vmem:[#allocation4_spill] sm:$0xff] }
 0x350   :  { %v2202_v14 = vunpack.c.l.b16 %v1662_v28  ;;  %v1531_v28 = vmul.f32 0.2, %v1345_v62  ;;  %v2273_v32 = vunpack.c.l.b16 %v1669_v56  ;;  %v1623_v58 = vsel %vm1495_vm7, %v1415_v16, %v1559_v61  ;;  %v4077_v16 = vld [vmem:[%s6409_s1 + $0x30] sm:$0xff] }
 0x351   :  { %v1687_v31 = vpack.c.bf16 %v1623_v58, %v1623_v58  ;;  %v1952_v17 = vunpack.c.l.b16 %v1643_v5  ;;  %v1834_v56 = vshll.u32 %v5496_v51, 16  ;;  %v5680_v61 = vsel %vm2558_vm11, %v5490_v36, %v5619_v7 }
 0x352   :  { %v2218_v46 = vpack.c.b16 %v2202_v14, %v2202_v14  ;;  %v1420_v14 = vadd.f32 %v5481_v33, %v5413_v26  ;;  %v1595_v38 = vsel %vm1467_vm8, %v1345_v62, %v1531_v28  ;;  %v2289_v45 = vpack.c.b16 %v2273_v32, %v2273_v32  ;;  %v4080_v26 = vld [vmem:[%s6409_s1 + $0x48] sm:$0xff]  ;;  %v1354_v28 = vpop.f32.mrf.mxu0 }
 0x353   :  { %v1659_v27 = vpack.c.bf16 %v1595_v38, %v1595_v38  ;;  %v1733_v41 = vunpack.c.l.b16 %v1687_v31  ;;  %v1833_v62 = vrot.slane %v1831_v48, 7  ;;  %v1315_v51 = vadd.f32 %v5481_v33, %v6437_v18  ;;  %v4075_v31 = vld [vmem:[%s6409_s1 + $0x20] sm:$0xff] }
 0x354   :  { %2148 = vrot.lane.b32.xlu1 %v5449_v13, %s4178_s5  ;;  %2246 = vrot.lane.b32.xlu2 %v2218_v46, %s4179_s12  ;;  %v2013_v13 = vshll.u32 %v1964_v39, 16  ;;  %v4081_v46 = vld [vmem:[%s6409_s1 + $0x50] sm:$0xff]  ;;  %v1561_v60 = vmul.f32 0.2, %v1420_v14  ;;  %vm1497_vm9 = vcmp.ge.f32.partialorder %v1420_v14, 0.0  ;;  %v1425_v36 = vadd.f32 %v5481_v33, %v5451_v23 }
 0x355   :  { %2902 = vmatpush.bf16.msra.mxu2 %v4081_v46  ;;  %4132 = vmatpush.bf16.msrb.mxu3 %v4081_v46  ;;  %v5650_v63 = vpack.c.b16 %v1733_v41, %v1733_v41  ;;  %v1836_v32 = vor.u32 %v1834_v56, %v1833_v62  ;;  %v1355_v38 = vadd.f32 %v5481_v33, %v1354_v28  ;;  %vm1455_vm4 = vcmp.ge.f32.partialorder %v1315_v51, 0.0 }
 0x356   :  { %v2015_v19 = vrot.slane %v2013_v13, 1  ;;  %v1625_v20 = vsel %vm1497_vm9, %v1420_v14, %v1561_v60  ;;  %v1519_v60 = vmul.f32 0.2, %v1315_v51  ;;  %v1817_v41 = vshrl.u32 %v5454_v25, 16 }
 0x357   :  { %v1689_v52 = vpack.c.bf16 %v1625_v20, %v1625_v20  ;;  %v1901_v23 = vsel %vm5375_vm13, 0, %v1836_v32  ;;  %vm1499_vm5 = vcmp.ge.f32.partialorder %v1425_v36, 0.0  ;;  %v1350_v20 = vadd.f32 %v5481_v33, %v5560_v2  ;;  %v6438_v32 = vld [vmem:[#allocation7_spill] sm:$0xff] }
 0x358   :  { %v2016_v11 = vor.u32 %v2015_v19, %v2011_v50  ;;  %v1380_v19 = vadd.f32 %v5481_v33, %v4989_v47  ;;  %v1310_v50 = vadd.f32 %v5481_v33, %v5023_v29  ;;  %vm1471_vm7 = vcmp.ge.f32.partialorder %v1355_v38, 0.0 }
 0x359   :  { %2903 = vmatpush.bf16.msra.mxu2 %v4080_v26  ;;  %4133 = vmatpush.bf16.msrb.mxu3 %v4080_v26  ;;  %v1735_v1 = vunpack.c.l.b16 %v1689_v52  ;;  %v1563_v26 = vmul.f32 0.2, %v1425_v36  ;;  %v1583_v48 = vsel %vm1455_vm4, %v1315_v51, %v1519_v60  ;;  %v1819_v2 = vrot.slane %v1817_v41, 7 }
 0x35a   :  { %v2111_v59 = vsel %vm5215_vm15, %v2016_v11, 0  ;;  %v5666_v11 = vpop.permute.xlu2 %2318  ;;  %v1517_v47 = vmul.f32 0.2, %v1310_v50  ;;  %vm1481_vm10 = vcmp.ge.f32.partialorder %v1380_v19, 0.0  ;;  %vm1453_vm12 = vcmp.ge.f32.partialorder %v1310_v50, 0.0 }
 0x35b   :  { %v2131_v49 = vsel %vm5226_vm6, 0, %v2111_v59  ;;  %v1545_v59 = vmul.f32 0.2, %v1380_v19  ;;  %v5673_v22 = vpack.c.b16 %v1735_v1, %v1735_v1  ;;  %vm1469_vm8 = vcmp.ge.f32.partialorder %v1350_v20, 0.0 }
 0x35c   :  { %2232 = vrot.lane.b32.xlu1 %v2211_v30, %s4179_s12  ;;  %2330 = vrot.lane.b32.xlu2 %v2300_v15, %s4180_s15  ;;  %v2199_v15 = vunpack.c.l.b16 %v1659_v27  ;;  %v5645_v30 = vpack.c.b16 %v1952_v17, %v1952_v17  ;;  %v1581_v14 = vsel %vm1453_vm12, %v1310_v50, %v1517_v47  ;;  %v1627_v50 = vsel %vm1499_vm5, %v1425_v36, %v1563_v26 }
 0x35d   :  { %v1609_v58 = vsel %vm1481_vm10, %v1380_v19, %v1545_v59  ;;  %v1771_v56 = vshll.u32 %v5544_v8, 16  ;;  %v1820_v18 = vshll.u32 %v5454_v25, 16 }
 0x35e   :  { %v2215_v13 = vpack.c.b16 %v2199_v15, %v2199_v15  ;;  %v2041_v53 = vshll.u32 %v5645_v30, 16  ;;  %v2039_v29 = vshrl.u32 %v5645_v30, 16  ;;  %v1673_v27 = vpack.c.bf16 %v1609_v58, %v1609_v58 }
 0x35f   :  { %v1768_v15 = vshrl.u32 %v5544_v8, 16  ;;  %v1395_v58 = vadd.f32 %v5481_v33, %v6438_v32 }
 0x360   :  { %v2043_v3 = vrot.slane %v2041_v53, 1  ;;  %v1921_v53 = vsel %vm5385_vm14, 0, %v1901_v23 }
 0x361   :  { %v2446_v47 = vsel %vm188_vm0, %v1921_v53, %v5641_v10  ;;  %v1551_v41 = vmul.f32 0.2, %v1395_v58  ;;  %vm1487_vm10 = vcmp.ge.f32.partialorder %v1395_v58, 0.0 }
 0x364   :  { %2340 = vrot.lane.b32.xlu1 %v5604_v44, %s4183_s0  ;;  %2406 = vrot.lane.b32.xlu2 %v2138_v24, %s4184_s21  ;;  %v5664_v24 = vpop.permute.xlu1 %2158 }
 0x36c   :  { %2392 = vrot.lane.b32.xlu1 %v2131_v49, %s4184_s21  ;;  %2152 = vrot.lane.b32.xlu2 %v1964_v39, %s4178_s5  ;;  %v5643_v39 = vpop.permute.xlu0 %2398  ;;  %v2044_v49 = vor.u32 %v2043_v3, %v2039_v29  ;;  %v1770_v3 = vrot.slane %v1768_v15, 7  ;;  %v1647_v29 = vpack.c.bf16 %v1583_v48, %v1583_v48 }
 0x36e   :  { %v2115_v46 = vsel %vm5215_vm15, %v2044_v49, 0  ;;  %v1773_v36 = vor.u32 %v1771_v56, %v1770_v3 }
 0x36f   :  { %v2135_v52 = vsel %vm5226_vm6, 0, %v2115_v46  ;;  %v1822_v46 = vor.u32 %v1820_v18, %v1819_v2 }
 0x370   :  { %v1892_v23 = vsel %vm5375_vm13, 0, %v1773_v36 }
 0x374   :  { %2156 = vrot.lane.b32.xlu1 %v5539_v37, %s4178_s5  ;;  %2308 = vrot.lane.b32.xlu2 %v2289_v45, %s4180_s15  ;;  %v4079_v37 = vld [vmem:[%s6409_s1 + $0x40] sm:$0xff]  ;;  %v5668_v55 = vpop.permute.xlu0 %2224  ;;  %v1645_v45 = vpack.c.bf16 %v1581_v14, %v1581_v14 }
 0x375   :  { %2904 = vmatpush.bf16.msra.mxu2 %v4079_v37  ;;  %4134 = vmatpush.bf16.msrb.mxu3 %v4079_v37  ;;  %v1535_v37 = vmul.f32 0.2, %v1355_v38 }
 0x376   :  { %v1954_v19 = vunpack.c.l.b16 %v1645_v45 }
 0x377   :  { %v1599_v59 = vsel %vm1471_vm7, %v1355_v38, %v1535_v37 }
 0x378   :  { %v5723_v51 = vpack.c.b16 %v1954_v19, %v1954_v19  ;;  %v1663_v14 = vpack.c.bf16 %v1599_v59, %v1599_v59 }
 0x379   :  { %2905 = vmatpush.bf16.msra.mxu2 %v4078_v0  ;;  %4135 = vmatpush.bf16.msrb.mxu3 %v4078_v0  ;;  %v2277_v0 = vunpack.c.l.b16 %v1673_v27 }
 0x37a   :  { %v2203_v45 = vunpack.c.l.b16 %v1663_v14  ;;  %v2055_v14 = vshll.u32 %v5723_v51, 16 }
 0x37b   :  { %v2293_v49 = vpack.c.b16 %v2277_v0, %v2277_v0 }
 0x37c   :  { %2240 = vrot.lane.b32.xlu1 %v2215_v13, %s4179_s12  ;;  %2344 = vrot.lane.b32.xlu2 %v5650_v63, %s4183_s0  ;;  %v5699_v17 = vpop.permute.xlu0 %2384  ;;  %v1429_v13 = vpop.f32.mrf.mxu1  ;;  %v2219_v48 = vpack.c.b16 %v2203_v45, %v2203_v45  ;;  %v2053_v45 = vshrl.u32 %v5723_v51, 16 }
 0x37d   :  { %2906 = vmatpush.bf16.msra.mxu2 %v4077_v16  ;;  %4136 = vmatpush.bf16.msrb.mxu3 %v4077_v16  ;;  %v1533_v16 = vmul.f32 0.2, %v1350_v20  ;;  %v1430_v62 = vadd.f32 %v5481_v33, %v1429_v13 }
 0x37f   :  { %v1597_v38 = vsel %vm1469_vm8, %v1350_v20, %v1533_v16  ;;  %v1565_v10 = vmul.f32 0.2, %v1430_v62  ;;  %vm1501_vm9 = vcmp.ge.f32.partialorder %v1430_v62, 0.0 }
 0x380   :  { %v1661_v27 = vpack.c.bf16 %v1597_v38, %v1597_v38 }
 0x381   :  { %2907 = vmatpush.bf16.msra.mxu2 %v4076_v35  ;;  %4137 = vmatpush.bf16.msrb.mxu3 %v4076_v35  ;;  %v1691_v35 = vpack.c.bf16 %v1627_v50, %v1627_v50  ;;  %v1629_v15 = vsel %vm1501_vm9, %v1430_v62, %v1565_v10  ;;  %v1615_v50 = vsel %vm1487_vm10, %v1395_v58, %v1551_v41 }
 0x382   :  { %v2201_v13 = vunpack.c.l.b16 %v1661_v27  ;;  %v1693_v53 = vpack.c.bf16 %v1629_v15, %v1629_v15 }
 0x383   :  { %v1737_v25 = vunpack.c.l.b16 %v1691_v35 }
 0x384   :  { %2348 = vrot.lane.b32.xlu1 %v5673_v22, %s4183_s0  ;;  %2636 = vrot.lane.b32.xlu2 %v5680_v61, %s4183_s0 }
 0x385   :  { %2908 = vmatpush.bf16.msra.mxu2 %v4075_v31  ;;  %4138 = vmatpush.bf16.msrb.mxu3 %v4075_v31  ;;  %v5727_v31 = vpop.permute.xlu0 %2166 }
 0x386   :  { %v2243_v7 = vpop.permute.xlu1 %2242 }
 0x387   :  { %v2355_v5 = vpop.permute.xlu2 %2354 }
 0x38c   :  { %2400 = vrot.lane.b32.xlu1 %v2135_v52, %s4184_s21  ;;  %2160 = vrot.lane.b32.xlu2 %v5645_v30, %s4178_s5  ;;  %v2483_v30 = vsel %vm237_vm1, %v2446_v47, %v2243_v7  ;;  %v1956_v7 = vunpack.c.l.b16 %v1647_v29  ;;  %v5744_v52 = vpack.c.b16 %v1737_v25, %v1737_v25  ;;  %v1679_v47 = vpack.c.bf16 %v1615_v50, %v1615_v50 }
 0x38d   :  { %v2515_v8 = vsel %vm270_vm2, %v2483_v30, %v5621_v6  ;;  %v1899_v6 = vsel %vm5375_vm13, 0, %v1822_v46  ;;  %v5758_v59 = vpop.permute.xlu0 %2250  ;;  %v2217_v29 = vpack.c.b16 %v2201_v13, %v2201_v13  ;;  %v1739_v30 = vunpack.c.l.b16 %v1693_v53 }
 0x38e   :  { %v5715_v1 = vpop.permute.xlu1 %2350  ;;  %v2547_v60 = vsel %vm1176_vm3, %v2515_v8, %v2355_v5  ;;  %v1972_v37 = vpack.c.b16 %v1956_v7, %v1956_v7  ;;  %v1912_v5 = vsel %vm5385_vm14, 0, %v1892_v23  ;;  %v1919_v0 = vsel %vm5385_vm14, 0, %v1899_v6 }
 0x38f   :  { %v2145_v28 = vpop.permute.xlu2 %2144  ;;  %v2440_v2 = vsel %vm188_vm0, %v1919_v0, %v5664_v24  ;;  %v2283_v36 = vunpack.c.l.b16 %v1679_v47  ;;  %v2057_v7 = vrot.slane %v2055_v14, 1  ;;  %v1859_v53 = vshrl.u32 %v5582_v9, 16 }
 0x390   :  { %v2419_v3 = vsel %vm188_vm0, %v1912_v5, %v2145_v28  ;;  %v2479_v16 = vsel %vm237_vm1, %v2440_v2, %v5602_v43  ;;  %v2069_v62 = vshll.u32 %v1972_v37, 16  ;;  %v6441_v2 = vld [vmem:[#allocation10_spill] sm:$0xff] }
 0x391   :  { %v2465_v24 = vsel %vm237_vm1, %v2419_v3, %v5668_v55  ;;  %v2511_v43 = vsel %vm270_vm2, %v2479_v16, %v5666_v11  ;;  %v5772_v55 = vpack.c.b16 %v1739_v30, %v1739_v30  ;;  %v2067_v11 = vshrl.u32 %v1972_v37, 16 }
 0x392   :  { %v2543_v18 = vsel %vm1176_vm3, %v2511_v43, %v5715_v1  ;;  %v2071_v58 = vrot.slane %v2069_v62, 1  ;;  %v2299_v25 = vpack.c.b16 %v2283_v36, %v2283_v36  ;;  %v2058_v5 = vor.u32 %v2057_v7, %v2053_v45 }
 0x393   :  { %v5780_v46 = vsel %vm2558_vm11, %v2543_v18, %v5643_v39  ;;  %v1845_v3 = vshrl.u32 %v6441_v2, 16  ;;  %v1861_v62 = vrot.slane %v1859_v53, 7 }
 0x394   :  { %2164 = vrot.lane.b32.xlu1 %v5723_v51, %s4178_s5  ;;  %2316 = vrot.lane.b32.xlu2 %v2293_v49, %s4180_s15  ;;  %v6439_v49 = vld [vmem:[#allocation5_spill] sm:$0xff]  ;;  %v2072_v8 = vor.u32 %v2071_v58, %v2067_v11  ;;  %v6442_v58 = vmov 0  }
 0x395   :  { %v1390_v28 = vadd.f32 %v5481_v33, %v6439_v49  ;;  %v5793_v23 = vpop.permute.xlu0 %2358  ;;  %v1847_v49 = vrot.slane %v1845_v3, 7 }
 0x396   :  { %v2403_v26 = vpop.permute.xlu1 %2402  ;;  %v2119_v6 = vsel %vm5215_vm15, %v2072_v8, 0 }
 0x397   :  { %v5740_v20 = vsel %vm2558_vm11, %v2547_v60, %v2403_v26  ;;  %v2337_v19 = vpop.permute.xlu2 %2336  ;;  %v1549_v10 = vmul.f32 0.2, %v1390_v28  ;;  %vm1485_vm12 = vcmp.ge.f32.partialorder %v1390_v28, 0.0  ;;  %v1435_v60 = vadd.f32 %v5481_v33, %v5519_v40 }
 0x398   :  { %2642 = vrot.lane.b32.xlu0 %v5740_v20, %s4183_s0  ;;  %v2139_v0 = vsel %vm5226_vm6, 0, %v2119_v6 }
 0x399   :  { %v1613_v39 = vsel %vm1485_vm12, %v1390_v28, %v1549_v10  ;;  %v1567_v40 = vmul.f32 0.2, %v1435_v60  ;;  %vm1503_vm4 = vcmp.ge.f32.partialorder %v1435_v60, 0.0 }
 0x39a   :  { %v1677_v13 = vpack.c.bf16 %v1613_v39, %v1613_v39 }
 0x39c   :  { %2248 = vrot.lane.b32.xlu1 %v2219_v48, %s4179_s12  ;;  %2352 = vrot.lane.b32.xlu2 %v5744_v52, %s4183_s0  ;;  %v2117_v48 = vsel %vm5215_vm15, %v2058_v5, 0  ;;  %v2281_v16 = vunpack.c.l.b16 %v1677_v13 }
 0x39d   :  { %v2411_v28 = vpop.permute.xlu0 %2410 }
 0x39e   :  { %v2305_v56 = vpop.permute.xlu1 %2304  ;;  %v2297_v43 = vpack.c.b16 %v2281_v16, %v2281_v16  ;;  %v1782_v16 = vshrl.u32 %v5604_v44, 16 }
 0x39f   :  { %v2497_v35 = vsel %vm270_vm2, %v2465_v24, %v2305_v56  ;;  %v2635_v1 = vpop.permute.xlu2 %2634  ;;  %v2137_v56 = vsel %vm5226_vm6, 0, %v2117_v48  ;;  %v1862_v24 = vshll.u32 %v5582_v9, 16 }
 0x3a0   :  { %v2529_v32 = vsel %vm1176_vm3, %v2497_v35, %v2337_v19  ;;  %2244 = vrot.lane.b32.xlu0 %v2217_v29, %s4179_s12  ;;  %v6440_v19 = vld [vmem:[#allocation6_spill] sm:$0xff]  ;;  %v1631_v29 = vsel %vm1503_vm4, %v1435_v60, %v1567_v40 }
 0x3a1   :  { %v5776_v38 = vsel %vm2558_vm11, %v2529_v32, %v5699_v17  ;;  %v1320_v50 = vadd.f32 %v5481_v33, %v6440_v19  ;;  %v1695_v35 = vpack.c.bf16 %v1631_v29, %v1631_v29  ;;  %v1864_v18 = vor.u32 %v1862_v24, %v1861_v62 }
 0x3a2   :  { %v5788_v17 = vsel %vm1176_vm3, %v5776_v38, %v2635_v1  ;;  %v1848_v32 = vshll.u32 %v6441_v2, 16  ;;  %v6443_v1 = vld [vmem:[#allocation3_spill] sm:$0xff] }
 0x3a3   :  { %v2755_v41 = vunpack.c.l.b16 %v5788_v17  ;;  %vm1457_vm5 = vcmp.ge.f32.partialorder %v1320_v50, 0.0  ;;  %v1741_v9 = vunpack.c.l.b16 %v1695_v35  ;;  %v1905_v11 = vsel %vm5375_vm13, 0, %v1864_v18 }
 0x3a4   :  { %2356 = vrot.lane.b32.xlu1 %v5772_v55, %s4183_s0  ;;  %2640 = vrot.lane.b32.xlu2 %v5780_v46, %s4183_s0  ;;  %v1850_v36 = vor.u32 %v1848_v32, %v1847_v49  ;;  %v1360_v8 = vadd.f32 %v5481_v33, %v6443_v1  ;;  %v1925_v45 = vsel %vm5385_vm14, 0, %v1905_v11 }
 0x3a5   :  { %v5828_v39 = vpack.c.b16 %v1741_v9, %v1741_v9  ;;  %v1799_v9 = vshll.u32 %v5650_v63, 16 }
 0x3a6   :  { %v2633_v27 = vpop.permute.xlu1 %2632  ;;  %vm1473_vm7 = vcmp.ge.f32.partialorder %v1360_v8, 0.0 }
 0x3a7   :  { %v2651_v26 = vsel %vm1176_vm3, 0, %v2633_v27  ;;  %v1903_v27 = vsel %vm5375_vm13, 0, %v1850_v36 }
 0x3a8   :  { %v2754_v15 = vunpack.c.l.b16 %v2651_v26  ;;  %2328 = vrot.lane.b32.xlu0 %v2299_v25, %s4180_s15  ;;  %v1537_v26 = vmul.f32 0.2, %v1360_v8  ;;  %v1923_v5 = vsel %vm5385_vm14, 0, %v1903_v27 }
 0x3a9   :  { %v2452_v13 = vsel %vm188_vm0, %v1923_v5, %v5727_v31 }
 0x3aa   :  { %v2773_v51 = vpack.c.b16 %v2755_v41, %v2754_v15  ;;  %v2229_v15 = vpop.permute.xlu0 %2228  ;;  %v1601_v48 = vsel %vm1473_vm7, %v1360_v8, %v1537_v26 }
 0x3ab   :  { %v1665_v31 = vpack.c.bf16 %v1601_v48, %v1601_v48 }
 0x3ac   :  { %2408 = vrot.lane.b32.xlu1 %v2139_v0, %s4184_s21  ;;  %2168 = vrot.lane.b32.xlu2 %v1972_v37, %s4178_s5  ;;  %v1521_v37 = vmul.f32 0.2, %v1320_v50 }
 0x3ad   :  { %2909 = vmatmul.bf16.vlgmr.msra.gmra.mxu2 %v2773_v51 }
 0x3ae   :  { %v2171_v47 = vpop.permute.xlu1 %2170  ;;  %v2247_v30 = vpop.permute.xlu2 %2246  ;;  %v1585_v14 = vsel %vm1457_vm5, %v1320_v50, %v1521_v37 }
 0x3af   :  { %v1649_v25 = vpack.c.bf16 %v1585_v14, %v1585_v14  ;;  %v2458_v60 = vsel %vm188_vm0, %v1925_v45, %v2171_v47  ;;  %v2487_v53 = vsel %vm237_vm1, %v2452_v13, %v2247_v30  ;;  %v2205_v30 = vunpack.c.l.b16 %v1665_v31  ;;  %v1439_v13 = vpop.f32.mrf.mxu3 }
 0x3b0   :  { %2404 = vrot.lane.b32.xlu0 %v2137_v56, %s4184_s21  ;;  %v2491_v51 = vsel %vm237_vm1, %v2458_v60, %v5758_v59  ;;  %v1784_v56 = vrot.slane %v1782_v16, 7  ;;  %v1440_v48 = vadd.f32 %v5481_v33, %v1439_v13 }
 0x3b1   :  { %v1958_v6 = vunpack.c.l.b16 %v1649_v25 }
 0x3b2   :  { %v2313_v29 = vpop.permute.xlu0 %2312  ;;  %v1569_v16 = vmul.f32 0.2, %v1440_v48  ;;  %vm1505_vm9 = vcmp.ge.f32.partialorder %v1440_v48, 0.0 }
 0x3b3   :  { %v5845_v2 = vpack.c.b16 %v1958_v6, %v1958_v6 }
 0x3b4   :  { %2675 = vrot.lane.b32.xlu1 %v6442_v58, %s4185_s23  ;;  %2324 = vrot.lane.b32.xlu2 %v2297_v43, %s4180_s15 }
 0x3b5   :  { %v2083_v47 = vshll.u32 %v5845_v2, 16  ;;  %v2081_v35 = vshrl.u32 %v5845_v2, 16 }
 0x3b6   :  { %v2327_v10 = vpop.permute.xlu1 %2326  ;;  %v2331_v7 = vpop.permute.xlu2 %2330 }
 0x3b7   :  { %v2523_v40 = vsel %vm270_vm2, %v2491_v51, %v2331_v7  ;;  %v2519_v19 = vsel %vm270_vm2, %v2487_v53, %v2327_v10  ;;  %v2085_v49 = vrot.slane %v2083_v47, 1  ;;  %v6444_v7 = vld [vmem:[#allocation8_spill] sm:$0xff] }
 0x3b8   :  { %v2551_v59 = vsel %vm1176_vm3, %v2519_v19, %v5793_v23  ;;  %v1785_v23 = vshll.u32 %v5604_v44, 16  ;;  %v1400_v25 = vadd.f32 %v5481_v33, %v6444_v7 }
 0x3b9   :  { %v2086_v18 = vor.u32 %v2085_v49, %v2081_v35 }
 0x3ba   :  { %v1787_v43 = vor.u32 %v1785_v23, %v1784_v56  ;;  %v2389_v36 = vpop.permute.xlu0 %2388  ;;  %v1553_v5 = vmul.f32 0.2, %v1400_v25  ;;  %vm1489_vm8 = vcmp.ge.f32.partialorder %v1400_v25, 0.0  ;;  %v1633_v23 = vsel %vm1505_vm9, %v1440_v48, %v1569_v16 }
 0x3bc   :  { %2693 = vrot.lane.b32.xlu1 %v5568_v54, %s4179_s12  ;;  %2360 = vrot.lane.b32.xlu2 %v5828_v39, %s4183_s0  ;;  %v1894_v44 = vsel %vm5375_vm13, 0, %v1787_v43  ;;  %v1617_v19 = vsel %vm1489_vm8, %v1400_v25, %v1553_v5  ;;  %v4089_v25 = vld [vmem:[%s6409_s1 + $0x90] sm:$0xff] }
 0x3bd   :  { %v1914_v10 = vsel %vm5385_vm14, 0, %v1894_v44 }
 0x3be   :  { %v2363_v0 = vpop.permute.xlu1 %2362  ;;  %v2407_v54 = vpop.permute.xlu2 %2406 }
 0x3bf   :  { %v2555_v50 = vsel %vm1176_vm3, %v2523_v40, %v2363_v0  ;;  %v5856_v62 = vsel %vm2558_vm11, %v2551_v59, %v2407_v54  ;;  %v1681_v59 = vpack.c.bf16 %v1617_v19, %v1617_v19 }
 0x3c0   :  { %v5848_v3 = vsel %vm2558_vm11, %v2555_v50, %v2411_v28  ;;  %v1796_v28 = vshrl.u32 %v5650_v63, 16 }
 0x3c1   :  { %2646 = vrot.lane.b32.xlu0 %v5848_v3, %s4183_s0 }
 0x3c2   :  { %v1798_v32 = vrot.slane %v1796_v28, 7  ;;  %v2639_v40 = vpop.permute.xlu0 %2638 }
 0x3c4   :  { %2695 = vrot.lane.b32.xlu1 %v5680_v61, %s4179_s12  ;;  %2644 = vrot.lane.b32.xlu2 %v5856_v62, %s4183_s0  ;;  %v2221_v61 = vpack.c.b16 %v2205_v30, %v2205_v30  ;;  %v1801_v1 = vor.u32 %v1799_v9, %v1798_v32 }
 0x3c6   :  { %v2149_v24 = vpop.permute.xlu1 %2148  ;;  %v2153_v37 = vpop.permute.xlu2 %2152  ;;  %v1896_v63 = vsel %vm5375_vm13, 0, %v1801_v1 }
 0x3c7   :  { %v2425_v8 = vsel %vm188_vm0, %v1914_v10, %v2149_v24  ;;  %v1916_v51 = vsel %vm5385_vm14, 0, %v1896_v63 }
 0x3c8   :  { %v2469_v27 = vsel %vm237_vm1, %v2425_v8, %v2229_v15  ;;  %v2431_v0 = vsel %vm188_vm0, %v1916_v51, %v2153_v37  ;;  %v2285_v37 = vunpack.c.l.b16 %v1681_v59 }
 0x3c9   :  { %2691 = vrot.lane.b32.xlu0 %v5528_v12, %s4179_s12  ;;  %v2121_v12 = vsel %vm5215_vm15, %v2086_v18, 0 }
 0x3ca   :  { %v2237_v49 = vpop.permute.xlu0 %2236  ;;  %v2301_v32 = vpack.c.b16 %v2285_v37, %v2285_v37 }
 0x3cc   :  { %2252 = vrot.lane.b32.xlu1 %v2221_v61, %s4179_s12  ;;  %2677 = vrot.lane.b32.xlu2 %v5776_v38, %s4185_s23  ;;  %v2141_v38 = vsel %vm5226_vm6, 0, %v2121_v12  ;;  %v1697_v61 = vpack.c.bf16 %v1633_v23, %v1633_v23 }
 0x3ce   :  { %v2233_v14 = vpop.permute.xlu1 %2232  ;;  %v2309_v11 = vpop.permute.xlu2 %2308  ;;  %v1743_v17 = vunpack.c.l.b16 %v1697_v61 }
 0x3cf   :  { %v2501_v45 = vsel %vm270_vm2, %v2469_v27, %v2309_v11  ;;  %v2473_v15 = vsel %vm237_vm1, %v2431_v0, %v2233_v14  ;;  %v1813_v14 = vshll.u32 %v5673_v22, 16 }
 0x3d0   :  { %v2505_v50 = vsel %vm270_vm2, %v2473_v15, %v2313_v29  ;;  %v1810_v29 = vshrl.u32 %v5673_v22, 16  ;;  %v5919_v12 = vpack.c.b16 %v1743_v17, %v1743_v17 }
 0x3d2   :  { %v1812_v35 = vrot.slane %v1810_v29, 7  ;;  %v2321_v9 = vpop.permute.xlu0 %2320  ;;  %v4087_v29 = vld [vmem:[%s6409_s1 + $0x80] sm:$0xff] }
 0x3d4   :  { %2412 = vrot.lane.b32.xlu1 %v2141_v38, %s4184_s21 }
 0x3d6   :  { %v2341_v60 = vpop.permute.xlu1 %2340  ;;  %v2345_v6 = vpop.permute.xlu2 %2344 }
 0x3d7   :  { %v2533_v26 = vsel %vm1176_vm3, %v2501_v45, %v2341_v60  ;;  %v2537_v54 = vsel %vm1176_vm3, %v2505_v50, %v2345_v6 }
 0x3d8   :  { %v2566_v53 = vsel %vm2558_vm11, %v2533_v26, %v2389_v36  ;;  %v1824_v36 = vshrl.u32 %v5744_v52, 16 }
 0x3d9   :  { %2679 = vrot.lane.b32.xlu2 %v2566_v53, %s4185_s23 }
 0x3da   :  { %v1826_v11 = vrot.slane %v1824_v36, 7  ;;  %v2397_v60 = vpop.permute.xlu0 %2396 }
 0x3dc   :  { %2699 = vrot.lane.b32.xlu1 %v5780_v46, %s4179_s12 }
 0x3de   :  { %v2393_v31 = vpop.permute.xlu1 %2392  ;;  %v2637_v30 = vpop.permute.xlu2 %2636 }
 0x3df   :  { %v2570_v47 = vsel %vm2558_vm11, %v2537_v54, %v2393_v31  ;;  %v2655_v56 = vsel %vm1176_vm3, %v2566_v53, %v2637_v30  ;;  %v4088_v54 = vld [vmem:[%s6409_s1 + $0x88] sm:$0xff]  ;;  %v1852_v30 = vshrl.u32 %v5828_v39, 16 }
 0x3e0   :  { %2681 = vrot.lane.b32.xlu0 %v2570_v47, %s4185_s23  ;;  %v2657_v33 = vsel %vm1176_vm3, %v2570_v47, %v2639_v40  ;;  %v2756_v24 = vunpack.c.l.b16 %v2655_v56 }
 0x3e1   :  { %2697 = vrot.lane.b32.xlu2 %v5531_v21, %s4179_s12  ;;  %v2757_v46 = vunpack.c.l.b16 %v2657_v33  ;;  %v4090_v21 = vld [vmem:[%s6409_s1 + $0x98] sm:$0xff]  ;;  %v1854_v37 = vrot.slane %v1852_v30, 7  ;;  %v4083_v30 = vld [vmem:[%s6409_s1 + $0x60] sm:$0xff] }
 0x3e2   :  { %v5909_v43 = vpack.c.b16 %v2756_v24, %v2755_v41  ;;  %v1815_v41 = vor.u32 %v1813_v14, %v1812_v35  ;;  %2950 = vmatpush.bf16.msrb.mxu2 %v4090_v21 }
 0x3e3   :  { %v2775_v28 = vpack.c.b16 %v2757_v46, %v2756_v24 }
 0x3e4   :  { %v1898_v22 = vsel %vm5375_vm13, 0, %v1815_v41  ;;  %v4086_v41 = vld [vmem:[%s6409_s1 + $0x78] sm:$0xff] }
 0x3e5   :  { %2914 = vmatmul.bf16.gmra.mxu2 %v2775_v28  ;;  %v1918_v8 = vsel %vm5385_vm14, 0, %v1898_v22 }
 0x3e6   :  { %v2157_v18 = vpop.permute.xlu1 %2156  ;;  %v2161_v44 = vpop.permute.xlu2 %2160  ;;  %2951 = vmatpush.bf16.msrb.mxu2 %v4089_v25 }
 0x3e7   :  { %v2437_v7 = vsel %vm188_vm0, %v1918_v8, %v2157_v18  ;;  %v1841_v18 = vshll.u32 %v5772_v55, 16 }
 0x3e8   :  { %2172 = vrot.lane.b32.xlu0 %v5845_v2, %s4178_s5  ;;  %v1827_v2 = vshll.u32 %v5744_v52, 16  ;;  %v2477_v63 = vsel %vm237_vm1, %v2437_v7, %v2237_v49  ;;  %v1855_v49 = vshll.u32 %v5828_v39, 16 }
 0x3e9   :  { %2332 = vrot.lane.b32.xlu2 %v2301_v32, %s4180_s15 }
 0x3ea   :  { %v1829_v38 = vor.u32 %v1827_v2, %v1826_v11  ;;  %2952 = vmatpush.bf16.msrb.mxu2 %v4088_v54  ;;  %v1857_v61 = vor.u32 %v1855_v49, %v1854_v37  ;;  %v1869_v49 = vshll.u32 %v5919_v12, 16 }
 0x3ec   :  { %v1900_v52 = vsel %vm5375_vm13, 0, %v1829_v38 }
 0x3ed   :  { %v1920_v5 = vsel %vm5385_vm14, 0, %v1900_v52 }
 0x3ee   :  { %v2241_v10 = vpop.permute.xlu1 %2240  ;;  %v2317_v1 = vpop.permute.xlu2 %2316  ;;  %v2443_v51 = vsel %vm188_vm0, %v1920_v5, %v2161_v44  ;;  %2953 = vmatpush.bf16.msrb.mxu2 %v4087_v29  ;;  %v1904_v44 = vsel %vm5375_vm13, 0, %v1857_v61 }
 0x3ef   :  { %v2509_v27 = vsel %vm270_vm2, %v2477_v63, %v2317_v1  ;;  %v2481_v53 = vsel %vm237_vm1, %v2443_v51, %v2241_v10  ;;  %v1924_v21 = vsel %vm5385_vm14, 0, %v1904_v44 }
 0x3f0   :  { %2364 = vrot.lane.b32.xlu0 %v5919_v12, %s4183_s0  ;;  %v2513_v40 = vsel %vm270_vm2, %v2481_v53, %v2321_v9  ;;  %v4084_v53 = vld [vmem:[%s6409_s1 + $0x68] sm:$0xff] }
 0x3f1   :  { %2648 = vrot.lane.b32.xlu2 %v6442_v58, %s4183_s0 }
 0x3f2   :  { %2954 = vmatpush.bf16.msrb.mxu2 %v4086_v41 }
 0x3f6   :  { %v2349_v45 = vpop.permute.xlu1 %2348  ;;  %v2353_v6 = vpop.permute.xlu2 %2352 }
 0x3f7   :  { %v2541_v26 = vsel %vm1176_vm3, %v2509_v27, %v2349_v45  ;;  %v2545_v0 = vsel %vm1176_vm3, %v2513_v40, %v2353_v6  ;;  %v4085_v45 = vld [vmem:[%s6409_s1 + $0x70] sm:$0xff] }
 0x3f8   :  { %v2574_v13 = vsel %vm2558_vm11, %v2541_v26, %v2397_v60  ;;  %2955 = vmatpush.bf16.msrb.mxu2 %v4085_v45 }
 0x3f9   :  { %2683 = vrot.lane.b32.xlu0 %v2574_v13, %s4185_s23 }
 0x3fc   :  { %2956 = vmatpush.bf16.msrb.mxu2 %v4084_v53 }
 0x3fe   :  { %v2401_v15 = vpop.permute.xlu1 %2400  ;;  %v2641_v19 = vpop.permute.xlu2 %2640 }
 0x3ff   :  { %v2578_v48 = vsel %vm2558_vm11, %v2545_v0, %v2401_v15  ;;  %v2659_v50 = vsel %vm1176_vm3, %v2574_v13, %v2641_v19 }
 0x400   :  { %2685 = vrot.lane.b32.xlu2 %v2578_v48, %s4185_s23  ;;  %v2758_v31 = vunpack.c.l.b16 %v2659_v50  ;;  %2957 = vmatpush.bf16.msrb.mxu2 %v4083_v30 }
 0x401   :  { %2701 = vrot.lane.b32.xlu0 %v5740_v20, %s4179_s12  ;;  %v1838_v20 = vshrl.u32 %v5772_v55, 16 }
 0x402   :  { %v5955_v59 = vpack.c.b16 %v2758_v31, %v2757_v46 }
 0x406   :  { %v2165_v16 = vpop.permute.xlu1 %2164  ;;  %v2169_v47 = vpop.permute.xlu2 %2168 }
 0x407   :  { %v2455_v39 = vsel %vm188_vm0, %v1924_v21, %v2169_v47 }
 0x408   :  { %2703 = vrot.lane.b32.xlu2 %v5856_v62, %s4179_s12  ;;  %v1840_v62 = vrot.slane %v1838_v20, 7  ;;  %v1866_v20 = vshrl.u32 %v5919_v12, 16 }
 0x40a   :  { %v2643_v56 = vpop.permute.xlu0 %2642  ;;  %v1843_v32 = vor.u32 %v1841_v18, %v1840_v62  ;;  %v1868_v37 = vrot.slane %v1866_v20, 7 }
 0x40b   :  { %v2661_v33 = vsel %vm1176_vm3, %v2578_v48, %v2643_v56 }
 0x40c   :  { %v2759_v24 = vunpack.c.l.b16 %v2661_v33  ;;  %v1902_v36 = vsel %vm5375_vm13, 0, %v1843_v32  ;;  %v1871_v61 = vor.u32 %v1869_v49, %v1868_v37 }
 0x40d   :  { %v1922_v22 = vsel %vm5385_vm14, 0, %v1902_v36 }
 0x40e   :  { %v2249_v46 = vpop.permute.xlu1 %2248  ;;  %v2777_v23 = vpack.c.b16 %v2759_v24, %v2758_v31  ;;  %v2325_v28 = vpop.permute.xlu2 %2324  ;;  %v2449_v10 = vsel %vm188_vm0, %v1922_v22, %v2165_v16  ;;  %v1906_v32 = vsel %vm5375_vm13, 0, %v1871_v61 }
 0x40f   :  { %v2489_v55 = vsel %vm237_vm1, %v2455_v39, %v2249_v46 }
 0x410   :  { %2919 = vmatmul.bf16.gmra.mxu2 %v2777_v23 }
 0x412   :  { %v2245_v35 = vpop.permute.xlu0 %2244 }
 0x413   :  { %v2485_v2 = vsel %vm237_vm1, %v2449_v10, %v2245_v35 }
 0x414   :  { %v2517_v7 = vsel %vm270_vm2, %v2485_v2, %v2325_v28 }
 0x416   :  { %v2357_v14 = vpop.permute.xlu1 %2356  ;;  %v2361_v17 = vpop.permute.xlu2 %2360 }
 0x417   :  { %v2549_v25 = vsel %vm1176_vm3, %v2517_v7, %v2357_v14  ;;  %v1926_v14 = vsel %vm5385_vm14, 0, %v1906_v32 }
 0x41a   :  { %v2329_v9 = vpop.permute.xlu0 %2328 }
 0x41b   :  { %v2521_v11 = vsel %vm270_vm2, %v2489_v55, %v2329_v9 }
 0x41c   :  { %v2553_v8 = vsel %vm1176_vm3, %v2521_v11, %v2361_v17 }
 0x41e   :  { %v2409_v1 = vpop.permute.xlu1 %2408  ;;  %v2645_v63 = vpop.permute.xlu2 %2644 }
 0x41f   :  { %v2586_v38 = vsel %vm2558_vm11, %v2553_v8, %v2409_v1 }
 0x420   :  { %2689 = vrot.lane.b32.xlu0 %v2586_v38, %s4185_s23 }
 0x422   :  { %v2405_v52 = vpop.permute.xlu0 %2404 }
 0x423   :  { %v2582_v27 = vsel %vm2558_vm11, %v2549_v25, %v2405_v52 }
 0x424   :  { %2687 = vrot.lane.b32.xlu1 %v2582_v27, %s4185_s23  ;;  %v2663_v60 = vsel %vm1176_vm3, %v2582_v27, %v2645_v63 }
 0x425   :  { %v2760_v26 = vunpack.c.l.b16 %v2663_v60 }
 0x426   :  { %v2676_v6 = vpop.permute.xlu1 %2675  ;;  %v2678_v13 = vpop.permute.xlu2 %2677 }
 0x427   :  { %v2778_v5 = vpack.c.b16 %v2760_v26, %v2759_v24 }
 0x42c   :  { %2705 = vrot.lane.b32.xlu1 %v5848_v3, %s4179_s12 }
 0x42e   :  { %v2694_v51 = vpop.permute.xlu1 %2693 }
 0x42f   :  { %v2715_v15 = vsel %vm1176_vm3, %v2678_v13, %v2694_v51 }
 0x430   :  { %v2764_v16 = vunpack.c.l.b16 %v2715_v15  ;;  %v2910_v27 = vpop.f32.mrf.mxu2 }
 0x433   :  { %v2647_v40 = vpop.permute.xlu0 %2646  ;;  %v2680_v19 = vpop.permute.xlu2 %2679 }
 0x434   :  { %v2665_v0 = vsel %vm1176_vm3, %v2586_v38, %v2647_v40 }
 0x435   :  { %v2761_v48 = vunpack.c.l.b16 %v2665_v0 }
 0x436   :  { %v2696_v50 = vpop.permute.xlu1 %2695 }
 0x437   :  { %v2718_v54 = vsel %vm1176_vm3, %v2680_v19, %v2696_v50  ;;  %v2779_v31 = vpack.c.b16 %v2761_v48, %v2760_v26 }
 0x438   :  { %v2765_v3 = vunpack.c.l.b16 %v2718_v54  ;;  %v2912_v45 = vpop.f32.mrf.mxu2 }
 0x439   :  { %2924 = vmatmul.bf16.gmra.mxu2 %v2779_v31 }
 0x43a   :  { %v6002_v47 = vpack.c.b16 %v2765_v3, %v2764_v16 }
 0x43b   :  { %v2692_v56 = vpop.permute.xlu0 %2691  ;;  %v2698_v46 = vpop.permute.xlu2 %2697 }
 0x43c   :  { %v2712_v33 = vsel %vm1176_vm3, %v2676_v6, %v2692_v56 }
 0x43d   :  { %v2763_v24 = vunpack.c.l.b16 %v2712_v33  ;;  %v6445_v33 = vld [vmem:[#allocation2_spill] sm:$0xff] }
 0x43e   :  { %v2253_v18 = vpop.permute.xlu1 %2252 }
 0x43f   :  { %v2781_v29 = vpack.c.b16 %v2764_v16, %v2763_v24 }
 0x443   :  { %v2333_v39 = vpop.permute.xlu2 %2332 }
 0x446   :  { %v2413_v12 = vpop.permute.xlu1 %2412 }
 0x449   :  { %2929 = vmatmul.bf16.gmra.mxu2 %v2781_v29 }
 0x44b   :  { %v2649_v11 = vpop.permute.xlu2 %2648 }
 0x44e   :  { %v2700_v22 = vpop.permute.xlu1 %2699 }
 0x452   :  { %v2682_v23 = vpop.permute.xlu0 %2681 }
 0x453   :  { %v2721_v28 = vsel %vm1176_vm3, %v2682_v23, %v2698_v46  ;;  %v6040_v23 = vld [vmem:[%s6410_s2 + $0x1] ss:$0 sm:$0xff] }
 0x454   :  { %v2766_v62 = vunpack.c.l.b16 %v2721_v28  ;;  %v2911_v49 = vadd.f32 %v6040_v23, %v2910_v27  ;;  %v2913_v61 = vadd.f32 %v6040_v23, %v2912_v45 }
 0x456   :  { %v2783_v35 = vpack.c.b16 %v2766_v62, %v2765_v3 }
 0x459   :  { %2934 = vmatmul.bf16.gmra.mxu2 %v2783_v35 }
 0x45a   :  { %v2173_v44 = vpop.permute.xlu0 %2172  ;;  %v2686_v38 = vpop.permute.xlu2 %2685 }
 0x45b   :  { %v2461_v21 = vsel %vm188_vm0, %v1926_v14, %v2173_v44 }
 0x45c   :  { %v2493_v36 = vsel %vm237_vm1, %v2461_v21, %v2253_v18 }
 0x45d   :  { %v2525_v41 = vsel %vm270_vm2, %v2493_v36, %v2333_v39 }
 0x462   :  { %v2365_v17 = vpop.permute.xlu0 %2364  ;;  %v2704_v51 = vpop.permute.xlu2 %2703 }
 0x463   :  { %v2557_v55 = vsel %vm1176_vm3, %v2525_v41, %v2365_v17 }
 0x464   :  { %v2590_v9 = vsel %vm2558_vm11, %v2557_v55, %v2413_v12 }
 0x465   :  { %2708 = vrot.lane.b32.xlu2 %v2590_v9, %s4185_s23 }
 0x468   :  { %v2915_v13 = vpop.f32.mrf.mxu2 }
 0x469   :  { %2958 = vmatmul.bf16.vlgmr.msrb.gmra.mxu2 %v5909_v43  ;;  %v2667_v43 = vsel %vm1176_vm3, %v2590_v9, %v2649_v11  ;;  %v2916_v21 = vadd.f32 %v6040_v23, %v2915_v13 }
 0x46a   :  { %v2762_v60 = vunpack.c.l.b16 %v2667_v43 }
 0x46b   :  { %v2684_v10 = vpop.permute.xlu0 %2683 }
 0x46c   :  { %v2724_v2 = vsel %vm1176_vm3, %v2684_v10, %v2700_v22  ;;  %v2780_v6 = vpack.c.b16 %v2762_v60, %v2761_v48 }
 0x46d   :  { %v2767_v1 = vunpack.c.l.b16 %v2724_v2 }
 0x46f   :  { %v2784_v8 = vpack.c.b16 %v2767_v1, %v2766_v62 }
 0x473   :  { %v2702_v7 = vpop.permute.xlu0 %2701 }
 0x474   :  { %v2727_v25 = vsel %vm1176_vm3, %v2686_v38, %v2702_v7 }
 0x475   :  { %v2768_v52 = vunpack.c.l.b16 %v2727_v25 }
 0x477   :  { %v2785_v63 = vpack.c.b16 %v2768_v52, %v2767_v1 }
 0x479   :  { %2939 = vmatmul.bf16.vlgmr.msrb.gmra.mxu3 %v2785_v63  ;;  %2963 = vmatmul.bf16.gmra.mxu2 %v5955_v59  ;;  %v2917_v59 = vpop.f32.mrf.mxu2 }
 0x47a   :  { %v2918_v11 = vadd.f32 %v6040_v23, %v2917_v59 }
 0x489   :  { %2968 = vmatmul.bf16.gmra.mxu2 %v2778_v5 }
 0x492   :  { %v2690_v40 = vpop.permute.xlu0 %2689 }
 0x493   :  { %v2920_v5 = vpop.f32.mrf.mxu2 }
 0x496   :  { %v2688_v26 = vpop.permute.xlu1 %2687 }
 0x497   :  { %v2730_v53 = vsel %vm1176_vm3, %v2688_v26, %v2704_v51 }
 0x498   :  { %v2769_v19 = vunpack.c.l.b16 %v2730_v53 }
 0x499   :  { %2973 = vmatmul.bf16.gmra.mxu2 %v2780_v6 }
 0x49a   :  { %v2786_v3 = vpack.c.b16 %v2769_v19, %v2768_v52  ;;  %v2921_v52 = vadd.f32 %v6040_v23, %v2920_v5 }
 0x49b   :  { %v2922_v31 = vpop.f32.mrf.mxu2 }
 0x49e   :  { %v2706_v0 = vpop.permute.xlu1 %2705 }
 0x49f   :  { %v2733_v15 = vsel %vm1176_vm3, %v2690_v40, %v2706_v0 }
 0x4a0   :  { %v2770_v50 = vunpack.c.l.b16 %v2733_v15  ;;  %v2923_v15 = vadd.f32 %v6040_v23, %v2922_v31 }
 0x4a2   :  { %v2787_v54 = vpack.c.b16 %v2770_v50, %v2769_v19 }
 0x4a4   :  { %2944 = vmatmul.bf16.gmra.mxu3 %v2787_v54 }
 0x4a9   :  { %2978 = vmatmul.bf16.gmra.mxu2 %v6002_v47 }
 0x4b9   :  { %2983 = vmatmul.bf16.gmra.mxu2 %v2784_v8 }
 0x4bc   :  { %v2925_v48 = vpop.f32.mrf.mxu2 }
 0x4bd   :  { %v2926_v26 = vadd.f32 %v6040_v23, %v2925_v48 }
 0x4bf   :  { %v2709_v56 = vpop.permute.xlu2 %2708 }
 0x4c0   :  { %v2735_v24 = vsel %vm1176_vm3, %v2709_v56, %v6445_v33 }
 0x4c1   :  { %v2771_v29 = vunpack.c.l.b16 %v2735_v24 }
 0x4c3   :  { %v2788_v37 = vpack.c.b16 %v2771_v29, %v2770_v50 }
 0x4c4   :  { %v2927_v16 = vpop.f32.mrf.mxu2 }
 0x4c5   :  { %v2928_v51 = vadd.f32 %v6040_v23, %v2927_v16 }
 0x4c9   :  { %2988 = vmatmul.bf16.gmra.mxu2 %v2786_v3 }
 0x4cc   :  { %v6029_v30 = vpop.f32.mrf.mxu2 }
 0x4d4   :  { %v2932_v20 = vpop.f32.mrf.mxu2 }
 0x4d5   :  { %v2933_v50 = vadd.f32 %v6040_v23, %v2932_v20 }
 0x4d9   :  { %2993 = vmatmul.bf16.gmra.mxu2 %v2788_v37 }
 0x4dc   :  { %v6033_v46 = vpop.f32.mrf.mxu2 }
 0x4e4   :  { %v6035_v47 = vpop.f32.mrf.mxu2 }
 0x4ec   :  { %v2959_v28 = vpop.f32.mrf.mxu2 }
 0x4ed   :  { %v2960_v62 = vadd.f32 %v2959_v28, %v2911_v49 }
 0x4ef   :  { %v3015_v24 = vmul.f32 0.2, %v2960_v62  ;;  %vm2999_vm12 = vcmp.ge.f32.partialorder %v2960_v62, 0.0 }
 0x4f1   :  { %v3031_v31 = vsel %vm2999_vm12, %v2960_v62, %v3015_v24 }
 0x4f4   :  { %v2961_v35 = vpop.f32.mrf.mxu2 }
 0x4f5   :  { %v2962_v18 = vadd.f32 %v2961_v35, %v2913_v61  ;;  %v3047_v61 = vpack.c.bf16 %v3031_v31, %v3031_v31  ;;  %v2938_v35 = vadd.f32 %v6040_v23, %v6035_v47  ;;  %v2931_v47 = vadd.f32 %v6040_v23, %v6029_v30 }
 0x4f7   :  { %vm3000_vm0 = vcmp.ge.f32.partialorder %v2962_v18, 0.0  ;;  %v3016_v32 = vmul.f32 0.2, %v2962_v18 }
 0x4f9   :  { %v3032_v44 = vsel %vm3000_vm0, %v2962_v18, %v3016_v32 }
 0x4fa   :  { %v3048_v14 = vpack.c.bf16 %v3032_v44, %v3032_v44 }
 0x4fc   :  { %v3176_v36 = vunpack.c.l.b16 %v3048_v14  ;;  %v2964_v39 = vpop.f32.mrf.mxu2  ;;  %v2940_v18 = vpop.f32.mrf.mxu3 }
 0x4fd   :  { %v6045_v12 = vadd.f32 %v2964_v39, %v2916_v21  ;;  %v3175_v39 = vunpack.c.l.b16 %v3047_v61 }
 0x4fe   :  { %v3184_v17 = vpack.c.b16 %v3176_v36, %v3176_v36 }
 0x4ff   :  { %v3017_v32 = vmul.f32 0.2, %v6045_v12  ;;  %vm3001_vm4 = vcmp.ge.f32.partialorder %v6045_v12, 0.0 }
 0x500   :  { %3273 = vrot.lane.b32.xlu0 %v3184_v17, %s4179_s12  ;;  %v3201_v41 = vshll.u32 %v3184_v17, 16  ;;  %v3199_v55 = vshrl.u32 %v3184_v17, 16 }
 0x502   :  { %v3203_v9 = vrot.slane %v3201_v41, 1  ;;  %v3033_v41 = vsel %vm3001_vm4, %v6045_v12, %v3017_v32 }
 0x504   :  { %v2966_v22 = vpop.f32.mrf.mxu2  ;;  %v3204_v10 = vor.u32 %v3203_v9, %v3199_v55 }
 0x505   :  { %v2967_v2 = vadd.f32 %v2966_v22, %v2918_v11  ;;  %v6080_v22 = vpack.c.b16 %v3175_v39, %v3175_v39 }
 0x506   :  { %v3256_v1 = vsel %vm5215_vm15, %v3204_v10, 0 }
 0x507   :  { %vm3002_vm2 = vcmp.ge.f32.partialorder %v2967_v2, 0.0  ;;  %v3018_v8 = vmul.f32 0.2, %v2967_v2  ;;  %v3264_v38 = vsel %vm5226_vm6, 0, %v3256_v1 }
 0x508   :  { %3313 = vrot.lane.b32.xlu2 %v3264_v38, %s4185_s23 }
 0x509   :  { %v3034_v7 = vsel %vm3002_vm2, %v2967_v2, %v3018_v8  ;;  %v3049_v2 = vpack.c.bf16 %v3033_v41, %v3033_v41 }
 0x50a   :  { %v3050_v25 = vpack.c.bf16 %v3034_v7, %v3034_v7 }
 0x50c   :  { %v3178_v63 = vunpack.c.l.b16 %v3050_v25  ;;  %v2969_v27 = vpop.f32.mrf.mxu2 }
 0x50d   :  { %v6055_v45 = vadd.f32 %v2969_v27, %v2921_v52  ;;  %v2942_v52 = vpop.f32.mrf.mxu3  ;;  %v3194_v27 = vshll.u32 %v6080_v22, 16 }
 0x50e   :  { %v3186_v43 = vpack.c.b16 %v3178_v63, %v3178_v63 }
 0x50f   :  { %v3019_v12 = vmul.f32 0.2, %v6055_v45  ;;  %vm3003_vm7 = vcmp.ge.f32.partialorder %v6055_v45, 0.0 }
 0x510   :  { %3277 = vrot.lane.b32.xlu0 %v3186_v43, %s4179_s12  ;;  %v3215_v20 = vshll.u32 %v3186_v43, 16  ;;  %v3213_v62 = vshrl.u32 %v3186_v43, 16  ;;  %v3177_v43 = vunpack.c.l.b16 %v3049_v2 }
 0x512   :  { %v3217_v21 = vrot.slane %v3215_v20, 1 }
 0x514   :  { %v2971_v60 = vpop.f32.mrf.mxu2  ;;  %v3218_v55 = vor.u32 %v3217_v21, %v3213_v62 }
 0x515   :  { %v2972_v19 = vadd.f32 %v2971_v60, %v2923_v15  ;;  %v2943_v15 = vadd.f32 %v6040_v23, %v2942_v52 }
 0x516   :  { %v3258_v7 = vsel %vm5215_vm15, %v3218_v55, 0 }
 0x517   :  { %v3020_v54 = vmul.f32 0.2, %v2972_v19  ;;  %vm3004_vm11 = vcmp.ge.f32.partialorder %v2972_v19, 0.0 }
 0x519   :  { %v3036_v3 = vsel %vm3004_vm11, %v2972_v19, %v3020_v54 }
 0x51a   :  { %v3052_v16 = vpack.c.bf16 %v3036_v3, %v3036_v3 }
 0x51c   :  { %v2974_v6 = vpop.f32.mrf.mxu2  ;;  %v3180_v28 = vunpack.c.l.b16 %v3052_v16 }
 0x51d   :  { %v6059_v13 = vadd.f32 %v2974_v6, %v2926_v26  ;;  %v3266_v26 = vsel %vm5226_vm6, 0, %v3258_v7 }
 0x51e   :  { %v3188_v44 = vpack.c.b16 %v3180_v28, %v3180_v28  ;;  %v2941_v28 = vadd.f32 %v6040_v23, %v2940_v18 }
 0x51f   :  { %vm3005_vm9 = vcmp.ge.f32.partialorder %v6059_v13, 0.0 }
 0x520   :  { %v3229_v9 = vshll.u32 %v3188_v44, 16  ;;  %v3227_v30 = vshrl.u32 %v3188_v44, 16 }
 0x522   :  { %v3231_v25 = vrot.slane %v3229_v9, 1 }
 0x524   :  { %v2976_v53 = vpop.f32.mrf.mxu2  ;;  %v3232_v6 = vor.u32 %v3231_v25, %v3227_v30 }
 0x525   :  { %v6062_v40 = vadd.f32 %v2976_v53, %v2928_v51  ;;  %v3035_v51 = vsel %vm3003_vm7, %v6055_v45, %v3019_v12  ;;  %v3196_v53 = vrot.slane %v3194_v27, 1 }
 0x526   :  { %v3260_v54 = vsel %vm5215_vm15, %v3232_v6, 0 }
 0x527   :  { %v3268_v16 = vsel %vm5226_vm6, 0, %v3260_v54  ;;  %vm3006_vm2 = vcmp.ge.f32.partialorder %v6062_v40, 0.0 }
 0x52c   :  { %v2979_v0 = vpop.f32.mrf.mxu2 }
 0x52d   :  { %v2980_v1 = vadd.f32 %v2979_v0, %v2931_v47  ;;  %v3185_v0 = vpack.c.b16 %v3177_v43, %v3177_v43 }
 0x52f   :  { %v3023_v60 = vmul.f32 0.2, %v2980_v1  ;;  %vm3007_vm8 = vcmp.ge.f32.partialorder %v2980_v1, 0.0  ;;  %v3206_v55 = vshrl.u32 %v3185_v0, 16 }
 0x531   :  { %v3039_v19 = vsel %vm3007_vm8, %v2980_v1, %v3023_v60 }
 0x532   :  { %v3055_v45 = vpack.c.bf16 %v3039_v19, %v3039_v19 }
 0x534   :  { %v2981_v59 = vpop.f32.mrf.mxu2  ;;  %v3071_v32 = vunpack.c.l.b16 %v3055_v45  ;;  %v4097_v45 = vld [vmem:[%s6409_s1 + $0xd0] sm:$0xff] }
 0x535   :  { %v2982_v5 = vadd.f32 %v2981_v59, %v2933_v50  ;;  %v3051_v50 = vpack.c.bf16 %v3035_v51, %v3035_v51 }
 0x537   :  { %vm3008_vm10 = vcmp.ge.f32.partialorder %v2982_v5, 0.0  ;;  %v3024_v48 = vmul.f32 0.2, %v2982_v5  ;;  %v3179_v31 = vunpack.c.l.b16 %v3051_v50 }
 0x539   :  { %v3040_v56 = vsel %vm3008_vm10, %v2982_v5, %v3024_v48  ;;  %v3192_v5 = vshrl.u32 %v6080_v22, 16  ;;  %v3021_v48 = vmul.f32 0.2, %v6059_v13  ;;  %v6113_v39 = vpack.c.b16 %v3179_v31, %v3179_v31 }
 0x53a   :  { %v3056_v33 = vpack.c.bf16 %v3040_v56, %v3040_v56  ;;  %v6101_v56 = vpop.f32.mrf.mxu3 }
 0x53b   :  { %v3037_v20 = vsel %vm3005_vm9, %v6059_v13, %v3021_v48  ;;  %v3022_v13 = vmul.f32 0.2, %v6062_v40  ;;  %v3220_v51 = vshrl.u32 %v6113_v39, 16  ;;  %v2946_v54 = vadd.f32 %v6040_v23, %v6101_v56  ;;  %v4096_v56 = vld [vmem:[%s6409_s1 + $0xc8] sm:$0xff] }
 0x53c   :  { %v3072_v29 = vunpack.c.l.b16 %v3056_v33  ;;  %v6066_v37 = vpop.f32.mrf.mxu2  ;;  %v3197_v33 = vor.u32 %v3196_v53, %v3192_v5  ;;  %v3053_v62 = vpack.c.bf16 %v3037_v20, %v3037_v20 }
 0x53e   :  { %v6068_v49 = vpack.c.b16 %v3072_v29, %v3072_v29  ;;  %v3208_v29 = vshll.u32 %v3185_v0, 16  ;;  %v3255_v21 = vsel %vm5215_vm15, %v3197_v33, 0  ;;  %v3181_v2 = vunpack.c.l.b16 %v3053_v62 }
 0x540   :  { %3289 = vrot.lane.b32.xlu1 %v6068_v49, %s4183_s0  ;;  %v3189_v52 = vpack.c.b16 %v3181_v2, %v3181_v2 }
 0x542   :  { %v2947_v1 = vpop.f32.mrf.mxu3  ;;  %v3236_v50 = vshll.u32 %v3189_v52, 16 }
 0x543   :  { %v2948_v7 = vadd.f32 %v6040_v23, %v2947_v1 }
 0x544   :  { %v2986_v14 = vpop.f32.mrf.mxu2 }
 0x545   :  { %v2987_v36 = vadd.f32 %v2986_v14, %v2938_v35  ;;  %v2936_v35 = vadd.f32 %v6040_v23, %v6033_v46  ;;  %v6118_v46 = vpack.c.b16 %v3071_v32, %v3071_v32 }
 0x547   :  { %vm3010_vm5 = vcmp.ge.f32.partialorder %v2987_v36, 0.0  ;;  %v3026_v17 = vmul.f32 0.2, %v2987_v36 }
 0x548   :  { %3281 = vrot.lane.b32.xlu1 %v3188_v44, %s4179_s12 }
 0x549   :  { %v3042_v11 = vsel %vm3010_vm5, %v2987_v36, %v3026_v17  ;;  %v3210_v36 = vrot.slane %v3208_v29, 1  ;;  %v2985_v17 = vadd.f32 %v6066_v37, %v2936_v35  ;;  %v3222_v37 = vshll.u32 %v6113_v39, 16 }
 0x54a   :  { %v3058_v10 = vpack.c.bf16 %v3042_v11, %v3042_v11  ;;  %v3263_v11 = vsel %vm5226_vm6, 0, %v3255_v21 }
 0x54b   :  { %vm3009_vm10 = vcmp.ge.f32.partialorder %v2985_v17, 0.0  ;;  %v3224_v60 = vrot.slane %v3222_v37, 1 }
 0x54c   :  { %v3074_v8 = vunpack.c.l.b16 %v3058_v10  ;;  %v2989_v38 = vpop.f32.mrf.mxu2  ;;  %v3211_v10 = vor.u32 %v3210_v36, %v3206_v55  ;;  %v4094_v55 = vld [vmem:[%s6409_s1 + $0xb8] sm:$0xff] }
 0x54d   :  { %v2990_v14 = vadd.f32 %v2989_v38, %v2941_v28  ;;  %v3038_v38 = vsel %vm3006_vm2, %v6062_v40, %v3022_v13  ;;  %v3225_v19 = vor.u32 %v3224_v60, %v3220_v51  ;;  %v3234_v28 = vshrl.u32 %v3189_v52, 16 }
 0x54e   :  { %v6086_v63 = vpack.c.b16 %v3074_v8, %v3074_v8  ;;  %v3025_v8 = vmul.f32 0.2, %v2985_v17  ;;  %v3257_v12 = vsel %vm5215_vm15, %v3211_v10, 0  ;;  %v3054_v30 = vpack.c.bf16 %v3038_v38, %v3038_v38  ;;  %v4106_v38 = vld [vmem:[%s6409_s1 + $0x118] sm:$0xff] }
 0x54f   :  { %v3027_v47 = vmul.f32 0.2, %v2990_v14  ;;  %vm3011_vm11 = vcmp.ge.f32.partialorder %v2990_v14, 0.0  ;;  %v6219_v51 = vunpack.c.l.b16 %v6442_v58  ;;  %v4102_v58 = vld [vmem:[%s6409_s1 + $0xf8] sm:$0xff] }
 0x550   :  { %3293 = vrot.lane.b32.xlu2 %v6086_v63, %s4183_s0  ;;  %3317 = vrot.lane.b32.xlu1 %v3266_v26, %s4185_s23  ;;  %v3041_v27 = vsel %vm3009_vm10, %v2985_v17, %v3025_v8  ;;  %v3095_v8 = vshrl.u32 %v6068_v49, 16 }
 0x551   :  { %v3043_v25 = vsel %vm3011_vm11, %v2990_v14, %v3027_v47  ;;  %v3057_v40 = vpack.c.bf16 %v3041_v27, %v3041_v27  ;;  %v4095_v14 = vld [vmem:[%s6409_s1 + $0xc0] sm:$0xff] }
 0x552   :  { %v3059_v6 = vpack.c.bf16 %v3043_v25, %v3043_v25  ;;  %v3097_v37 = vrot.slane %v3095_v8, 7 }
 0x553   :  { %v3073_v48 = vunpack.c.l.b16 %v3057_v40 }
 0x554   :  { %v2991_v59 = vpop.f32.mrf.mxu2  ;;  %v3075_v5 = vunpack.c.l.b16 %v3059_v6 }
 0x555   :  { %v2992_v3 = vadd.f32 %v2991_v59, %v2943_v15  ;;  %v3182_v15 = vunpack.c.l.b16 %v3054_v30  ;;  %v4098_v59 = vld [vmem:[%s6409_s1 + $0xd8] sm:$0xff]  ;;  %v6153_v20 = vpack.c.b16 %v3073_v48, %v3073_v48 }
 0x556   :  { %3675 = vmatpush.bf16.msra.mxu3 %v4098_v59  ;;  %v6151_v29 = vpack.c.b16 %v3075_v5, %v3075_v5 }
 0x557   :  { %vm3012_vm0 = vcmp.ge.f32.partialorder %v2992_v3, 0.0  ;;  %v3028_v24 = vmul.f32 0.2, %v2992_v3  ;;  %v3190_v33 = vpack.c.b16 %v3182_v15, %v3182_v15 }
 0x558   :  { %3321 = vrot.lane.b32.xlu2 %v3268_v16, %s4185_s23  ;;  %3275 = vrot.lane.b32.xlu1 %v3185_v0, %s4179_s12  ;;  %v3265_v0 = vsel %vm5226_vm6, 0, %v3257_v12  ;;  %v3238_v16 = vrot.slane %v3236_v50, 1  ;;  %v4105_v12 = vld [vmem:[%s6409_s1 + $0x110] sm:$0xff]  ;;  %v3112_v50 = vshll.u32 %v6086_v63, 16 }
 0x559   :  { %v3044_v61 = vsel %vm3012_vm0, %v2992_v3, %v3028_v24  ;;  %v3243_v32 = vshll.u32 %v3190_v33, 16 }
 0x55a   :  { %v3060_v44 = vpack.c.bf16 %v3044_v61, %v3044_v61  ;;  %3676 = vmatpush.bf16.msra.mxu3 %v4097_v45  ;;  %v3239_v35 = vor.u32 %v3238_v16, %v3234_v28 }
 0x55b   :  { %v3245_v62 = vrot.slane %v3243_v32, 1 }
 0x55c   :  { %v3076_v41 = vunpack.c.l.b16 %v3060_v44  ;;  %v2994_v18 = vpop.f32.mrf.mxu2  ;;  %v3261_v36 = vsel %vm5215_vm15, %v3239_v35, 0 }
 0x55d   :  { %v2995_v24 = vadd.f32 %v2994_v18, %v2946_v54  ;;  %v3269_v13 = vsel %vm5226_vm6, 0, %v3261_v36 }
 0x55e   :  { %v6120_v9 = vpack.c.b16 %v3076_v41, %v3076_v41  ;;  %3677 = vmatpush.bf16.msra.mxu3 %v4096_v56  ;;  %v3241_v41 = vshrl.u32 %v3190_v33, 16 }
 0x55f   :  { %v3029_v61 = vmul.f32 0.2, %v2995_v24  ;;  %vm3013_vm4 = vcmp.ge.f32.partialorder %v2995_v24, 0.0 }
 0x560   :  { %3311 = vrot.lane.b32.xlu1 %v3263_v11, %s4185_s23  ;;  %3287 = vrot.lane.b32.xlu2 %v6118_v46, %s4183_s0  ;;  %v3246_v47 = vor.u32 %v3245_v62, %v3241_v41  ;;  %v3123_v28 = vshrl.u32 %v6120_v9, 16  ;;  %v3088_v62 = vshrl.u32 %v6118_v46, 16  ;;  %v4113_v41 = vld [vmem:[%s6409_s1 + $0x150] sm:$0xff] }
 0x561   :  { %3297 = vrot.lane.b32.xlu0 %v6120_v9, %s4183_s0  ;;  %v3045_v21 = vsel %vm3013_vm4, %v2995_v24, %v3029_v61  ;;  %v4099_v61 = vld [vmem:[%s6409_s1 + $0xe0] sm:$0xff] }
 0x562   :  { %v3061_v18 = vpack.c.bf16 %v3045_v21, %v3045_v21  ;;  %3678 = vmatpush.bf16.msra.mxu3 %v4095_v14  ;;  %v3262_v10 = vsel %vm5215_vm15, %v3246_v47, 0  ;;  %v3314_v6 = vpop.permute.xlu2 %3313  ;;  %v3125_v32 = vrot.slane %v3123_v28, 7  ;;  %v4114_v14 = vld [vmem:[%s6409_s1 + $0x158] sm:$0xff] }
 0x563   :  { %v3270_v1 = vsel %vm5226_vm6, 0, %v3262_v10  ;;  %v3102_v10 = vshrl.u32 %v6153_v20, 16 }
 0x564   :  { %v2996_v43 = vpop.f32.mrf.mxu2  ;;  %v3077_v11 = vunpack.c.l.b16 %v3061_v18 }
 0x565   :  { %v2997_v26 = vadd.f32 %v2996_v43, %v2948_v7  ;;  %v3098_v7 = vshll.u32 %v6068_v49, 16  ;;  %v3109_v49 = vshrl.u32 %v6086_v63, 16  ;;  %v4100_v63 = vld [vmem:[%s6409_s1 + $0xe8] sm:$0xff] }
 0x566   :  { %3679 = vmatpush.bf16.msra.mxu3 %v4094_v55  ;;  %v6184_v2 = vpack.c.b16 %v3077_v11, %v3077_v11  ;;  %v3090_v55 = vrot.slane %v3088_v62, 7 }
 0x567   :  { %v3030_v53 = vmul.f32 0.2, %v2997_v26  ;;  %vm3014_vm12 = vcmp.ge.f32.partialorder %v2997_v26, 0.0  ;;  %v3100_v25 = vor.u32 %v3098_v7, %v3097_v37  ;;  %v3111_v15 = vrot.slane %v3109_v49, 7 }
 0x568   :  { %3315 = vrot.lane.b32.xlu2 %v3265_v0, %s4185_s23  ;;  %3283 = vrot.lane.b32.xlu1 %v3189_v52, %s4179_s12  ;;  %v4104_v52 = vld [vmem:[%s6409_s1 + $0x108] sm:$0xff]  ;;  %v4103_v0 = vld [vmem:[%s6409_s1 + $0x100] sm:$0xff] }
 0x569   :  { %3271 = vrot.lane.b32.xlu0 %v6080_v22, %s4179_s12  ;;  %v3046_v3 = vsel %vm3014_vm12, %v2997_v26, %v3030_v53  ;;  %v3259_v22 = vsel %vm5215_vm15, %v3225_v19, 0  ;;  %v3152_v30 = vsel %vm5375_vm13, 0, %v3100_v25  ;;  %vm3367_vm15 = vcmask 785408  }
 0x56a   :  { %v3062_v31 = vpack.c.bf16 %v3046_v3, %v3046_v3  ;;  %v3267_v23 = vsel %vm5226_vm6, 0, %v3259_v22  ;;  %v3160_v43 = vsel %vm5385_vm14, 0, %v3152_v30  ;;  %v3114_v54 = vor.u32 %v3112_v50, %v3111_v15  ;;  %v4101_v3 = vld [vmem:[%s6409_s1 + $0xf0] sm:$0xff] }
 0x56b   :  { %v3104_v25 = vrot.slane %v3102_v10, 7 }
 0x56c   :  { %v3078_v44 = vunpack.c.l.b16 %v3062_v31  ;;  %v3154_v48 = vsel %vm5375_vm13, 0, %v3114_v54 }
 0x56d   :  { %v3162_v24 = vsel %vm5385_vm14, 0, %v3154_v48 }
 0x56e   :  { %v6170_v17 = vpack.c.b16 %v3078_v44, %v3078_v44  ;;  %v3126_v44 = vshll.u32 %v6120_v9, 16  ;;  %v4112_v9 = vld [vmem:[%s6409_s1 + $0x148] sm:$0xff] }
 0x570   :  { %3319 = vrot.lane.b32.xlu1 %v3267_v23, %s4185_s23  ;;  %3295 = vrot.lane.b32.xlu2 %v6151_v29, %s4183_s0  ;;  %v3128_v36 = vor.u32 %v3126_v44, %v3125_v32  ;;  %v3137_v62 = vshrl.u32 %v6170_v17, 16 }
 0x571   :  { %3291 = vrot.lane.b32.xlu0 %v6153_v20, %s4183_s0 }
 0x572   :  { %v3274_v27 = vpop.permute.xlu0 %3273  ;;  %v3156_v18 = vsel %vm5375_vm13, 0, %v3128_v36 }
 0x573   :  { %v3332_v60 = vsel %vm237_vm1, %v3160_v43, %v3274_v27  ;;  %v3164_v47 = vsel %vm5385_vm14, 0, %v3156_v18  ;;  %v4110_v27 = vld [vmem:[%s6409_s1 + $0x138] sm:$0xff] }
 0x578   :  { %3323 = vrot.lane.b32.xlu2 %v3269_v13, %s4185_s23  ;;  %3301 = vrot.lane.b32.xlu1 %v6170_v17, %s4183_s0 }
 0x579   :  { %3279 = vrot.lane.b32.xlu0 %v6113_v39, %s4179_s12  ;;  %v4093_v39 = vld [vmem:[%s6409_s1 + $0xb0] sm:$0xff] }
 0x57a   :  { %3680 = vmatpush.bf16.msra.mxu3 %v4093_v39  ;;  %v3091_v39 = vshll.u32 %v6118_v46, 16  ;;  %v3105_v46 = vshll.u32 %v6153_v20, 16  ;;  %v4109_v20 = vld [vmem:[%s6409_s1 + $0x130] sm:$0xff] }
 0x57c   :  { %v3107_v43 = vor.u32 %v3105_v46, %v3104_v25 }
 0x57e   :  { %3681 = vmatpush.bf16.msra.mxu3 %v4092_v34 }
 0x580   :  { %3325 = vrot.lane.b32.xlu2 %v3270_v1, %s4185_s23 }
 0x581   :  { %3299 = vrot.lane.b32.xlu0 %v6184_v2, %s4183_s0 }
 0x582   :  { %3682 = vmatpush.bf16.msra.mxu3 %v4091_v57  ;;  %v3278_v45 = vpop.permute.xlu0 %3277  ;;  %v4111_v57 = vld [vmem:[%s6409_s1 + $0x140] sm:$0xff] }
 0x583   :  { %v3338_v22 = vsel %vm237_vm1, %v3162_v24, %v3278_v45  ;;  %v4107_v45 = vld [vmem:[%s6409_s1 + $0x120] sm:$0xff] }
 0x586   :  { %3694 = vmatpush.bf16.msrb.mxu3 %v4106_v38  ;;  %v3093_v38 = vor.u32 %v3091_v39, %v3090_v55  ;;  %v4120_v55 = vld [vmem:[%s6409_s1 + $0x188] sm:$0xff] }
 0x588   :  { %v3151_v30 = vsel %vm5375_vm13, 0, %v3093_v38 }
 0x589   :  { %3285 = vrot.lane.b32.xlu0 %v3190_v33, %s4179_s12 }
 0x58a   :  { %3695 = vmatpush.bf16.msrb.mxu3 %v4105_v12 }
 0x58e   :  { %3696 = vmatpush.bf16.msrb.mxu3 %v4104_v52 }
 0x592   :  { %3697 = vmatpush.bf16.msrb.mxu3 %v4103_v0  ;;  %v4108_v0 = vld [vmem:[%s6409_s1 + $0x128] sm:$0xff] }
 0x596   :  { %3698 = vmatpush.bf16.msrb.mxu3 %v4102_v58 }
 0x59a   :  { %3699 = vmatpush.bf16.msrb.mxu3 %v4101_v3 }
 0x59e   :  { %3700 = vmatpush.bf16.msrb.mxu3 %v4100_v63 }
 0x5a2   :  { %3701 = vmatpush.bf16.msrb.mxu3 %v4099_v61  ;;  %v4122_v61 = vld [vmem:[%s6409_s1 + $0x198] sm:$0xff] }
 0x5aa   :  { %v3294_v33 = vpop.permute.xlu2 %3293 }
 0x5ab   :  { %v3358_v16 = vsel %vm1176_vm3, %v3338_v22, %v3294_v33 }
 0x5b2   :  { %v3290_v26 = vpop.permute.xlu1 %3289  ;;  %v3322_v21 = vpop.permute.xlu2 %3321 }
 0x5b3   :  { %v3354_v40 = vsel %vm1176_vm3, %v3332_v60, %v3290_v26  ;;  %v3159_v60 = vsel %vm5385_vm14, 0, %v3151_v30  ;;  %v3116_v26 = vshrl.u32 %v6151_v29, 16  ;;  %v4118_v30 = vld [vmem:[%s6409_s1 + $0x178] sm:$0xff] }
 0x5b4   :  { %v3371_v53 = vsel %vm3367_vm15, %v3354_v40, %v3314_v6 }
 0x5b5   :  { %v3459_v19 = vunpack.c.l.b16 %v3371_v53  ;;  %v3153_v53 = vsel %vm5375_vm13, 0, %v3107_v43 }
 0x5b6   :  { %v3161_v50 = vsel %vm5385_vm14, 0, %v3153_v53 }
 0x5b7   :  { %v3467_v59 = vpack.c.b16 %v3459_v19, %v6219_v51 }
 0x5b9   :  { %3683 = vmatmul.bf16.vlgmr.msra.gmra.mxu3 %v3467_v59  ;;  %v3119_v59 = vshll.u32 %v6151_v29, 16 }
 0x5ba   :  { %v3282_v5 = vpop.permute.xlu1 %3281  ;;  %3713 = vmatpush.bf16.msra.mxu3 %v4114_v14  ;;  %v3288_v8 = vpop.permute.xlu2 %3287 }
 0x5bb   :  { %v3344_v11 = vsel %vm237_vm1, %v3164_v47, %v3282_v5  ;;  %v3130_v5 = vshrl.u32 %v6184_v2, 16  ;;  %v3139_v47 = vrot.slane %v3137_v62, 7  ;;  %v6446_v62 = vld [vmem:[#allocation9_spill] sm:$0xff] }
 0x5bc   :  { %vm3771_vm6 = vcmp.lt.s32.totalorder %v6446_v62, 4  ;;  %vm3814_vm7 = vcmp.eq.s32.totalorder %v6446_v62, 0 }
 0x5be   :  { %3714 = vmatpush.bf16.msra.mxu3 %v4113_v41 }
 0x5c2   :  { %v3318_v31 = vpop.permute.xlu1 %3317  ;;  %3715 = vmatpush.bf16.msra.mxu3 %v4112_v9  ;;  %v3316_v40 = vpop.permute.xlu2 %3315 }
 0x5c3   :  { %v3375_v23 = vsel %vm3367_vm15, %v3358_v16, %v3318_v31  ;;  %v3132_v16 = vrot.slane %v3130_v5, 7 }
 0x5c4   :  { %v3461_v56 = vunpack.c.l.b16 %v3375_v23 }
 0x5c6   :  { %v6248_v35 = vpack.c.b16 %v3461_v56, %v3459_v19  ;;  %3716 = vmatpush.bf16.msra.mxu3 %v4111_v57  ;;  %v3118_v19 = vrot.slane %v3116_v26, 7 }
 0x5c8   :  { %v3121_v63 = vor.u32 %v3119_v59, %v3118_v19 }
 0x5ca   :  { %v3276_v13 = vpop.permute.xlu1 %3275  ;;  %3717 = vmatpush.bf16.msra.mxu3 %v4110_v27  ;;  %v3155_v28 = vsel %vm5375_vm13, 0, %v3121_v63  ;;  %v3296_v23 = vpop.permute.xlu2 %3295 }
 0x5cb   :  { %v3335_v54 = vsel %vm237_vm1, %v3161_v50, %v3276_v13  ;;  %v3163_v14 = vsel %vm5385_vm14, 0, %v3155_v28 }
 0x5ce   :  { %3718 = vmatpush.bf16.msra.mxu3 %v4109_v20 }
 0x5d2   :  { %v3312_v52 = vpop.permute.xlu1 %3311  ;;  %3719 = vmatpush.bf16.msra.mxu3 %v4108_v0  ;;  %v3324_v39 = vpop.permute.xlu2 %3323  ;;  %v4115_v0 = vld [vmem:[%s6409_s1 + $0x160] sm:$0xff] }
 0x5d3   :  { %v3298_v1 = vpop.permute.xlu0 %3297 }
 0x5d4   :  { %v3362_v34 = vsel %vm1176_vm3, %v3344_v11, %v3298_v1  ;;  %v3140_v1 = vshll.u32 %v6170_v17, 16 }
 0x5d5   :  { %v6273_v37 = vsel %vm3367_vm15, %v3362_v34, %v3322_v21  ;;  %v4121_v21 = vld [vmem:[%s6409_s1 + $0x190] sm:$0xff] }
 0x5d6   :  { %v3463_v7 = vunpack.c.l.b16 %v6273_v37  ;;  %3720 = vmatpush.bf16.msra.mxu3 %v4107_v45  ;;  %v3142_v25 = vor.u32 %v3140_v1, %v3139_v47  ;;  %v4160_v37 = vld [vmem:[%s6410_s2 + $0x2] ss:$0 sm:$0xff] }
 0x5d8   :  { %v3471_v12 = vpack.c.b16 %v3463_v7, %v3461_v56  ;;  %v3133_v56 = vshll.u32 %v6184_v2, 16  ;;  %v3158_v17 = vsel %vm5375_vm13, 0, %v3142_v25 }
 0x5d9   :  { %v3166_v27 = vsel %vm5385_vm14, 0, %v3158_v17  ;;  %v3765_v17 = vld [vmem:[%s6411_s3 + $0x10] sm:$0xff] }
 0x5da   :  { %3688 = vmatmul.bf16.gmra.mxu3 %v3471_v12  ;;  %v3284_v58 = vpop.permute.xlu1 %3283  ;;  %v3135_v32 = vor.u32 %v3133_v56, %v3132_v16 }
 0x5db   :  { %v3272_v49 = vpop.permute.xlu0 %3271 }
 0x5dc   :  { %v3329_v6 = vsel %vm237_vm1, %v3159_v60, %v3272_v49  ;;  %v3157_v13 = vsel %vm5375_vm13, 0, %v3135_v32  ;;  %v4117_v49 = vld [vmem:[%s6409_s1 + $0x170] sm:$0xff]  ;;  %v3763_v32 = vld [vmem:[%s6411_s3] sm:$0xff] }
 0x5dd   :  { %v3352_v15 = vsel %vm1176_vm3, %v3329_v6, %v3288_v8  ;;  %v3165_v10 = vsel %vm5385_vm14, 0, %v3157_v13  ;;  %v4119_v8 = vld [vmem:[%s6409_s1 + $0x180] sm:$0xff]  ;;  %v3326_v6 = vpop.permute.xlu2 %3325 }
 0x5de   :  { %v3369_v48 = vsel %vm3367_vm15, %v3352_v15, %v3312_v52  ;;  %v3347_v34 = vsel %vm237_vm1, %v3165_v10, %v3284_v58 }
 0x5df   :  { %v3458_v22 = vunpack.c.l.b16 %v3369_v48 }
 0x5e2   :  { %v3320_v2 = vpop.permute.xlu1 %3319 }
 0x5e3   :  { %v3292_v3 = vpop.permute.xlu0 %3291 }
 0x5e4   :  { %v3356_v33 = vsel %vm1176_vm3, %v3335_v54, %v3292_v3 }
 0x5e5   :  { %v3373_v24 = vsel %vm3367_vm15, %v3356_v33, %v3316_v40 }
 0x5e6   :  { %v3460_v29 = vunpack.c.l.b16 %v3373_v24 }
 0x5e8   :  { %v3468_v31 = vpack.c.b16 %v3460_v29, %v3458_v22 }
 0x5ea   :  { %3702 = vmatmul.bf16.vlgmr.msrb.gmra.mxu3 %v3468_v31  ;;  %v3302_v60 = vpop.permute.xlu1 %3301 }
 0x5eb   :  { %v3280_v44 = vpop.permute.xlu0 %3279  ;;  %3732 = vmatpush.bf16.msrb.mxu3 %v4122_v61 }
 0x5ec   :  { %v3341_v36 = vsel %vm237_vm1, %v3163_v14, %v3280_v44 }
 0x5ed   :  { %v3360_v41 = vsel %vm1176_vm3, %v3341_v36, %v3296_v23 }
 0x5ee   :  { %v3377_v18 = vsel %vm3367_vm15, %v3360_v41, %v3320_v2  ;;  %v3764_v41 = vld [vmem:[%s6411_s3 + $0x8] sm:$0xff] }
 0x5ef   :  { %v3462_v9 = vunpack.c.l.b16 %v3377_v18  ;;  %3733 = vmatpush.bf16.msrb.mxu3 %v4121_v21 }
 0x5f1   :  { %v3470_v11 = vpack.c.b16 %v3462_v9, %v3460_v29 }
 0x5f3   :  { %v3300_v57 = vpop.permute.xlu0 %3299  ;;  %3734 = vmatpush.bf16.msrb.mxu3 %v4120_v55 }
 0x5f4   :  { %v3364_v38 = vsel %vm1176_vm3, %v3347_v34, %v3300_v57 }
 0x5f5   :  { %v3381_v12 = vsel %vm3367_vm15, %v3364_v38, %v3324_v39 }
 0x5f6   :  { %v3464_v46 = vunpack.c.l.b16 %v3381_v12 }
 0x5f7   :  { %3735 = vmatpush.bf16.msrb.mxu3 %v4119_v8 }
 0x5f8   :  { %v3472_v52 = vpack.c.b16 %v3464_v46, %v3462_v9  ;;  %v3474_v15 = vpack.c.b16 %v6219_v51, %v3464_v46 }
 0x5fa   :  { %3707 = vmatmul.bf16.gmra.mxu3 %v3472_v52 }
 0x5fb   :  { %v3286_v43 = vpop.permute.xlu0 %3285  ;;  %3736 = vmatpush.bf16.msrb.mxu3 %v4118_v30 }
 0x5fc   :  { %v3350_v26 = vsel %vm237_vm1, %v3166_v27, %v3286_v43 }
 0x5fd   :  { %v3366_v42 = vsel %vm1176_vm3, %v3350_v26, %v3302_v60 }
 0x5fe   :  { %v3383_v20 = vsel %vm3367_vm15, %v3366_v42, %v3326_v6 }
 0x5ff   :  { %v3465_v40 = vunpack.c.l.b16 %v3383_v20  ;;  %3737 = vmatpush.bf16.msrb.mxu3 %v4117_v49 }
 0x601   :  { %v3473_v53 = vpack.c.b16 %v3465_v40, %v3463_v7 }
 0x603   :  { %3738 = vmatpush.bf16.msrb.mxu3 %v4116_v4 }
 0x607   :  { %3739 = vmatpush.bf16.msrb.mxu3 %v4115_v0 }
 0x60a   :  { %3721 = vmatmul.bf16.vlgmr.msra.gmra.mxu3 %v6248_v35 }
 0x61a   :  { %3726 = vmatmul.bf16.gmra.mxu3 %v3473_v53 }
 0x62a   :  { %3740 = vmatmul.bf16.vlgmr.msrb.gmra.mxu3 %v3470_v11 }
 0x63a   :  { %3745 = vmatmul.bf16.gmra.mxu3 %v3474_v15  ;;  %v3766_v15 = vld [vmem:[%s6411_s3 + $0x18] sm:$0xff] }
 0x63c   :  { %v3684_v19 = vpop.f32.mrf.mxu3 }
 0x63d   :  { %v3685_v7 = vadd.f32 %v4160_v37, %v3684_v19 }
 0x644   :  { %v3686_v50 = vpop.f32.mrf.mxu3 }
 0x645   :  { %v3687_v48 = vadd.f32 %v4160_v37, %v3686_v50 }
 0x65d   :  { %v3689_v59 = vpop.f32.mrf.mxu3 }
 0x65e   :  { %v3690_v35 = vadd.f32 %v4160_v37, %v3689_v59 }
 0x665   :  { %v3691_v54 = vpop.f32.mrf.mxu3 }
 0x666   :  { %v3692_v46 = vadd.f32 %v4160_v37, %v3691_v54 }
 0x66d   :  { %v3703_v58 = vpop.f32.mrf.mxu3 }
 0x66e   :  { %v3704_v5 = vadd.f32 %v3703_v58, %v3685_v7 }
 0x675   :  { %v3705_v3 = vpop.f32.mrf.mxu3 }
 0x676   :  { %v3706_v45 = vadd.f32 %v3705_v3, %v3687_v48 }
 0x67d   :  { %v3708_v33 = vpop.f32.mrf.mxu3 }
 0x67e   :  { %v3709_v63 = vadd.f32 %v3708_v33, %v3690_v35 }
 0x685   :  { %v3710_v24 = vpop.f32.mrf.mxu3 }
 0x686   :  { %v3711_v30 = vadd.f32 %v3710_v24, %v3692_v46 }
 0x68d   :  { %v3722_v51 = vpop.f32.mrf.mxu3 }
 0x68e   :  { %v3723_v31 = vadd.f32 %v3722_v51, %v3704_v5 }
 0x695   :  { %v3724_v22 = vpop.f32.mrf.mxu3 }
 0x696   :  { %v3725_v44 = vadd.f32 %v3724_v22, %v3706_v45 }
 0x69d   :  { %v3727_v29 = vpop.f32.mrf.mxu3 }
 0x69e   :  { %v3728_v47 = vadd.f32 %v3727_v29, %v3709_v63 }
 0x6a5   :  { %v3729_v16 = vpop.f32.mrf.mxu3 }
 0x6a6   :  { %v3730_v49 = vadd.f32 %v3729_v16, %v3711_v30 }
 0x6ad   :  { %v3741_v28 = vpop.f32.mrf.mxu3 }
 0x6ae   :  { %v3742_v23 = vadd.f32 %v3741_v28, %v3723_v31 }
 0x6b0   :  { %vm3751_vm1 = vcmp.ge.f32.partialorder %v3742_v23, 0.0  ;;  %v3755_v56 = vmul.f32 0.2, %v3742_v23 }
 0x6b2   :  { %v3759_v61 = vsel %vm3751_vm1, %v3742_v23, %v3755_v56  ;;  %v3820_v56 = vld [vmem:[%s6410_s2 + $0x3] sm:$0x1] }
 0x6b3   :  { %v3767_v21 = vmul.f32 %v3763_v32, %v3759_v61 }
 0x6b5   :  { %v3743_v14 = vpop.f32.mrf.mxu3  ;;  %v3794_v18 = vsel %vm3771_vm6, 0.0, %v3767_v21  ;;  %v3774_v9 = vsel %vm3771_vm6, %v3767_v21, 0.0 }
 0x6b6   :  { %v3744_v36 = vadd.f32 %v3743_v14, %v3725_v44  ;;  %v3798_v39 = vsel %vm1176_vm3, %v3794_v18, 0.0  ;;  %v3778_v8 = vsel %vm1176_vm3, %v3774_v9, 0.0 }
 0x6b8   :  { %vm3752_vm13 = vcmp.ge.f32.partialorder %v3744_v36, 0.0  ;;  %v3756_v2 = vmul.f32 0.2, %v3744_v36 }
 0x6ba   :  { %v3760_v13 = vsel %vm3752_vm13, %v3744_v36, %v3756_v2 }
 0x6bb   :  { %v3768_v55 = vmul.f32 %v3764_v41, %v3760_v13 }
 0x6bd   :  { %v3775_v11 = vsel %vm3771_vm6, %v3768_v55, 0.0  ;;  %v3795_v10 = vsel %vm3771_vm6, 0.0, %v3768_v55  ;;  %v3746_v1 = vpop.f32.mrf.mxu3 }
 0x6be   :  { %v3747_v34 = vadd.f32 %v3746_v1, %v3728_v47  ;;  %v3799_v57 = vsel %vm1176_vm3, %v3795_v10, 0.0  ;;  %v3779_v38 = vsel %vm1176_vm3, %v3775_v11, 0.0 }
 0x6bf   :  { %v3800_v25 = vadd.f32 %v3799_v57, %v3798_v39  ;;  %v3780_v12 = vadd.f32 %v3779_v38, %v3778_v8 }
 0x6c0   :  { %vm3753_vm14 = vcmp.ge.f32.partialorder %v3747_v34, 0.0  ;;  %v3757_v52 = vmul.f32 0.2, %v3747_v34 }
 0x6c2   :  { %v3761_v27 = vsel %vm3753_vm14, %v3747_v34, %v3757_v52 }
 0x6c3   :  { %v3769_v43 = vmul.f32 %v3765_v17, %v3761_v27 }
 0x6c5   :  { %v3748_v60 = vpop.f32.mrf.mxu3  ;;  %v3796_v26 = vsel %vm3771_vm6, 0.0, %v3769_v43  ;;  %v3776_v6 = vsel %vm3771_vm6, %v3769_v43, 0.0 }
 0x6c6   :  { %v3749_v42 = vadd.f32 %v3748_v60, %v3730_v49  ;;  %v3801_v20 = vsel %vm1176_vm3, %v3796_v26, 0.0  ;;  %v3781_v40 = vsel %vm1176_vm3, %v3776_v6, 0.0 }
 0x6c7   :  { %v3802_v4 = vadd.f32 %v3801_v20, %v3800_v25  ;;  %v3782_v53 = vadd.f32 %v3781_v40, %v3780_v12 }
 0x6c8   :  { %vm3754_vm5 = vcmp.ge.f32.partialorder %v3749_v42, 0.0  ;;  %v3758_v0 = vmul.f32 0.2, %v3749_v42 }
 0x6ca   :  { %v3762_v19 = vsel %vm3754_vm5, %v3749_v42, %v3758_v0 }
 0x6cb   :  { %v3770_v50 = vmul.f32 %v3766_v15, %v3762_v19 }
 0x6cd   :  { %v3797_v59 = vsel %vm3771_vm6, 0.0, %v3770_v50  ;;  %v3777_v54 = vsel %vm3771_vm6, %v3770_v50, 0.0 }
 0x6ce   :  { %v3803_v37 = vsel %vm1176_vm3, %v3797_v59, 0.0  ;;  %v3783_v7 = vsel %vm1176_vm3, %v3777_v54, 0.0  ;;  %vm3815_vm3 = vcmp.eq.s32.totalorder %v6446_v62, 1 }
 0x6cf   :  { %v3804_v58 = vadd.f32 %v3803_v37, %v3802_v4  ;;  %v3784_v5 = vadd.f32 %v3783_v7, %v3782_v53 }
 0x6d1   :  { %3805 = vadd.xlane.f32.xlu1 %v3804_v58  ;;  %3785 = vadd.xlane.f32.xlu0 %v3784_v5 }
 0x744   :  { %v3806_v48 = vpop.xlane.xlu1 %3805  ;;  %v3786_v3 = vpop.xlane.xlu0 %3785 }
 0x745   :  { %v3807_v45 = vrot.slane %v3806_v48, 4  ;;  %v3787_v35 = vrot.slane %v3786_v3, 4 }
 0x747   :  { %v3808_v33 = vadd.f32 %v3807_v45, %v3806_v48  ;;  %v3788_v63 = vadd.f32 %v3787_v35, %v3786_v3 }
 0x749   :  { %v3809_v24 = vrot.slane %v3808_v33, 2  ;;  %v3789_v51 = vrot.slane %v3788_v63, 2 }
 0x74b   :  { %v3810_v22 = vadd.f32 %v3809_v24, %v3808_v33  ;;  %v3790_v29 = vadd.f32 %v3789_v51, %v3788_v63 }
 0x74d   :  { %v3791_v16 = vrot.slane %v3790_v29, 1  ;;  %v3811_v31 = vrot.slane %v3810_v22, 1 }
 0x74f   :  { %v3792_v28 = vadd.f32 %v3791_v16, %v3790_v29  ;;  %v3812_v23 = vadd.f32 %v3811_v31, %v3810_v22 }
 0x751   :  { %4139 = vpush %v3792_v28 }
 0x752   :  { %4141 = vpush %v3812_v23 }
 0x753   :  { %4143 = vpush %v3820_v56 }
 0x782   :  { %s4140_s25 = spop %4139 }
 0x783   :  { %v3818_v61 = vstv %s4140_s25  ;;  %s4142_s26 = spop %4141 }
 0x784   :  { %v3816_v32 = vstv %s4142_s26  ;;  %s4144_s27 = spop %4143 }
 0x785   :  { %v3817_v44 = vsel %vm3815_vm3, %v3816_v32, 0.0  ;;  %v3823_v14 = vstv %s4144_s27 }
 0x786   :  { %v3819_v21 = vsel %vm3814_vm7, %v3818_v61, %v3817_v44 }
 0x787   :  { %v3825_v36 = vadd.f32 %v3823_v14, %v3819_v21 }
 0x789   :  { %3826 = vst [vmem:[%s6412_s4] sm:$0xff] %v3825_v36 }

</bundles_post_ra>
